<compile_context>
chip_gen: v7x
topology: tpu7x:2x2x1
jax: 0.10.0
libtpu: 0.0.40
codegen_flags: <defaults>
</compile_context>

<pallas_src>
import math
import functools

import jax
import jax.numpy as jnp
from jax import lax
from jax.experimental import pallas as pl
from jax.experimental.pallas import tpu as pltpu


# ----------------------------- in-kernel helpers ------------------------------

def _ln(x, g, b, eps):
    mean = jnp.mean(x, axis=-1, keepdims=True)
    c = x - mean
    var = jnp.mean(c * c, axis=-1, keepdims=True)
    return c * lax.rsqrt(var + eps) * g + b


def _mha_proj(q, k, v, wo, add_mask, H, dh, scale):
    """Multi-head attention on flattened [rows, D] tensors, fused with the output proj.

    q:[Rq,D] k,v:[Rk,D] wo:[D,D] add_mask:[Rq,Rk] (0 / -1e30, encodes batch separation
    and causality). Returns attention @ wo : [Rq, D] (bias added by caller)."""
    acc = None
    for h in range(H):
        sl = slice(h * dh, (h + 1) * dh)
        s = lax.dot_general(q[:, sl], k[:, sl], (((1,), (1,)), ((), ())),
                            preferred_element_type=jnp.float32) * scale + add_mask
        mx = jnp.max(s, axis=-1, keepdims=True)
        p = jnp.exp(s - mx)
        l = jnp.sum(p, axis=-1, keepdims=True)
        oh = jnp.dot(p, v[:, sl], preferred_element_type=jnp.float32)
        oh = oh * pl.reciprocal(l, approx=True)
        contrib = jnp.dot(oh, wo[sl, :], preferred_element_type=jnp.float32)
        acc = contrib if acc is None else acc + contrib
    return acc


# ------------------------------- Pallas kernels --------------------------------

def _embed_kernel(src_ref, tgt_ref, inpw_ref, inpb_ref, convw_ref, convb_ref,
                  pes_ref, pet_ref, srce_ref, tgte_ref, *, sqrt_d):
    w = inpw_ref[...]
    b = inpb_ref[...]
    es = (jnp.dot(src_ref[...], w, preferred_element_type=jnp.float32) + b) * sqrt_d
    et = (jnp.dot(tgt_ref[...], w, preferred_element_type=jnp.float32) + b) * sqrt_d
    # target path: projection + positional encoding only
    tgte_ref[...] = et + pet_ref[...]
    # source path: Conv1d(k=1) + tanh (pointwise channel mixing), then positional enc.
    srce_ref[...] = jnp.tanh(
        jnp.dot(es, convw_ref[...], preferred_element_type=jnp.float32) + convb_ref[...]
    ) + pes_ref[...]


def _encoder_layer_kernel(x_ref, mask_ref,
                          wqkv_ref, bqkv_ref, wo_ref, bo_ref,
                          ln1g_ref, ln1b_ref,
                          w1_ref, b1_ref, w2_ref, b2_ref,
                          ln2g_ref, ln2b_ref,
                          o_ref, *, D, H, dh, scale, eps):
    x = x_ref[...]
    qkv = jnp.dot(x, wqkv_ref[...], preferred_element_type=jnp.float32) + bqkv_ref[...]
    a = _mha_proj(qkv[:, :D], qkv[:, D:2 * D], qkv[:, 2 * D:],
                  wo_ref[...], mask_ref[...], H, dh, scale) + bo_ref[...]
    x = _ln(x + a, ln1g_ref[...], ln1b_ref[...], eps)
    h1 = jnp.maximum(
        jnp.dot(x, w1_ref[...], preferred_element_type=jnp.float32) + b1_ref[...], 0.0)
    f = jnp.dot(h1, w2_ref[...], preferred_element_type=jnp.float32) + b2_ref[...]
    o_ref[...] = _ln(x + f, ln2g_ref[...], ln2b_ref[...], eps)


def _decoder_head_kernel(y_ref, mem_ref, smask_ref, cmask_ref,
                         encg_ref, encb_ref,
                         swqkv_ref, sbqkv_ref, swo_ref, sbo_ref, ln1g_ref, ln1b_ref,
                         cwq_ref, cbq_ref, cwkv_ref, cbkv_ref, cwo_ref, cbo_ref,
                         ln2g_ref, ln2b_ref,
                         w1_ref, b1_ref, w2_ref, b2_ref, ln3g_ref, ln3b_ref,
                         decg_ref, decb_ref, outw_ref, outb_ref,
                         o_ref, *, D, H, dh, scale, eps, B):
    # final encoder norm applied to the memory
    mem = _ln(mem_ref[...], encg_ref[...], encb_ref[...], eps)
    y = y_ref[...]

    # masked (causal + batch) self-attention
    qkv = jnp.dot(y, swqkv_ref[...], preferred_element_type=jnp.float32) + sbqkv_ref[...]
    a = _mha_proj(qkv[:, :D], qkv[:, D:2 * D], qkv[:, 2 * D:],
                  swo_ref[...], smask_ref[...], H, dh, scale) + sbo_ref[...]
    y = _ln(y + a, ln1g_ref[...], ln1b_ref[...], eps)

    # cross-attention (queries from tgt, keys/values from encoder memory)
    qc = jnp.dot(y, cwq_ref[...], preferred_element_type=jnp.float32) + cbq_ref[...]
    kv = jnp.dot(mem, cwkv_ref[...], preferred_element_type=jnp.float32) + cbkv_ref[...]
    a = _mha_proj(qc, kv[:, :D], kv[:, D:],
                  cwo_ref[...], cmask_ref[...], H, dh, scale) + cbo_ref[...]
    y = _ln(y + a, ln2g_ref[...], ln2b_ref[...], eps)

    # FFN
    h1 = jnp.maximum(
        jnp.dot(y, w1_ref[...], preferred_element_type=jnp.float32) + b1_ref[...], 0.0)
    f = jnp.dot(h1, w2_ref[...], preferred_element_type=jnp.float32) + b2_ref[...]
    y = _ln(y + f, ln3g_ref[...], ln3b_ref[...], eps)

    # final decoder norm
    y = _ln(y, decg_ref[...], decb_ref[...], eps)

    # output head: only time step 0 (rows 0..B-1 in the L-major flattened layout),
    # D -> 1 projection done as a row-wise reduce (avoids an N=1 matmul).
    y0 = y[:B, :]
    o_ref[...] = jnp.sum(y0 * outw_ref[...], axis=-1, keepdims=True) + outb_ref[...]


# --------------------------- pallas_call plumbing ------------------------------

def _full_spec_from_shape(shape):
    nd = len(shape)
    return pl.BlockSpec(tuple(shape), lambda i, _nd=nd: (0,) * _nd)


def _fused_call(kernel, out_shape, inputs):
    """grid=(1,) whole-array-in-VMEM pallas_call (everything fits easily at these sizes)."""
    in_specs = [_full_spec_from_shape(a.shape) for a in inputs]
    if isinstance(out_shape, (tuple, list)):
        out_shape = tuple(out_shape)
        out_specs = tuple(_full_spec_from_shape(o.shape) for o in out_shape)
    else:
        out_specs = _full_spec_from_shape(out_shape.shape)
    return pl.pallas_call(
        kernel,
        out_shape=out_shape,
        grid=(1,),
        in_specs=in_specs,
        out_specs=out_specs,
        compiler_params=pltpu.CompilerParams(dimension_semantics=("arbitrary",)),
    )(*inputs)


# ------------------------------- host-side prep --------------------------------

def sinusoidal_pe(max_len, d_model):
    pos = jnp.arange(max_len, dtype=jnp.float32)[:, None]
    div = jnp.exp(jnp.arange(0, d_model, 2, dtype=jnp.float32)
                  * (-math.log(10000.0) / d_model))
    pe = jnp.zeros((max_len, d_model), dtype=jnp.float32)
    pe = pe.at[:, 0::2].set(jnp.sin(pos * div))
    pe = pe.at[:, 1::2].set(jnp.cos(pos * div))
    return pe


def _additive_mask(rq, rk, B, causal=False):
    """Additive mask for the flattened (time-major) row layout: row = t*B + b.
    0 where attention is allowed (same batch element, and key_t <= query_t if causal),
    -1e30 otherwise."""
    bq = jnp.arange(rq) % B
    bk = jnp.arange(rk) % B
    ok = bq[:, None] == bk[None, :]
    if causal:
        ok = ok & ((jnp.arange(rk) // B)[None, :] <= (jnp.arange(rq) // B)[:, None])
    return jnp.where(ok, 0.0, -1e30).astype(jnp.float32)


# --------------------------------- forward -------------------------------------

def transam_forward(src, params, *, d_model, nhead, tgt_len=3, max_len=100):
    # src: [batch, seq_len, feature_dim]  (reference forward starts with permute(1,0,2))
    src = jnp.transpose(src, (1, 0, 2)).astype(jnp.float32)  # [L, B, F]
    L, B, F = src.shape
    D, H = d_model, nhead
    dh = D // H
    Lt = tgt_len
    R, Rt = L * B, Lt * B
    scale = 1.0 / math.sqrt(dh)
    eps = 1e-5

    src2 = src.reshape(R, F)
    tgt2 = src[L - Lt:].reshape(Rt, F)  # tgt = src[-3:]

    pe = sinusoidal_pe(max_len, D)
    pe_s = jnp.broadcast_to(pe[:L, None, :], (L, B, D)).reshape(R, D)
    pe_t = jnp.broadcast_to(pe[:Lt, None, :], (Lt, B, D)).reshape(Rt, D)

    enc_mask = _additive_mask(R, R, B)                 # batch separation only
    self_mask = _additive_mask(Rt, Rt, B, causal=True)  # tgt_mask + batch separation
    cross_mask = _additive_mask(Rt, R, B)              # batch separation only

    # ---- call 1: fused embedding ------------------------------------------------
    src_e, tgt_e = _fused_call(
        functools.partial(_embed_kernel, sqrt_d=math.sqrt(D)),
        (jax.ShapeDtypeStruct((R, D), jnp.float32),
         jax.ShapeDtypeStruct((Rt, D), jnp.float32)),
        [src2, tgt2, params["inp_w"], params["inp_b"],
         params["conv_w"], params["conv_b"], pe_s, pe_t])

    # ---- calls 2-4: fused post-norm encoder layers -------------------------------
    enc_kernel = functools.partial(_encoder_layer_kernel,
                                   D=D, H=H, dh=dh, scale=scale, eps=eps)
    x = src_e
    for p in params["enc"]:
        x = _fused_call(
            enc_kernel, jax.ShapeDtypeStruct((R, D), jnp.float32),
            [x, enc_mask,
             p["wqkv"], p["bqkv"], p["wo"], p["bo"],
             p["ln1_g"], p["ln1_b"],
             p["w1"], p["b1"], p["w2"], p["b2"],
             p["ln2_g"], p["ln2_b"]])

    # ---- call 5: encoder final LN + decoder layer + decoder final LN + head -------
    # TODO(synk): only dec_seq_len=1 (the module default) is supported in this fused path.
    pd = params["dec"]
    out = _fused_call(
        functools.partial(_decoder_head_kernel,
                          D=D, H=H, dh=dh, scale=scale, eps=eps, B=B),
        jax.ShapeDtypeStruct((B, 1), jnp.float32),
        [tgt_e, x, self_mask, cross_mask,
         params["enc_norm_g"], params["enc_norm_b"],
         pd["s_wqkv"], pd["s_bqkv"], pd["s_wo"], pd["s_bo"], pd["ln1_g"], pd["ln1_b"],
         pd["c_wq"], pd["c_bq"], pd["c_wkv"], pd["c_bkv"], pd["c_wo"], pd["c_bo"],
         pd["ln2_g"], pd["ln2_b"],
         pd["w1"], pd["b1"], pd["w2"], pd["b2"], pd["ln3_g"], pd["ln3_b"],
         params["dec_norm_g"], params["dec_norm_b"],
         params["out_w"], params["out_b"]])
    return out  # [batch, 1]


# --------------------------- deterministic init ---------------------------------

def init_params(key, F, D, d_ff, n_enc):
    keys = jax.random.split(key, 64)
    it = iter(keys)

    def nrm(shape):
        return (0.05 * jax.random.normal(next(it), shape)).astype(jnp.float32)

    def zeros(*shape):
        return jnp.zeros(shape, jnp.float32)

    def ones(*shape):
        return jnp.ones(shape, jnp.float32)

    def enc_layer():
        return dict(
            wqkv=nrm((D, 3 * D)), bqkv=zeros(1, 3 * D),
            wo=nrm((D, D)), bo=zeros(1, D),
            ln1_g=ones(1, D), ln1_b=zeros(1, D),
            w1=nrm((D, d_ff)), b1=zeros(1, d_ff),
            w2=nrm((d_ff, D)), b2=zeros(1, D),
            ln2_g=ones(1, D), ln2_b=zeros(1, D),
        )

    dec = dict(
        s_wqkv=nrm((D, 3 * D)), s_bqkv=zeros(1, 3 * D),
        s_wo=nrm((D, D)), s_bo=zeros(1, D),
        ln1_g=ones(1, D), ln1_b=zeros(1, D),
        c_wq=nrm((D, D)), c_bq=zeros(1, D),
        c_wkv=nrm((D, 2 * D)), c_bkv=zeros(1, 2 * D),
        c_wo=nrm((D, D)), c_bo=zeros(1, D),
        ln2_g=ones(1, D), ln2_b=zeros(1, D),
        w1=nrm((D, d_ff)), b1=zeros(1, d_ff),
        w2=nrm((d_ff, D)), b2=zeros(1, D),
        ln3_g=ones(1, D), ln3_b=zeros(1, D),
    )

    return dict(
        inp_w=nrm((F, D)), inp_b=zeros(1, D),
        conv_w=nrm((D, D)), conv_b=zeros(1, D),
        enc=[enc_layer() for _ in range(n_enc)],
        enc_norm_g=ones(1, D), enc_norm_b=zeros(1, D),
        dec=dec,
        dec_norm_g=ones(1, D), dec_norm_b=zeros(1, D),
        out_w=nrm((1, D)), out_b=zeros(1, 1),
    )


# ----------------------------------- main ---------------------------------------

if __name__ == "__main__":
    # small, module-consistent shapes:
    B, L, F = 2, 8, 4            # batch, seq_len, feature_dim
    D, H, D_FF = 64, 8, 128      # d_model, nhead (nn.Transformer uses 8), FFN width (scaled down)
    N_ENC = 3                    # num_layers=3 encoder layers; dec_seq_len=1 decoder layer

    key = jax.random.PRNGKey(0)
    k_param, k_data = jax.random.split(key)

    params = init_params(k_param, F, D, D_FF, N_ENC)
    src = jax.random.normal(k_data, (B, L, F), dtype=jnp.float32)

    fwd = jax.jit(functools.partial(transam_forward, d_model=D, nhead=H))
    out = jax.block_until_ready(fwd(src, params))

    assert out.shape == (B, 1), out.shape
    assert bool(jnp.all(jnp.isfinite(out)))
    print("KERNEL_OK")
</pallas_src>

<mosaic_0001>
module attributes {stable_mosaic.version = 11 : i64} {
  func.func @_embed_kernel(%arg0: i32, %arg1: memref<16x4xf32, #tpu.memory_space<vmem>>, %arg2: memref<6x4xf32, #tpu.memory_space<vmem>>, %arg3: memref<4x64xf32, #tpu.memory_space<vmem>>, %arg4: memref<1x64xf32, #tpu.memory_space<vmem>>, %arg5: memref<64x64xf32, #tpu.memory_space<vmem>>, %arg6: memref<1x64xf32, #tpu.memory_space<vmem>>, %arg7: memref<16x64xf32, #tpu.memory_space<vmem>>, %arg8: memref<6x64xf32, #tpu.memory_space<vmem>>, %arg9: memref<16x64xf32, #tpu.memory_space<vmem>>, %arg10: memref<6x64xf32, #tpu.memory_space<vmem>>) attributes {dimension_semantics = [#tpu.dimension_semantics<arbitrary>], iteration_bounds = array<i64: 1>, scalar_prefetch = 0 : i64, scratch_operands = 0 : i64, tpu.core_type = #tpu.core_type<tc>, window_params = [{pipeline_mode = #tpu.pipeline_mode<synchronous>, transform_indices = @transform_0, window_bounds = array<i64: 16, 4>}, {pipeline_mode = #tpu.pipeline_mode<synchronous>, transform_indices = @transform_1, window_bounds = array<i64: 6, 4>}, {pipeline_mode = #tpu.pipeline_mode<synchronous>, transform_indices = @transform_2, window_bounds = array<i64: 4, 64>}, {pipeline_mode = #tpu.pipeline_mode<synchronous>, transform_indices = @transform_3, window_bounds = array<i64: 1, 64>}, {pipeline_mode = #tpu.pipeline_mode<synchronous>, transform_indices = @transform_4, window_bounds = array<i64: 64, 64>}, {pipeline_mode = #tpu.pipeline_mode<synchronous>, transform_indices = @transform_5, window_bounds = array<i64: 1, 64>}, {pipeline_mode = #tpu.pipeline_mode<synchronous>, transform_indices = @transform_6, window_bounds = array<i64: 16, 64>}, {pipeline_mode = #tpu.pipeline_mode<synchronous>, transform_indices = @transform_7, window_bounds = array<i64: 6, 64>}, {pipeline_mode = #tpu.pipeline_mode<synchronous>, transform_indices = @transform_8, window_bounds = array<i64: 16, 64>}, {pipeline_mode = #tpu.pipeline_mode<synchronous>, transform_indices = @transform_9, window_bounds = array<i64: 6, 64>}]} {
    %c0 = arith.constant 0 : index
    %c0_0 = arith.constant 0 : index
    %0 = vector.load %arg3[%c0, %c0_0] : memref<4x64xf32, #tpu.memory_space<vmem>>, vector<4x64xf32>
    %c0_1 = arith.constant 0 : index
    %c0_2 = arith.constant 0 : index
    %1 = vector.load %arg4[%c0_1, %c0_2] : memref<1x64xf32, #tpu.memory_space<vmem>>, vector<1x64xf32>
    %c0_3 = arith.constant 0 : index
    %c0_4 = arith.constant 0 : index
    %2 = vector.load %arg1[%c0_3, %c0_4] : memref<16x4xf32, #tpu.memory_space<vmem>>, vector<16x4xf32>
    %cst = arith.constant dense<0.000000e+00> : vector<16x64xf32>
    %3 = tpu.matmul %2, %0, %cst {dimension_numbers = #tpu.dot_dimension_numbers<[1], [0], [0], [1], [0, 0, 1, 1], [], []>} : vector<16x4xf32>, vector<4x64xf32>, vector<16x64xf32> -> vector<16x64xf32>
    %4 = vector.broadcast %1 : vector<1x64xf32> to vector<16x64xf32>
    %5 = arith.addf %3, %4 : vector<16x64xf32>
    %cst_5 = arith.constant 8.000000e+00 : f32
    %6 = vector.broadcast %cst_5 : f32 to vector<16x64xf32>
    %7 = arith.mulf %5, %6 : vector<16x64xf32>
    %c0_6 = arith.constant 0 : index
    %c0_7 = arith.constant 0 : index
    %8 = vector.load %arg2[%c0_6, %c0_7] : memref<6x4xf32, #tpu.memory_space<vmem>>, vector<6x4xf32>
    %cst_8 = arith.constant dense<0.000000e+00> : vector<6x64xf32>
    %9 = tpu.matmul %8, %0, %cst_8 {dimension_numbers = #tpu.dot_dimension_numbers<[1], [0], [0], [1], [0, 0, 1, 1], [], []>} : vector<6x4xf32>, vector<4x64xf32>, vector<6x64xf32> -> vector<6x64xf32>
    %10 = vector.broadcast %1 : vector<1x64xf32> to vector<6x64xf32>
    %11 = arith.addf %9, %10 : vector<6x64xf32>
    %cst_9 = arith.constant 8.000000e+00 : f32
    %12 = vector.broadcast %cst_9 : f32 to vector<6x64xf32>
    %13 = arith.mulf %11, %12 : vector<6x64xf32>
    %c0_10 = arith.constant 0 : index
    %c0_11 = arith.constant 0 : index
    %14 = vector.load %arg8[%c0_10, %c0_11] : memref<6x64xf32, #tpu.memory_space<vmem>>, vector<6x64xf32>
    %15 = arith.addf %13, %14 : vector<6x64xf32>
    %c0_12 = arith.constant 0 : index
    %c0_13 = arith.constant 0 : index
    %16 = vector.load %arg10[%c0_12, %c0_13] : memref<6x64xf32, #tpu.memory_space<vmem>>, vector<6x64xf32>
    tpu.vector_store %arg10[%c0_12, %c0_13], %15 {strides = array<i32>} : memref<6x64xf32, #tpu.memory_space<vmem>>, vector<6x64xf32>,
    %c0_14 = arith.constant 0 : index
    %c0_15 = arith.constant 0 : index
    %17 = vector.load %arg5[%c0_14, %c0_15] : memref<64x64xf32, #tpu.memory_space<vmem>>, vector<64x64xf32>
    %cst_16 = arith.constant dense<0.000000e+00> : vector<16x64xf32>
    %18 = tpu.matmul %7, %17, %cst_16 {dimension_numbers = #tpu.dot_dimension_numbers<[1], [0], [0], [1], [0, 0, 1, 1], [], []>} : vector<16x64xf32>, vector<64x64xf32>, vector<16x64xf32> -> vector<16x64xf32>
    %c0_17 = arith.constant 0 : index
    %c0_18 = arith.constant 0 : index
    %19 = vector.load %arg6[%c0_17, %c0_18] : memref<1x64xf32, #tpu.memory_space<vmem>>, vector<1x64xf32>
    %20 = vector.broadcast %19 : vector<1x64xf32> to vector<16x64xf32>
    %21 = arith.addf %18, %20 : vector<16x64xf32>
    %22 = math.tanh %21 : vector<16x64xf32>
    %c0_19 = arith.constant 0 : index
    %c0_20 = arith.constant 0 : index
    %23 = vector.load %arg7[%c0_19, %c0_20] : memref<16x64xf32, #tpu.memory_space<vmem>>, vector<16x64xf32>
    %24 = arith.addf %22, %23 : vector<16x64xf32>
    %c0_21 = arith.constant 0 : index
    %c0_22 = arith.constant 0 : index
    %25 = vector.load %arg9[%c0_21, %c0_22] : memref<16x64xf32, #tpu.memory_space<vmem>>, vector<16x64xf32>
    tpu.vector_store %arg9[%c0_21, %c0_22], %24 {strides = array<i32>} : memref<16x64xf32, #tpu.memory_space<vmem>>, vector<16x64xf32>,
    return
  }
  func.func @transform_0(%arg0: i32) -> (i32, i32) {
    %c0_i32 = arith.constant 0 : i32
    %c0_i32_0 = arith.constant 0 : i32
    %c0_i32_1 = arith.constant 0 : i32
    return %c0_i32, %c0_i32_0 : i32, i32
  }
  func.func @transform_1(%arg0: i32) -> (i32, i32) {
    %c0_i32 = arith.constant 0 : i32
    %c0_i32_0 = arith.constant 0 : i32
    %c0_i32_1 = arith.constant 0 : i32
    return %c0_i32, %c0_i32_0 : i32, i32
  }
  func.func @transform_2(%arg0: i32) -> (i32, i32) {
    %c0_i32 = arith.constant 0 : i32
    %c0_i32_0 = arith.constant 0 : i32
    %c0_i32_1 = arith.constant 0 : i32
    return %c0_i32, %c0_i32_0 : i32, i32
  }
  func.func @transform_3(%arg0: i32) -> (i32, i32) {
    %c0_i32 = arith.constant 0 : i32
    %c0_i32_0 = arith.constant 0 : i32
    %c0_i32_1 = arith.constant 0 : i32
    return %c0_i32, %c0_i32_0 : i32, i32
  }
  func.func @transform_4(%arg0: i32) -> (i32, i32) {
    %c0_i32 = arith.constant 0 : i32
    %c0_i32_0 = arith.constant 0 : i32
    %c0_i32_1 = arith.constant 0 : i32
    return %c0_i32, %c0_i32_0 : i32, i32
  }
  func.func @transform_5(%arg0: i32) -> (i32, i32) {
    %c0_i32 = arith.constant 0 : i32
    %c0_i32_0 = arith.constant 0 : i32
    %c0_i32_1 = arith.constant 0 : i32
    return %c0_i32, %c0_i32_0 : i32, i32
  }
  func.func @transform_6(%arg0: i32) -> (i32, i32) {
    %c0_i32 = arith.constant 0 : i32
    %c0_i32_0 = arith.constant 0 : i32
    %c0_i32_1 = arith.constant 0 : i32
    return %c0_i32, %c0_i32_0 : i32, i32
  }
  func.func @transform_7(%arg0: i32) -> (i32, i32) {
    %c0_i32 = arith.constant 0 : i32
    %c0_i32_0 = arith.constant 0 : i32
    %c0_i32_1 = arith.constant 0 : i32
    return %c0_i32, %c0_i32_0 : i32, i32
  }
  func.func @transform_8(%arg0: i32) -> (i32, i32) {
    %c0_i32 = arith.constant 0 : i32
    %c0_i32_0 = arith.constant 0 : i32
    %c0_i32_1 = arith.constant 0 : i32
    return %c0_i32, %c0_i32_0 : i32, i32
  }
  func.func @transform_9(%arg0: i32) -> (i32, i32) {
    %c0_i32 = arith.constant 0 : i32
    %c0_i32_0 = arith.constant 0 : i32
    %c0_i32_1 = arith.constant 0 : i32
    return %c0_i32, %c0_i32_0 : i32, i32
  }
}

module attributes {stable_mosaic.version = 11 : i64} {
  func.func @_encoder_layer_kernel(%arg0: i32, %arg1: memref<16x64xf32, #tpu.memory_space<vmem>>, %arg2: memref<16x16xf32, #tpu.memory_space<vmem>>, %arg3: memref<64x192xf32, #tpu.memory_space<vmem>>, %arg4: memref<1x192xf32, #tpu.memory_space<vmem>>, %arg5: memref<64x64xf32, #tpu.memory_space<vmem>>, %arg6: memref<1x64xf32, #tpu.memory_space<vmem>>, %arg7: memref<1x64xf32, #tpu.memory_space<vmem>>, %arg8: memref<1x64xf32, #tpu.memory_space<vmem>>, %arg9: memref<64x128xf32, #tpu.memory_space<vmem>>, %arg10: memref<1x128xf32, #tpu.memory_space<vmem>>, %arg11: memref<128x64xf32, #tpu.memory_space<vmem>>, %arg12: memref<1x64xf32, #tpu.memory_space<vmem>>, %arg13: memref<1x64xf32, #tpu.memory_space<vmem>>, %arg14: memref<1x64xf32, #tpu.memory_space<vmem>>, %arg15: memref<16x64xf32, #tpu.memory_space<vmem>>) attributes {dimension_semantics = [#tpu.dimension_semantics<arbitrary>], iteration_bounds = array<i64: 1>, scalar_prefetch = 0 : i64, scratch_operands = 0 : i64, tpu.core_type = #tpu.core_type<tc>, window_params = [{pipeline_mode = #tpu.pipeline_mode<synchronous>, transform_indices = @transform_0, window_bounds = array<i64: 16, 64>}, {pipeline_mode = #tpu.pipeline_mode<synchronous>, transform_indices = @transform_1, window_bounds = array<i64: 16, 16>}, {pipeline_mode = #tpu.pipeline_mode<synchronous>, transform_indices = @transform_2, window_bounds = array<i64: 64, 192>}, {pipeline_mode = #tpu.pipeline_mode<synchronous>, transform_indices = @transform_3, window_bounds = array<i64: 1, 192>}, {pipeline_mode = #tpu.pipeline_mode<synchronous>, transform_indices = @transform_4, window_bounds = array<i64: 64, 64>}, {pipeline_mode = #tpu.pipeline_mode<synchronous>, transform_indices = @transform_5, window_bounds = array<i64: 1, 64>}, {pipeline_mode = #tpu.pipeline_mode<synchronous>, transform_indices = @transform_6, window_bounds = array<i64: 1, 64>}, {pipeline_mode = #tpu.pipeline_mode<synchronous>, transform_indices = @transform_7, window_bounds = array<i64: 1, 64>}, {pipeline_mode = #tpu.pipeline_mode<synchronous>, transform_indices = @transform_8, window_bounds = array<i64: 64, 128>}, {pipeline_mode = #tpu.pipeline_mode<synchronous>, transform_indices = @transform_9, window_bounds = array<i64: 1, 128>}, {pipeline_mode = #tpu.pipeline_mode<synchronous>, transform_indices = @transform_10, window_bounds = array<i64: 128, 64>}, {pipeline_mode = #tpu.pipeline_mode<synchronous>, transform_indices = @transform_11, window_bounds = array<i64: 1, 64>}, {pipeline_mode = #tpu.pipeline_mode<synchronous>, transform_indices = @transform_12, window_bounds = array<i64: 1, 64>}, {pipeline_mode = #tpu.pipeline_mode<synchronous>, transform_indices = @transform_13, window_bounds = array<i64: 1, 64>}, {pipeline_mode = #tpu.pipeline_mode<synchronous>, transform_indices = @transform_14, window_bounds = array<i64: 16, 64>}]} {
    %c0 = arith.constant 0 : index
    %c0_0 = arith.constant 0 : index
    %0 = vector.load %arg1[%c0, %c0_0] : memref<16x64xf32, #tpu.memory_space<vmem>>, vector<16x64xf32>
    %c0_1 = arith.constant 0 : index
    %c0_2 = arith.constant 0 : index
    %1 = vector.load %arg3[%c0_1, %c0_2] : memref<64x192xf32, #tpu.memory_space<vmem>>, vector<64x192xf32>
    %cst = arith.constant dense<0.000000e+00> : vector<16x192xf32>
    %2 = tpu.matmul %0, %1, %cst {dimension_numbers = #tpu.dot_dimension_numbers<[1], [0], [0], [1], [0, 0, 1, 1], [], []>} : vector<16x64xf32>, vector<64x192xf32>, vector<16x192xf32> -> vector<16x192xf32>
    %c0_3 = arith.constant 0 : index
    %c0_4 = arith.constant 0 : index
    %3 = vector.load %arg4[%c0_3, %c0_4] : memref<1x192xf32, #tpu.memory_space<vmem>>, vector<1x192xf32>
    %4 = vector.broadcast %3 : vector<1x192xf32> to vector<16x192xf32>
    %5 = arith.addf %2, %4 : vector<16x192xf32>
    %6 = vector.extract_strided_slice %5 {offsets = [0, 0], sizes = [16, 64], strides = [1, 1]} : vector<16x192xf32> to vector<16x64xf32>
    %7 = vector.extract_strided_slice %5 {offsets = [0, 64], sizes = [16, 64], strides = [1, 1]} : vector<16x192xf32> to vector<16x64xf32>
    %8 = vector.extract_strided_slice %5 {offsets = [0, 128], sizes = [16, 64], strides = [1, 1]} : vector<16x192xf32> to vector<16x64xf32>
    %c0_5 = arith.constant 0 : index
    %c0_6 = arith.constant 0 : index
    %9 = vector.load %arg5[%c0_5, %c0_6] : memref<64x64xf32, #tpu.memory_space<vmem>>, vector<64x64xf32>
    %c0_7 = arith.constant 0 : index
    %c0_8 = arith.constant 0 : index
    %10 = vector.load %arg2[%c0_7, %c0_8] : memref<16x16xf32, #tpu.memory_space<vmem>>, vector<16x16xf32>
    %11 = vector.extract_strided_slice %6 {offsets = [0, 0], sizes = [16, 8], strides = [1, 1]} : vector<16x64xf32> to vector<16x8xf32>
    %12 = vector.extract_strided_slice %7 {offsets = [0, 0], sizes = [16, 8], strides = [1, 1]} : vector<16x64xf32> to vector<16x8xf32>
    %cst_9 = arith.constant dense<0.000000e+00> : vector<16x16xf32>
    %13 = tpu.matmul %11, %12, %cst_9 {dimension_numbers = #tpu.dot_dimension_numbers<[1], [1], [0], [0], [0, 0, 1, 0], [], []>} : vector<16x8xf32>, vector<16x8xf32>, vector<16x16xf32> -> vector<16x16xf32>
    %cst_10 = arith.constant 0.353553385 : f32
    %14 = vector.broadcast %cst_10 : f32 to vector<16x16xf32>
    %15 = arith.mulf %13, %14 : vector<16x16xf32>
    %16 = arith.addf %15, %10 : vector<16x16xf32>
    %cst_11 = arith.constant dense<0xFF800000> : vector<16xf32>
    %17 = vector.multi_reduction <maximumf>, %16, %cst_11 [1] : vector<16x16xf32> to vector<16xf32>
    %18 = vector.shape_cast %17 : vector<16xf32> to vector<16x1xf32>
    %19 = vector.broadcast %18 : vector<16x1xf32> to vector<16x16xf32>
    %20 = arith.subf %16, %19 : vector<16x16xf32>
    %21 = math.exp %20 : vector<16x16xf32>
    %cst_12 = arith.constant dense<0.000000e+00> : vector<16xf32>
    %22 = vector.multi_reduction <add>, %21, %cst_12 [1] : vector<16x16xf32> to vector<16xf32>
    %23 = vector.shape_cast %22 : vector<16xf32> to vector<16x1xf32>
    %24 = vector.extract_strided_slice %8 {offsets = [0, 0], sizes = [16, 8], strides = [1, 1]} : vector<16x64xf32> to vector<16x8xf32>
    %cst_13 = arith.constant dense<0.000000e+00> : vector<16x8xf32>
    %25 = tpu.matmul %21, %24, %cst_13 {dimension_numbers = #tpu.dot_dimension_numbers<[1], [0], [0], [1], [0, 0, 1, 1], [], []>} : vector<16x16xf32>, vector<16x8xf32>, vector<16x8xf32> -> vector<16x8xf32>
    %26 = tpu.reciprocal %23 {approx = true} : vector<16x1xf32> -> vector<16x1xf32>
    %27 = vector.broadcast %26 : vector<16x1xf32> to vector<16x8xf32>
    %28 = arith.mulf %25, %27 : vector<16x8xf32>
    %29 = vector.extract_strided_slice %9 {offsets = [0, 0], sizes = [8, 64], strides = [1, 1]} : vector<64x64xf32> to vector<8x64xf32>
    %cst_14 = arith.constant dense<0.000000e+00> : vector<16x64xf32>
    %30 = tpu.matmul %28, %29, %cst_14 {dimension_numbers = #tpu.dot_dimension_numbers<[1], [0], [0], [1], [0, 0, 1, 1], [], []>} : vector<16x8xf32>, vector<8x64xf32>, vector<16x64xf32> -> vector<16x64xf32>
    %31 = vector.extract_strided_slice %6 {offsets = [0, 8], sizes = [16, 8], strides = [1, 1]} : vector<16x64xf32> to vector<16x8xf32>
    %32 = vector.extract_strided_slice %7 {offsets = [0, 8], sizes = [16, 8], strides = [1, 1]} : vector<16x64xf32> to vector<16x8xf32>
    %cst_15 = arith.constant dense<0.000000e+00> : vector<16x16xf32>
    %33 = tpu.matmul %31, %32, %cst_15 {dimension_numbers = #tpu.dot_dimension_numbers<[1], [1], [0], [0], [0, 0, 1, 0], [], []>} : vector<16x8xf32>, vector<16x8xf32>, vector<16x16xf32> -> vector<16x16xf32>
    %cst_16 = arith.constant 0.353553385 : f32
    %34 = vector.broadcast %cst_16 : f32 to vector<16x16xf32>
    %35 = arith.mulf %33, %34 : vector<16x16xf32>
    %36 = arith.addf %35, %10 : vector<16x16xf32>
    %cst_17 = arith.constant dense<0xFF800000> : vector<16xf32>
    %37 = vector.multi_reduction <maximumf>, %36, %cst_17 [1] : vector<16x16xf32> to vector<16xf32>
    %38 = vector.shape_cast %37 : vector<16xf32> to vector<16x1xf32>
    %39 = vector.broadcast %38 : vector<16x1xf32> to vector<16x16xf32>
    %40 = arith.subf %36, %39 : vector<16x16xf32>
    %41 = math.exp %40 : vector<16x16xf32>
    %cst_18 = arith.constant dense<0.000000e+00> : vector<16xf32>
    %42 = vector.multi_reduction <add>, %41, %cst_18 [1] : vector<16x16xf32> to vector<16xf32>
    %43 = vector.shape_cast %42 : vector<16xf32> to vector<16x1xf32>
    %44 = vector.extract_strided_slice %8 {offsets = [0, 8], sizes = [16, 8], strides = [1, 1]} : vector<16x64xf32> to vector<16x8xf32>
    %cst_19 = arith.constant dense<0.000000e+00> : vector<16x8xf32>
    %45 = tpu.matmul %41, %44, %cst_19 {dimension_numbers = #tpu.dot_dimension_numbers<[1], [0], [0], [1], [0, 0, 1, 1], [], []>} : vector<16x16xf32>, vector<16x8xf32>, vector<16x8xf32> -> vector<16x8xf32>
    %46 = tpu.reciprocal %43 {approx = true} : vector<16x1xf32> -> vector<16x1xf32>
    %47 = vector.broadcast %46 : vector<16x1xf32> to vector<16x8xf32>
    %48 = arith.mulf %45, %47 : vector<16x8xf32>
    %49 = vector.extract_strided_slice %9 {offsets = [8, 0], sizes = [8, 64], strides = [1, 1]} : vector<64x64xf32> to vector<8x64xf32>
    %cst_20 = arith.constant dense<0.000000e+00> : vector<16x64xf32>
    %50 = tpu.matmul %48, %49, %cst_20 {dimension_numbers = #tpu.dot_dimension_numbers<[1], [0], [0], [1], [0, 0, 1, 1], [], []>} : vector<16x8xf32>, vector<8x64xf32>, vector<16x64xf32> -> vector<16x64xf32>
    %51 = arith.addf %30, %50 : vector<16x64xf32>
    %52 = vector.extract_strided_slice %6 {offsets = [0, 16], sizes = [16, 8], strides = [1, 1]} : vector<16x64xf32> to vector<16x8xf32>
    %53 = vector.extract_strided_slice %7 {offsets = [0, 16], sizes = [16, 8], strides = [1, 1]} : vector<16x64xf32> to vector<16x8xf32>
    %cst_21 = arith.constant dense<0.000000e+00> : vector<16x16xf32>
    %54 = tpu.matmul %52, %53, %cst_21 {dimension_numbers = #tpu.dot_dimension_numbers<[1], [1], [0], [0], [0, 0, 1, 0], [], []>} : vector<16x8xf32>, vector<16x8xf32>, vector<16x16xf32> -> vector<16x16xf32>
    %cst_22 = arith.constant 0.353553385 : f32
    %55 = vector.broadcast %cst_22 : f32 to vector<16x16xf32>
    %56 = arith.mulf %54, %55 : vector<16x16xf32>
    %57 = arith.addf %56, %10 : vector<16x16xf32>
    %cst_23 = arith.constant dense<0xFF800000> : vector<16xf32>
    %58 = vector.multi_reduction <maximumf>, %57, %cst_23 [1] : vector<16x16xf32> to vector<16xf32>
    %59 = vector.shape_cast %58 : vector<16xf32> to vector<16x1xf32>
    %60 = vector.broadcast %59 : vector<16x1xf32> to vector<16x16xf32>
    %61 = arith.subf %57, %60 : vector<16x16xf32>
    %62 = math.exp %61 : vector<16x16xf32>
    %cst_24 = arith.constant dense<0.000000e+00> : vector<16xf32>
    %63 = vector.multi_reduction <add>, %62, %cst_24 [1] : vector<16x16xf32> to vector<16xf32>
    %64 = vector.shape_cast %63 : vector<16xf32> to vector<16x1xf32>
    %65 = vector.extract_strided_slice %8 {offsets = [0, 16], sizes = [16, 8], strides = [1, 1]} : vector<16x64xf32> to vector<16x8xf32>
    %cst_25 = arith.constant dense<0.000000e+00> : vector<16x8xf32>
    %66 = tpu.matmul %62, %65, %cst_25 {dimension_numbers = #tpu.dot_dimension_numbers<[1], [0], [0], [1], [0, 0, 1, 1], [], []>} : vector<16x16xf32>, vector<16x8xf32>, vector<16x8xf32> -> vector<16x8xf32>
    %67 = tpu.reciprocal %64 {approx = true} : vector<16x1xf32> -> vector<16x1xf32>
    %68 = vector.broadcast %67 : vector<16x1xf32> to vector<16x8xf32>
    %69 = arith.mulf %66, %68 : vector<16x8xf32>
    %70 = vector.extract_strided_slice %9 {offsets = [16, 0], sizes = [8, 64], strides = [1, 1]} : vector<64x64xf32> to vector<8x64xf32>
    %cst_26 = arith.constant dense<0.000000e+00> : vector<16x64xf32>
    %71 = tpu.matmul %69, %70, %cst_26 {dimension_numbers = #tpu.dot_dimension_numbers<[1], [0], [0], [1], [0, 0, 1, 1], [], []>} : vector<16x8xf32>, vector<8x64xf32>, vector<16x64xf32> -> vector<16x64xf32>
    %72 = arith.addf %51, %71 : vector<16x64xf32>
    %73 = vector.extract_strided_slice %6 {offsets = [0, 24], sizes = [16, 8], strides = [1, 1]} : vector<16x64xf32> to vector<16x8xf32>
    %74 = vector.extract_strided_slice %7 {offsets = [0, 24], sizes = [16, 8], strides = [1, 1]} : vector<16x64xf32> to vector<16x8xf32>
    %cst_27 = arith.constant dense<0.000000e+00> : vector<16x16xf32>
    %75 = tpu.matmul %73, %74, %cst_27 {dimension_numbers = #tpu.dot_dimension_numbers<[1], [1], [0], [0], [0, 0, 1, 0], [], []>} : vector<16x8xf32>, vector<16x8xf32>, vector<16x16xf32> -> vector<16x16xf32>
    %cst_28 = arith.constant 0.353553385 : f32
    %76 = vector.broadcast %cst_28 : f32 to vector<16x16xf32>
    %77 = arith.mulf %75, %76 : vector<16x16xf32>
    %78 = arith.addf %77, %10 : vector<16x16xf32>
    %cst_29 = arith.constant dense<0xFF800000> : vector<16xf32>
    %79 = vector.multi_reduction <maximumf>, %78, %cst_29 [1] : vector<16x16xf32> to vector<16xf32>
    %80 = vector.shape_cast %79 : vector<16xf32> to vector<16x1xf32>
    %81 = vector.broadcast %80 : vector<16x1xf32> to vector<16x16xf32>
    %82 = arith.subf %78, %81 : vector<16x16xf32>
    %83 = math.exp %82 : vector<16x16xf32>
    %cst_30 = arith.constant dense<0.000000e+00> : vector<16xf32>
    %84 = vector.multi_reduction <add>, %83, %cst_30 [1] : vector<16x16xf32> to vector<16xf32>
    %85 = vector.shape_cast %84 : vector<16xf32> to vector<16x1xf32>
    %86 = vector.extract_strided_slice %8 {offsets = [0, 24], sizes = [16, 8], strides = [1, 1]} : vector<16x64xf32> to vector<16x8xf32>
    %cst_31 = arith.constant dense<0.000000e+00> : vector<16x8xf32>
    %87 = tpu.matmul %83, %86, %cst_31 {dimension_numbers = #tpu.dot_dimension_numbers<[1], [0], [0], [1], [0, 0, 1, 1], [], []>} : vector<16x16xf32>, vector<16x8xf32>, vector<16x8xf32> -> vector<16x8xf32>
    %88 = tpu.reciprocal %85 {approx = true} : vector<16x1xf32> -> vector<16x1xf32>
    %89 = vector.broadcast %88 : vector<16x1xf32> to vector<16x8xf32>
    %90 = arith.mulf %87, %89 : vector<16x8xf32>
    %91 = vector.extract_strided_slice %9 {offsets = [24, 0], sizes = [8, 64], strides = [1, 1]} : vector<64x64xf32> to vector<8x64xf32>
    %cst_32 = arith.constant dense<0.000000e+00> : vector<16x64xf32>
    %92 = tpu.matmul %90, %91, %cst_32 {dimension_numbers = #tpu.dot_dimension_numbers<[1], [0], [0], [1], [0, 0, 1, 1], [], []>} : vector<16x8xf32>, vector<8x64xf32>, vector<16x64xf32> -> vector<16x64xf32>
    %93 = arith.addf %72, %92 : vector<16x64xf32>
    %94 = vector.extract_strided_slice %6 {offsets = [0, 32], sizes = [16, 8], strides = [1, 1]} : vector<16x64xf32> to vector<16x8xf32>
    %95 = vector.extract_strided_slice %7 {offsets = [0, 32], sizes = [16, 8], strides = [1, 1]} : vector<16x64xf32> to vector<16x8xf32>
    %cst_33 = arith.constant dense<0.000000e+00> : vector<16x16xf32>
    %96 = tpu.matmul %94, %95, %cst_33 {dimension_numbers = #tpu.dot_dimension_numbers<[1], [1], [0], [0], [0, 0, 1, 0], [], []>} : vector<16x8xf32>, vector<16x8xf32>, vector<16x16xf32> -> vector<16x16xf32>
    %cst_34 = arith.constant 0.353553385 : f32
    %97 = vector.broadcast %cst_34 : f32 to vector<16x16xf32>
    %98 = arith.mulf %96, %97 : vector<16x16xf32>
    %99 = arith.addf %98, %10 : vector<16x16xf32>
    %cst_35 = arith.constant dense<0xFF800000> : vector<16xf32>
    %100 = vector.multi_reduction <maximumf>, %99, %cst_35 [1] : vector<16x16xf32> to vector<16xf32>
    %101 = vector.shape_cast %100 : vector<16xf32> to vector<16x1xf32>
    %102 = vector.broadcast %101 : vector<16x1xf32> to vector<16x16xf32>
    %103 = arith.subf %99, %102 : vector<16x16xf32>
    %104 = math.exp %103 : vector<16x16xf32>
    %cst_36 = arith.constant dense<0.000000e+00> : vector<16xf32>
    %105 = vector.multi_reduction <add>, %104, %cst_36 [1] : vector<16x16xf32> to vector<16xf32>
    %106 = vector.shape_cast %105 : vector<16xf32> to vector<16x1xf32>
    %107 = vector.extract_strided_slice %8 {offsets = [0, 32], sizes = [16, 8], strides = [1, 1]} : vector<16x64xf32> to vector<16x8xf32>
    %cst_37 = arith.constant dense<0.000000e+00> : vector<16x8xf32>
    %108 = tpu.matmul %104, %107, %cst_37 {dimension_numbers = #tpu.dot_dimension_numbers<[1], [0], [0], [1], [0, 0, 1, 1], [], []>} : vector<16x16xf32>, vector<16x8xf32>, vector<16x8xf32> -> vector<16x8xf32>
    %109 = tpu.reciprocal %106 {approx = true} : vector<16x1xf32> -> vector<16x1xf32>
    %110 = vector.broadcast %109 : vector<16x1xf32> to vector<16x8xf32>
    %111 = arith.mulf %108, %110 : vector<16x8xf32>
    %112 = vector.extract_strided_slice %9 {offsets = [32, 0], sizes = [8, 64], strides = [1, 1]} : vector<64x64xf32> to vector<8x64xf32>
    %cst_38 = arith.constant dense<0.000000e+00> : vector<16x64xf32>
    %113 = tpu.matmul %111, %112, %cst_38 {dimension_numbers = #tpu.dot_dimension_numbers<[1], [0], [0], [1], [0, 0, 1, 1], [], []>} : vector<16x8xf32>, vector<8x64xf32>, vector<16x64xf32> -> vector<16x64xf32>
    %114 = arith.addf %93, %113 : vector<16x64xf32>
    %115 = vector.extract_strided_slice %6 {offsets = [0, 40], sizes = [16, 8], strides = [1, 1]} : vector<16x64xf32> to vector<16x8xf32>
    %116 = vector.extract_strided_slice %7 {offsets = [0, 40], sizes = [16, 8], strides = [1, 1]} : vector<16x64xf32> to vector<16x8xf32>
    %cst_39 = arith.constant dense<0.000000e+00> : vector<16x16xf32>
    %117 = tpu.matmul %115, %116, %cst_39 {dimension_numbers = #tpu.dot_dimension_numbers<[1], [1], [0], [0], [0, 0, 1, 0], [], []>} : vector<16x8xf32>, vector<16x8xf32>, vector<16x16xf32> -> vector<16x16xf32>
    %cst_40 = arith.constant 0.353553385 : f32
    %118 = vector.broadcast %cst_40 : f32 to vector<16x16xf32>
    %119 = arith.mulf %117, %118 : vector<16x16xf32>
    %120 = arith.addf %119, %10 : vector<16x16xf32>
    %cst_41 = arith.constant dense<0xFF800000> : vector<16xf32>
    %121 = vector.multi_reduction <maximumf>, %120, %cst_41 [1] : vector<16x16xf32> to vector<16xf32>
    %122 = vector.shape_cast %121 : vector<16xf32> to vector<16x1xf32>
    %123 = vector.broadcast %122 : vector<16x1xf32> to vector<16x16xf32>
    %124 = arith.subf %120, %123 : vector<16x16xf32>
    %125 = math.exp %124 : vector<16x16xf32>
    %cst_42 = arith.constant dense<0.000000e+00> : vector<16xf32>
    %126 = vector.multi_reduction <add>, %125, %cst_42 [1] : vector<16x16xf32> to vector<16xf32>
    %127 = vector.shape_cast %126 : vector<16xf32> to vector<16x1xf32>
    %128 = vector.extract_strided_slice %8 {offsets = [0, 40], sizes = [16, 8], strides = [1, 1]} : vector<16x64xf32> to vector<16x8xf32>
    %cst_43 = arith.constant dense<0.000000e+00> : vector<16x8xf32>
    %129 = tpu.matmul %125, %128, %cst_43 {dimension_numbers = #tpu.dot_dimension_numbers<[1], [0], [0], [1], [0, 0, 1, 1], [], []>} : vector<16x16xf32>, vector<16x8xf32>, vector<16x8xf32> -> vector<16x8xf32>
    %130 = tpu.reciprocal %127 {approx = true} : vector<16x1xf32> -> vector<16x1xf32>
    %131 = vector.broadcast %130 : vector<16x1xf32> to vector<16x8xf32>
    %132 = arith.mulf %129, %131 : vector<16x8xf32>
    %133 = vector.extract_strided_slice %9 {offsets = [40, 0], sizes = [8, 64], strides = [1, 1]} : vector<64x64xf32> to vector<8x64xf32>
    %cst_44 = arith.constant dense<0.000000e+00> : vector<16x64xf32>
    %134 = tpu.matmul %132, %133, %cst_44 {dimension_numbers = #tpu.dot_dimension_numbers<[1], [0], [0], [1], [0, 0, 1, 1], [], []>} : vector<16x8xf32>, vector<8x64xf32>, vector<16x64xf32> -> vector<16x64xf32>
    %135 = arith.addf %114, %134 : vector<16x64xf32>
    %136 = vector.extract_strided_slice %6 {offsets = [0, 48], sizes = [16, 8], strides = [1, 1]} : vector<16x64xf32> to vector<16x8xf32>
    %137 = vector.extract_strided_slice %7 {offsets = [0, 48], sizes = [16, 8], strides = [1, 1]} : vector<16x64xf32> to vector<16x8xf32>
    %cst_45 = arith.constant dense<0.000000e+00> : vector<16x16xf32>
    %138 = tpu.matmul %136, %137, %cst_45 {dimension_numbers = #tpu.dot_dimension_numbers<[1], [1], [0], [0], [0, 0, 1, 0], [], []>} : vector<16x8xf32>, vector<16x8xf32>, vector<16x16xf32> -> vector<16x16xf32>
    %cst_46 = arith.constant 0.353553385 : f32
    %139 = vector.broadcast %cst_46 : f32 to vector<16x16xf32>
    %140 = arith.mulf %138, %139 : vector<16x16xf32>
    %141 = arith.addf %140, %10 : vector<16x16xf32>
    %cst_47 = arith.constant dense<0xFF800000> : vector<16xf32>
    %142 = vector.multi_reduction <maximumf>, %141, %cst_47 [1] : vector<16x16xf32> to vector<16xf32>
    %143 = vector.shape_cast %142 : vector<16xf32> to vector<16x1xf32>
    %144 = vector.broadcast %143 : vector<16x1xf32> to vector<16x16xf32>
    %145 = arith.subf %141, %144 : vector<16x16xf32>
    %146 = math.exp %145 : vector<16x16xf32>
    %cst_48 = arith.constant dense<0.000000e+00> : vector<16xf32>
    %147 = vector.multi_reduction <add>, %146, %cst_48 [1] : vector<16x16xf32> to vector<16xf32>
    %148 = vector.shape_cast %147 : vector<16xf32> to vector<16x1xf32>
    %149 = vector.extract_strided_slice %8 {offsets = [0, 48], sizes = [16, 8], strides = [1, 1]} : vector<16x64xf32> to vector<16x8xf32>
    %cst_49 = arith.constant dense<0.000000e+00> : vector<16x8xf32>
    %150 = tpu.matmul %146, %149, %cst_49 {dimension_numbers = #tpu.dot_dimension_numbers<[1], [0], [0], [1], [0, 0, 1, 1], [], []>} : vector<16x16xf32>, vector<16x8xf32>, vector<16x8xf32> -> vector<16x8xf32>
    %151 = tpu.reciprocal %148 {approx = true} : vector<16x1xf32> -> vector<16x1xf32>
    %152 = vector.broadcast %151 : vector<16x1xf32> to vector<16x8xf32>
    %153 = arith.mulf %150, %152 : vector<16x8xf32>
    %154 = vector.extract_strided_slice %9 {offsets = [48, 0], sizes = [8, 64], strides = [1, 1]} : vector<64x64xf32> to vector<8x64xf32>
    %cst_50 = arith.constant dense<0.000000e+00> : vector<16x64xf32>
    %155 = tpu.matmul %153, %154, %cst_50 {dimension_numbers = #tpu.dot_dimension_numbers<[1], [0], [0], [1], [0, 0, 1, 1], [], []>} : vector<16x8xf32>, vector<8x64xf32>, vector<16x64xf32> -> vector<16x64xf32>
    %156 = arith.addf %135, %155 : vector<16x64xf32>
    %157 = vector.extract_strided_slice %6 {offsets = [0, 56], sizes = [16, 8], strides = [1, 1]} : vector<16x64xf32> to vector<16x8xf32>
    %158 = vector.extract_strided_slice %7 {offsets = [0, 56], sizes = [16, 8], strides = [1, 1]} : vector<16x64xf32> to vector<16x8xf32>
    %cst_51 = arith.constant dense<0.000000e+00> : vector<16x16xf32>
    %159 = tpu.matmul %157, %158, %cst_51 {dimension_numbers = #tpu.dot_dimension_numbers<[1], [1], [0], [0], [0, 0, 1, 0], [], []>} : vector<16x8xf32>, vector<16x8xf32>, vector<16x16xf32> -> vector<16x16xf32>
    %cst_52 = arith.constant 0.353553385 : f32
    %160 = vector.broadcast %cst_52 : f32 to vector<16x16xf32>
    %161 = arith.mulf %159, %160 : vector<16x16xf32>
    %162 = arith.addf %161, %10 : vector<16x16xf32>
    %cst_53 = arith.constant dense<0xFF800000> : vector<16xf32>
    %163 = vector.multi_reduction <maximumf>, %162, %cst_53 [1] : vector<16x16xf32> to vector<16xf32>
    %164 = vector.shape_cast %163 : vector<16xf32> to vector<16x1xf32>
    %165 = vector.broadcast %164 : vector<16x1xf32> to vector<16x16xf32>
    %166 = arith.subf %162, %165 : vector<16x16xf32>
    %167 = math.exp %166 : vector<16x16xf32>
    %cst_54 = arith.constant dense<0.000000e+00> : vector<16xf32>
    %168 = vector.multi_reduction <add>, %167, %cst_54 [1] : vector<16x16xf32> to vector<16xf32>
    %169 = vector.shape_cast %168 : vector<16xf32> to vector<16x1xf32>
    %170 = vector.extract_strided_slice %8 {offsets = [0, 56], sizes = [16, 8], strides = [1, 1]} : vector<16x64xf32> to vector<16x8xf32>
    %cst_55 = arith.constant dense<0.000000e+00> : vector<16x8xf32>
    %171 = tpu.matmul %167, %170, %cst_55 {dimension_numbers = #tpu.dot_dimension_numbers<[1], [0], [0], [1], [0, 0, 1, 1], [], []>} : vector<16x16xf32>, vector<16x8xf32>, vector<16x8xf32> -> vector<16x8xf32>
    %172 = tpu.reciprocal %169 {approx = true} : vector<16x1xf32> -> vector<16x1xf32>
    %173 = vector.broadcast %172 : vector<16x1xf32> to vector<16x8xf32>
    %174 = arith.mulf %171, %173 : vector<16x8xf32>
    %175 = vector.extract_strided_slice %9 {offsets = [56, 0], sizes = [8, 64], strides = [1, 1]} : vector<64x64xf32> to vector<8x64xf32>
    %cst_56 = arith.constant dense<0.000000e+00> : vector<16x64xf32>
    %176 = tpu.matmul %174, %175, %cst_56 {dimension_numbers = #tpu.dot_dimension_numbers<[1], [0], [0], [1], [0, 0, 1, 1], [], []>} : vector<16x8xf32>, vector<8x64xf32>, vector<16x64xf32> -> vector<16x64xf32>
    %177 = arith.addf %156, %176 : vector<16x64xf32>
    %c0_57 = arith.constant 0 : index
    %c0_58 = arith.constant 0 : index
    %178 = vector.load %arg6[%c0_57, %c0_58] : memref<1x64xf32, #tpu.memory_space<vmem>>, vector<1x64xf32>
    %179 = vector.broadcast %178 : vector<1x64xf32> to vector<16x64xf32>
    %180 = arith.addf %177, %179 : vector<16x64xf32>
    %181 = arith.addf %0, %180 : vector<16x64xf32>
    %c0_59 = arith.constant 0 : index
    %c0_60 = arith.constant 0 : index
    %182 = vector.load %arg7[%c0_59, %c0_60] : memref<1x64xf32, #tpu.memory_space<vmem>>, vector<1x64xf32>
    %c0_61 = arith.constant 0 : index
    %c0_62 = arith.constant 0 : index
    %183 = vector.load %arg8[%c0_61, %c0_62] : memref<1x64xf32, #tpu.memory_space<vmem>>, vector<1x64xf32>
    %cst_63 = arith.constant dense<0.000000e+00> : vector<16xf32>
    %184 = vector.multi_reduction <add>, %181, %cst_63 [1] : vector<16x64xf32> to vector<16xf32>
    %185 = vector.shape_cast %184 : vector<16xf32> to vector<16x1xf32>
    %cst_64 = arith.constant 6.400000e+01 : f32
    %186 = vector.broadcast %cst_64 : f32 to vector<16x1xf32>
    %187 = arith.divf %185, %186 : vector<16x1xf32>
    %188 = vector.broadcast %187 : vector<16x1xf32> to vector<16x64xf32>
    %189 = arith.subf %181, %188 : vector<16x64xf32>
    %190 = arith.mulf %189, %189 : vector<16x64xf32>
    %cst_65 = arith.constant dense<0.000000e+00> : vector<16xf32>
    %191 = vector.multi_reduction <add>, %190, %cst_65 [1] : vector<16x64xf32> to vector<16xf32>
    %192 = vector.shape_cast %191 : vector<16xf32> to vector<16x1xf32>
    %cst_66 = arith.constant 6.400000e+01 : f32
    %193 = vector.broadcast %cst_66 : f32 to vector<16x1xf32>
    %194 = arith.divf %192, %193 : vector<16x1xf32>
    %cst_67 = arith.constant 9.99999974E-6 : f32
    %195 = vector.broadcast %cst_67 : f32 to vector<16x1xf32>
    %196 = arith.addf %194, %195 : vector<16x1xf32>
    %197 = math.rsqrt %196 : vector<16x1xf32>
    %198 = vector.broadcast %197 : vector<16x1xf32> to vector<16x64xf32>
    %199 = arith.mulf %189, %198 : vector<16x64xf32>
    %200 = vector.broadcast %182 : vector<1x64xf32> to vector<16x64xf32>
    %201 = arith.mulf %199, %200 : vector<16x64xf32>
    %202 = vector.broadcast %183 : vector<1x64xf32> to vector<16x64xf32>
    %203 = arith.addf %201, %202 : vector<16x64xf32>
    %c0_68 = arith.constant 0 : index
    %c0_69 = arith.constant 0 : index
    %204 = vector.load %arg9[%c0_68, %c0_69] : memref<64x128xf32, #tpu.memory_space<vmem>>, vector<64x128xf32>
    %cst_70 = arith.constant dense<0.000000e+00> : vector<16x128xf32>
    %205 = tpu.matmul %203, %204, %cst_70 {dimension_numbers = #tpu.dot_dimension_numbers<[1], [0], [0], [1], [0, 0, 1, 1], [], []>} : vector<16x64xf32>, vector<64x128xf32>, vector<16x128xf32> -> vector<16x128xf32>
    %c0_71 = arith.constant 0 : index
    %c0_72 = arith.constant 0 : index
    %206 = vector.load %arg10[%c0_71, %c0_72] : memref<1x128xf32, #tpu.memory_space<vmem>>, vector<1x128xf32>
    %207 = vector.broadcast %206 : vector<1x128xf32> to vector<16x128xf32>
    %208 = arith.addf %205, %207 : vector<16x128xf32>
    %cst_73 = arith.constant 0.000000e+00 : f32
    %209 = vector.broadcast %cst_73 : f32 to vector<16x128xf32>
    %210 = arith.maximumf %208, %209 : vector<16x128xf32>
    %c0_74 = arith.constant 0 : index
    %c0_75 = arith.constant 0 : index
    %211 = vector.load %arg11[%c0_74, %c0_75] : memref<128x64xf32, #tpu.memory_space<vmem>>, vector<128x64xf32>
    %cst_76 = arith.constant dense<0.000000e+00> : vector<16x64xf32>
    %212 = tpu.matmul %210, %211, %cst_76 {dimension_numbers = #tpu.dot_dimension_numbers<[1], [0], [0], [1], [0, 0, 1, 1], [], []>} : vector<16x128xf32>, vector<128x64xf32>, vector<16x64xf32> -> vector<16x64xf32>
    %c0_77 = arith.constant 0 : index
    %c0_78 = arith.constant 0 : index
    %213 = vector.load %arg12[%c0_77, %c0_78] : memref<1x64xf32, #tpu.memory_space<vmem>>, vector<1x64xf32>
    %214 = vector.broadcast %213 : vector<1x64xf32> to vector<16x64xf32>
    %215 = arith.addf %212, %214 : vector<16x64xf32>
    %216 = arith.addf %203, %215 : vector<16x64xf32>
    %c0_79 = arith.constant 0 : index
    %c0_80 = arith.constant 0 : index
    %217 = vector.load %arg13[%c0_79, %c0_80] : memref<1x64xf32, #tpu.memory_space<vmem>>, vector<1x64xf32>
    %c0_81 = arith.constant 0 : index
    %c0_82 = arith.constant 0 : index
    %218 = vector.load %arg14[%c0_81, %c0_82] : memref<1x64xf32, #tpu.memory_space<vmem>>, vector<1x64xf32>
    %cst_83 = arith.constant dense<0.000000e+00> : vector<16xf32>
    %219 = vector.multi_reduction <add>, %216, %cst_83 [1] : vector<16x64xf32> to vector<16xf32>
    %220 = vector.shape_cast %219 : vector<16xf32> to vector<16x1xf32>
    %cst_84 = arith.constant 6.400000e+01 : f32
    %221 = vector.broadcast %cst_84 : f32 to vector<16x1xf32>
    %222 = arith.divf %220, %221 : vector<16x1xf32>
    %223 = vector.broadcast %222 : vector<16x1xf32> to vector<16x64xf32>
    %224 = arith.subf %216, %223 : vector<16x64xf32>
    %225 = arith.mulf %224, %224 : vector<16x64xf32>
    %cst_85 = arith.constant dense<0.000000e+00> : vector<16xf32>
    %226 = vector.multi_reduction <add>, %225, %cst_85 [1] : vector<16x64xf32> to vector<16xf32>
    %227 = vector.shape_cast %226 : vector<16xf32> to vector<16x1xf32>
    %cst_86 = arith.constant 6.400000e+01 : f32
    %228 = vector.broadcast %cst_86 : f32 to vector<16x1xf32>
    %229 = arith.divf %227, %228 : vector<16x1xf32>
    %cst_87 = arith.constant 9.99999974E-6 : f32
    %230 = vector.broadcast %cst_87 : f32 to vector<16x1xf32>
    %231 = arith.addf %229, %230 : vector<16x1xf32>
    %232 = math.rsqrt %231 : vector<16x1xf32>
    %233 = vector.broadcast %232 : vector<16x1xf32> to vector<16x64xf32>
    %234 = arith.mulf %224, %233 : vector<16x64xf32>
    %235 = vector.broadcast %217 : vector<1x64xf32> to vector<16x64xf32>
    %236 = arith.mulf %234, %235 : vector<16x64xf32>
    %237 = vector.broadcast %218 : vector<1x64xf32> to vector<16x64xf32>
    %238 = arith.addf %236, %237 : vector<16x64xf32>
    %c0_88 = arith.constant 0 : index
    %c0_89 = arith.constant 0 : index
    %239 = vector.load %arg15[%c0_88, %c0_89] : memref<16x64xf32, #tpu.memory_space<vmem>>, vector<16x64xf32>
    tpu.vector_store %arg15[%c0_88, %c0_89], %238 {strides = array<i32>} : memref<16x64xf32, #tpu.memory_space<vmem>>, vector<16x64xf32>,
    return
  }
  func.func @transform_0(%arg0: i32) -> (i32, i32) {
    %c0_i32 = arith.constant 0 : i32
    %c0_i32_0 = arith.constant 0 : i32
    %c0_i32_1 = arith.constant 0 : i32
    return %c0_i32, %c0_i32_0 : i32, i32
  }
  func.func @transform_1(%arg0: i32) -> (i32, i32) {
    %c0_i32 = arith.constant 0 : i32
    %c0_i32_0 = arith.constant 0 : i32
    %c0_i32_1 = arith.constant 0 : i32
    return %c0_i32, %c0_i32_0 : i32, i32
  }
  func.func @transform_2(%arg0: i32) -> (i32, i32) {
    %c0_i32 = arith.constant 0 : i32
    %c0_i32_0 = arith.constant 0 : i32
    %c0_i32_1 = arith.constant 0 : i32
    return %c0_i32, %c0_i32_0 : i32, i32
  }
  func.func @transform_3(%arg0: i32) -> (i32, i32) {
    %c0_i32 = arith.constant 0 : i32
    %c0_i32_0 = arith.constant 0 : i32
    %c0_i32_1 = arith.constant 0 : i32
    return %c0_i32, %c0_i32_0 : i32, i32
  }
  func.func @transform_4(%arg0: i32) -> (i32, i32) {
    %c0_i32 = arith.constant 0 : i32
    %c0_i32_0 = arith.constant 0 : i32
    %c0_i32_1 = arith.constant 0 : i32
    return %c0_i32, %c0_i32_0 : i32, i32
  }
  func.func @transform_5(%arg0: i32) -> (i32, i32) {
    %c0_i32 = arith.constant 0 : i32
    %c0_i32_0 = arith.constant 0 : i32
    %c0_i32_1 = arith.constant 0 : i32
    return %c0_i32, %c0_i32_0 : i32, i32
  }
  func.func @transform_6(%arg0: i32) -> (i32, i32) {
    %c0_i32 = arith.constant 0 : i32
    %c0_i32_0 = arith.constant 0 : i32
    %c0_i32_1 = arith.constant 0 : i32
    return %c0_i32, %c0_i32_0 : i32, i32
  }
  func.func @transform_7(%arg0: i32) -> (i32, i32) {
    %c0_i32 = arith.constant 0 : i32
    %c0_i32_0 = arith.constant 0 : i32
    %c0_i32_1 = arith.constant 0 : i32
    return %c0_i32, %c0_i32_0 : i32, i32
  }
  func.func @transform_8(%arg0: i32) -> (i32, i32) {
    %c0_i32 = arith.constant 0 : i32
    %c0_i32_0 = arith.constant 0 : i32
    %c0_i32_1 = arith.constant 0 : i32
    return %c0_i32, %c0_i32_0 : i32, i32
  }
  func.func @transform_9(%arg0: i32) -> (i32, i32) {
    %c0_i32 = arith.constant 0 : i32
    %c0_i32_0 = arith.constant 0 : i32
    %c0_i32_1 = arith.constant 0 : i32
    return %c0_i32, %c0_i32_0 : i32, i32
  }
  func.func @transform_10(%arg0: i32) -> (i32, i32) {
    %c0_i32 = arith.constant 0 : i32
    %c0_i32_0 = arith.constant 0 : i32
    %c0_i32_1 = arith.constant 0 : i32
    return %c0_i32, %c0_i32_0 : i32, i32
  }
  func.func @transform_11(%arg0: i32) -> (i32, i32) {
    %c0_i32 = arith.constant 0 : i32
    %c0_i32_0 = arith.constant 0 : i32
    %c0_i32_1 = arith.constant 0 : i32
    return %c0_i32, %c0_i32_0 : i32, i32
  }
  func.func @transform_12(%arg0: i32) -> (i32, i32) {
    %c0_i32 = arith.constant 0 : i32
    %c0_i32_0 = arith.constant 0 : i32
    %c0_i32_1 = arith.constant 0 : i32
    return %c0_i32, %c0_i32_0 : i32, i32
  }
  func.func @transform_13(%arg0: i32) -> (i32, i32) {
    %c0_i32 = arith.constant 0 : i32
    %c0_i32_0 = arith.constant 0 : i32
    %c0_i32_1 = arith.constant 0 : i32
    return %c0_i32, %c0_i32_0 : i32, i32
  }
  func.func @transform_14(%arg0: i32) -> (i32, i32) {
    %c0_i32 = arith.constant 0 : i32
    %c0_i32_0 = arith.constant 0 : i32
    %c0_i32_1 = arith.constant 0 : i32
    return %c0_i32, %c0_i32_0 : i32, i32
  }
}

module attributes {stable_mosaic.version = 11 : i64} {
  func.func @_decoder_head_kernel(%arg0: i32, %arg1: memref<6x64xf32, #tpu.memory_space<vmem>>, %arg2: memref<16x64xf32, #tpu.memory_space<vmem>>, %arg3: memref<6x6xf32, #tpu.memory_space<vmem>>, %arg4: memref<6x16xf32, #tpu.memory_space<vmem>>, %arg5: memref<1x64xf32, #tpu.memory_space<vmem>>, %arg6: memref<1x64xf32, #tpu.memory_space<vmem>>, %arg7: memref<64x192xf32, #tpu.memory_space<vmem>>, %arg8: memref<1x192xf32, #tpu.memory_space<vmem>>, %arg9: memref<64x64xf32, #tpu.memory_space<vmem>>, %arg10: memref<1x64xf32, #tpu.memory_space<vmem>>, %arg11: memref<1x64xf32, #tpu.memory_space<vmem>>, %arg12: memref<1x64xf32, #tpu.memory_space<vmem>>, %arg13: memref<64x64xf32, #tpu.memory_space<vmem>>, %arg14: memref<1x64xf32, #tpu.memory_space<vmem>>, %arg15: memref<64x128xf32, #tpu.memory_space<vmem>>, %arg16: memref<1x128xf32, #tpu.memory_space<vmem>>, %arg17: memref<64x64xf32, #tpu.memory_space<vmem>>, %arg18: memref<1x64xf32, #tpu.memory_space<vmem>>, %arg19: memref<1x64xf32, #tpu.memory_space<vmem>>, %arg20: memref<1x64xf32, #tpu.memory_space<vmem>>, %arg21: memref<64x128xf32, #tpu.memory_space<vmem>>, %arg22: memref<1x128xf32, #tpu.memory_space<vmem>>, %arg23: memref<128x64xf32, #tpu.memory_space<vmem>>, %arg24: memref<1x64xf32, #tpu.memory_space<vmem>>, %arg25: memref<1x64xf32, #tpu.memory_space<vmem>>, %arg26: memref<1x64xf32, #tpu.memory_space<vmem>>, %arg27: memref<1x64xf32, #tpu.memory_space<vmem>>, %arg28: memref<1x64xf32, #tpu.memory_space<vmem>>, %arg29: memref<1x64xf32, #tpu.memory_space<vmem>>, %arg30: memref<1x1xf32, #tpu.memory_space<vmem>>, %arg31: memref<2x1xf32, #tpu.memory_space<vmem>>) attributes {dimension_semantics = [#tpu.dimension_semantics<arbitrary>], iteration_bounds = array<i64: 1>, scalar_prefetch = 0 : i64, scratch_operands = 0 : i64, tpu.core_type = #tpu.core_type<tc>, window_params = [{pipeline_mode = #tpu.pipeline_mode<synchronous>, transform_indices = @transform_0, window_bounds = array<i64: 6, 64>}, {pipeline_mode = #tpu.pipeline_mode<synchronous>, transform_indices = @transform_1, window_bounds = array<i64: 16, 64>}, {pipeline_mode = #tpu.pipeline_mode<synchronous>, transform_indices = @transform_2, window_bounds = array<i64: 6, 6>}, {pipeline_mode = #tpu.pipeline_mode<synchronous>, transform_indices = @transform_3, window_bounds = array<i64: 6, 16>}, {pipeline_mode = #tpu.pipeline_mode<synchronous>, transform_indices = @transform_4, window_bounds = array<i64: 1, 64>}, {pipeline_mode = #tpu.pipeline_mode<synchronous>, transform_indices = @transform_5, window_bounds = array<i64: 1, 64>}, {pipeline_mode = #tpu.pipeline_mode<synchronous>, transform_indices = @transform_6, window_bounds = array<i64: 64, 192>}, {pipeline_mode = #tpu.pipeline_mode<synchronous>, transform_indices = @transform_7, window_bounds = array<i64: 1, 192>}, {pipeline_mode = #tpu.pipeline_mode<synchronous>, transform_indices = @transform_8, window_bounds = array<i64: 64, 64>}, {pipeline_mode = #tpu.pipeline_mode<synchronous>, transform_indices = @transform_9, window_bounds = array<i64: 1, 64>}, {pipeline_mode = #tpu.pipeline_mode<synchronous>, transform_indices = @transform_10, window_bounds = array<i64: 1, 64>}, {pipeline_mode = #tpu.pipeline_mode<synchronous>, transform_indices = @transform_11, window_bounds = array<i64: 1, 64>}, {pipeline_mode = #tpu.pipeline_mode<synchronous>, transform_indices = @transform_12, window_bounds = array<i64: 64, 64>}, {pipeline_mode = #tpu.pipeline_mode<synchronous>, transform_indices = @transform_13, window_bounds = array<i64: 1, 64>}, {pipeline_mode = #tpu.pipeline_mode<synchronous>, transform_indices = @transform_14, window_bounds = array<i64: 64, 128>}, {pipeline_mode = #tpu.pipeline_mode<synchronous>, transform_indices = @transform_15, window_bounds = array<i64: 1, 128>}, {pipeline_mode = #tpu.pipeline_mode<synchronous>, transform_indices = @transform_16, window_bounds = array<i64: 64, 64>}, {pipeline_mode = #tpu.pipeline_mode<synchronous>, transform_indices = @transform_17, window_bounds = array<i64: 1, 64>}, {pipeline_mode = #tpu.pipeline_mode<synchronous>, transform_indices = @transform_18, window_bounds = array<i64: 1, 64>}, {pipeline_mode = #tpu.pipeline_mode<synchronous>, transform_indices = @transform_19, window_bounds = array<i64: 1, 64>}, {pipeline_mode = #tpu.pipeline_mode<synchronous>, transform_indices = @transform_20, window_bounds = array<i64: 64, 128>}, {pipeline_mode = #tpu.pipeline_mode<synchronous>, transform_indices = @transform_21, window_bounds = array<i64: 1, 128>}, {pipeline_mode = #tpu.pipeline_mode<synchronous>, transform_indices = @transform_22, window_bounds = array<i64: 128, 64>}, {pipeline_mode = #tpu.pipeline_mode<synchronous>, transform_indices = @transform_23, window_bounds = array<i64: 1, 64>}, {pipeline_mode = #tpu.pipeline_mode<synchronous>, transform_indices = @transform_24, window_bounds = array<i64: 1, 64>}, {pipeline_mode = #tpu.pipeline_mode<synchronous>, transform_indices = @transform_25, window_bounds = array<i64: 1, 64>}, {pipeline_mode = #tpu.pipeline_mode<synchronous>, transform_indices = @transform_26, window_bounds = array<i64: 1, 64>}, {pipeline_mode = #tpu.pipeline_mode<synchronous>, transform_indices = @transform_27, window_bounds = array<i64: 1, 64>}, {pipeline_mode = #tpu.pipeline_mode<synchronous>, transform_indices = @transform_28, window_bounds = array<i64: 1, 64>}, {pipeline_mode = #tpu.pipeline_mode<synchronous>, transform_indices = @transform_29, window_bounds = array<i64: 1, 1>}, {pipeline_mode = #tpu.pipeline_mode<synchronous>, transform_indices = @transform_30, window_bounds = array<i64: 2, 1>}]} {
    %c0 = arith.constant 0 : index
    %c0_0 = arith.constant 0 : index
    %0 = vector.load %arg2[%c0, %c0_0] : memref<16x64xf32, #tpu.memory_space<vmem>>, vector<16x64xf32>
    %c0_1 = arith.constant 0 : index
    %c0_2 = arith.constant 0 : index
    %1 = vector.load %arg5[%c0_1, %c0_2] : memref<1x64xf32, #tpu.memory_space<vmem>>, vector<1x64xf32>
    %c0_3 = arith.constant 0 : index
    %c0_4 = arith.constant 0 : index
    %2 = vector.load %arg6[%c0_3, %c0_4] : memref<1x64xf32, #tpu.memory_space<vmem>>, vector<1x64xf32>
    %cst = arith.constant dense<0.000000e+00> : vector<16xf32>
    %3 = vector.multi_reduction <add>, %0, %cst [1] : vector<16x64xf32> to vector<16xf32>
    %4 = vector.shape_cast %3 : vector<16xf32> to vector<16x1xf32>
    %cst_5 = arith.constant 6.400000e+01 : f32
    %5 = vector.broadcast %cst_5 : f32 to vector<16x1xf32>
    %6 = arith.divf %4, %5 : vector<16x1xf32>
    %7 = vector.broadcast %6 : vector<16x1xf32> to vector<16x64xf32>
    %8 = arith.subf %0, %7 : vector<16x64xf32>
    %9 = arith.mulf %8, %8 : vector<16x64xf32>
    %cst_6 = arith.constant dense<0.000000e+00> : vector<16xf32>
    %10 = vector.multi_reduction <add>, %9, %cst_6 [1] : vector<16x64xf32> to vector<16xf32>
    %11 = vector.shape_cast %10 : vector<16xf32> to vector<16x1xf32>
    %cst_7 = arith.constant 6.400000e+01 : f32
    %12 = vector.broadcast %cst_7 : f32 to vector<16x1xf32>
    %13 = arith.divf %11, %12 : vector<16x1xf32>
    %cst_8 = arith.constant 9.99999974E-6 : f32
    %14 = vector.broadcast %cst_8 : f32 to vector<16x1xf32>
    %15 = arith.addf %13, %14 : vector<16x1xf32>
    %16 = math.rsqrt %15 : vector<16x1xf32>
    %17 = vector.broadcast %16 : vector<16x1xf32> to vector<16x64xf32>
    %18 = arith.mulf %8, %17 : vector<16x64xf32>
    %19 = vector.broadcast %1 : vector<1x64xf32> to vector<16x64xf32>
    %20 = arith.mulf %18, %19 : vector<16x64xf32>
    %21 = vector.broadcast %2 : vector<1x64xf32> to vector<16x64xf32>
    %22 = arith.addf %20, %21 : vector<16x64xf32>
    %c0_9 = arith.constant 0 : index
    %c0_10 = arith.constant 0 : index
    %23 = vector.load %arg1[%c0_9, %c0_10] : memref<6x64xf32, #tpu.memory_space<vmem>>, vector<6x64xf32>
    %c0_11 = arith.constant 0 : index
    %c0_12 = arith.constant 0 : index
    %24 = vector.load %arg7[%c0_11, %c0_12] : memref<64x192xf32, #tpu.memory_space<vmem>>, vector<64x192xf32>
    %cst_13 = arith.constant dense<0.000000e+00> : vector<6x192xf32>
    %25 = tpu.matmul %23, %24, %cst_13 {dimension_numbers = #tpu.dot_dimension_numbers<[1], [0], [0], [1], [0, 0, 1, 1], [], []>} : vector<6x64xf32>, vector<64x192xf32>, vector<6x192xf32> -> vector<6x192xf32>
    %c0_14 = arith.constant 0 : index
    %c0_15 = arith.constant 0 : index
    %26 = vector.load %arg8[%c0_14, %c0_15] : memref<1x192xf32, #tpu.memory_space<vmem>>, vector<1x192xf32>
    %27 = vector.broadcast %26 : vector<1x192xf32> to vector<6x192xf32>
    %28 = arith.addf %25, %27 : vector<6x192xf32>
    %29 = vector.extract_strided_slice %28 {offsets = [0, 0], sizes = [6, 64], strides = [1, 1]} : vector<6x192xf32> to vector<6x64xf32>
    %30 = vector.extract_strided_slice %28 {offsets = [0, 64], sizes = [6, 64], strides = [1, 1]} : vector<6x192xf32> to vector<6x64xf32>
    %31 = vector.extract_strided_slice %28 {offsets = [0, 128], sizes = [6, 64], strides = [1, 1]} : vector<6x192xf32> to vector<6x64xf32>
    %c0_16 = arith.constant 0 : index
    %c0_17 = arith.constant 0 : index
    %32 = vector.load %arg9[%c0_16, %c0_17] : memref<64x64xf32, #tpu.memory_space<vmem>>, vector<64x64xf32>
    %c0_18 = arith.constant 0 : index
    %c0_19 = arith.constant 0 : index
    %33 = vector.load %arg3[%c0_18, %c0_19] : memref<6x6xf32, #tpu.memory_space<vmem>>, vector<6x6xf32>
    %34 = vector.extract_strided_slice %29 {offsets = [0, 0], sizes = [6, 8], strides = [1, 1]} : vector<6x64xf32> to vector<6x8xf32>
    %35 = vector.extract_strided_slice %30 {offsets = [0, 0], sizes = [6, 8], strides = [1, 1]} : vector<6x64xf32> to vector<6x8xf32>
    %cst_20 = arith.constant dense<0.000000e+00> : vector<6x6xf32>
    %36 = tpu.matmul %34, %35, %cst_20 {dimension_numbers = #tpu.dot_dimension_numbers<[1], [1], [0], [0], [0, 0, 1, 0], [], []>} : vector<6x8xf32>, vector<6x8xf32>, vector<6x6xf32> -> vector<6x6xf32>
    %cst_21 = arith.constant 0.353553385 : f32
    %37 = vector.broadcast %cst_21 : f32 to vector<6x6xf32>
    %38 = arith.mulf %36, %37 : vector<6x6xf32>
    %39 = arith.addf %38, %33 : vector<6x6xf32>
    %cst_22 = arith.constant dense<0xFF800000> : vector<6xf32>
    %40 = vector.multi_reduction <maximumf>, %39, %cst_22 [1] : vector<6x6xf32> to vector<6xf32>
    %41 = vector.shape_cast %40 : vector<6xf32> to vector<6x1xf32>
    %42 = vector.broadcast %41 : vector<6x1xf32> to vector<6x6xf32>
    %43 = arith.subf %39, %42 : vector<6x6xf32>
    %44 = math.exp %43 : vector<6x6xf32>
    %cst_23 = arith.constant dense<0.000000e+00> : vector<6xf32>
    %45 = vector.multi_reduction <add>, %44, %cst_23 [1] : vector<6x6xf32> to vector<6xf32>
    %46 = vector.shape_cast %45 : vector<6xf32> to vector<6x1xf32>
    %47 = vector.extract_strided_slice %31 {offsets = [0, 0], sizes = [6, 8], strides = [1, 1]} : vector<6x64xf32> to vector<6x8xf32>
    %cst_24 = arith.constant dense<0.000000e+00> : vector<6x8xf32>
    %48 = tpu.matmul %44, %47, %cst_24 {dimension_numbers = #tpu.dot_dimension_numbers<[1], [0], [0], [1], [0, 0, 1, 1], [], []>} : vector<6x6xf32>, vector<6x8xf32>, vector<6x8xf32> -> vector<6x8xf32>
    %49 = tpu.reciprocal %46 {approx = true} : vector<6x1xf32> -> vector<6x1xf32>
    %50 = vector.broadcast %49 : vector<6x1xf32> to vector<6x8xf32>
    %51 = arith.mulf %48, %50 : vector<6x8xf32>
    %52 = vector.extract_strided_slice %32 {offsets = [0, 0], sizes = [8, 64], strides = [1, 1]} : vector<64x64xf32> to vector<8x64xf32>
    %cst_25 = arith.constant dense<0.000000e+00> : vector<6x64xf32>
    %53 = tpu.matmul %51, %52, %cst_25 {dimension_numbers = #tpu.dot_dimension_numbers<[1], [0], [0], [1], [0, 0, 1, 1], [], []>} : vector<6x8xf32>, vector<8x64xf32>, vector<6x64xf32> -> vector<6x64xf32>
    %54 = vector.extract_strided_slice %29 {offsets = [0, 8], sizes = [6, 8], strides = [1, 1]} : vector<6x64xf32> to vector<6x8xf32>
    %55 = vector.extract_strided_slice %30 {offsets = [0, 8], sizes = [6, 8], strides = [1, 1]} : vector<6x64xf32> to vector<6x8xf32>
    %cst_26 = arith.constant dense<0.000000e+00> : vector<6x6xf32>
    %56 = tpu.matmul %54, %55, %cst_26 {dimension_numbers = #tpu.dot_dimension_numbers<[1], [1], [0], [0], [0, 0, 1, 0], [], []>} : vector<6x8xf32>, vector<6x8xf32>, vector<6x6xf32> -> vector<6x6xf32>
    %cst_27 = arith.constant 0.353553385 : f32
    %57 = vector.broadcast %cst_27 : f32 to vector<6x6xf32>
    %58 = arith.mulf %56, %57 : vector<6x6xf32>
    %59 = arith.addf %58, %33 : vector<6x6xf32>
    %cst_28 = arith.constant dense<0xFF800000> : vector<6xf32>
    %60 = vector.multi_reduction <maximumf>, %59, %cst_28 [1] : vector<6x6xf32> to vector<6xf32>
    %61 = vector.shape_cast %60 : vector<6xf32> to vector<6x1xf32>
    %62 = vector.broadcast %61 : vector<6x1xf32> to vector<6x6xf32>
    %63 = arith.subf %59, %62 : vector<6x6xf32>
    %64 = math.exp %63 : vector<6x6xf32>
    %cst_29 = arith.constant dense<0.000000e+00> : vector<6xf32>
    %65 = vector.multi_reduction <add>, %64, %cst_29 [1] : vector<6x6xf32> to vector<6xf32>
    %66 = vector.shape_cast %65 : vector<6xf32> to vector<6x1xf32>
    %67 = vector.extract_strided_slice %31 {offsets = [0, 8], sizes = [6, 8], strides = [1, 1]} : vector<6x64xf32> to vector<6x8xf32>
    %cst_30 = arith.constant dense<0.000000e+00> : vector<6x8xf32>
    %68 = tpu.matmul %64, %67, %cst_30 {dimension_numbers = #tpu.dot_dimension_numbers<[1], [0], [0], [1], [0, 0, 1, 1], [], []>} : vector<6x6xf32>, vector<6x8xf32>, vector<6x8xf32> -> vector<6x8xf32>
    %69 = tpu.reciprocal %66 {approx = true} : vector<6x1xf32> -> vector<6x1xf32>
    %70 = vector.broadcast %69 : vector<6x1xf32> to vector<6x8xf32>
    %71 = arith.mulf %68, %70 : vector<6x8xf32>
    %72 = vector.extract_strided_slice %32 {offsets = [8, 0], sizes = [8, 64], strides = [1, 1]} : vector<64x64xf32> to vector<8x64xf32>
    %cst_31 = arith.constant dense<0.000000e+00> : vector<6x64xf32>
    %73 = tpu.matmul %71, %72, %cst_31 {dimension_numbers = #tpu.dot_dimension_numbers<[1], [0], [0], [1], [0, 0, 1, 1], [], []>} : vector<6x8xf32>, vector<8x64xf32>, vector<6x64xf32> -> vector<6x64xf32>
    %74 = arith.addf %53, %73 : vector<6x64xf32>
    %75 = vector.extract_strided_slice %29 {offsets = [0, 16], sizes = [6, 8], strides = [1, 1]} : vector<6x64xf32> to vector<6x8xf32>
    %76 = vector.extract_strided_slice %30 {offsets = [0, 16], sizes = [6, 8], strides = [1, 1]} : vector<6x64xf32> to vector<6x8xf32>
    %cst_32 = arith.constant dense<0.000000e+00> : vector<6x6xf32>
    %77 = tpu.matmul %75, %76, %cst_32 {dimension_numbers = #tpu.dot_dimension_numbers<[1], [1], [0], [0], [0, 0, 1, 0], [], []>} : vector<6x8xf32>, vector<6x8xf32>, vector<6x6xf32> -> vector<6x6xf32>
    %cst_33 = arith.constant 0.353553385 : f32
    %78 = vector.broadcast %cst_33 : f32 to vector<6x6xf32>
    %79 = arith.mulf %77, %78 : vector<6x6xf32>
    %80 = arith.addf %79, %33 : vector<6x6xf32>
    %cst_34 = arith.constant dense<0xFF800000> : vector<6xf32>
    %81 = vector.multi_reduction <maximumf>, %80, %cst_34 [1] : vector<6x6xf32> to vector<6xf32>
    %82 = vector.shape_cast %81 : vector<6xf32> to vector<6x1xf32>
    %83 = vector.broadcast %82 : vector<6x1xf32> to vector<6x6xf32>
    %84 = arith.subf %80, %83 : vector<6x6xf32>
    %85 = math.exp %84 : vector<6x6xf32>
    %cst_35 = arith.constant dense<0.000000e+00> : vector<6xf32>
    %86 = vector.multi_reduction <add>, %85, %cst_35 [1] : vector<6x6xf32> to vector<6xf32>
    %87 = vector.shape_cast %86 : vector<6xf32> to vector<6x1xf32>
    %88 = vector.extract_strided_slice %31 {offsets = [0, 16], sizes = [6, 8], strides = [1, 1]} : vector<6x64xf32> to vector<6x8xf32>
    %cst_36 = arith.constant dense<0.000000e+00> : vector<6x8xf32>
    %89 = tpu.matmul %85, %88, %cst_36 {dimension_numbers = #tpu.dot_dimension_numbers<[1], [0], [0], [1], [0, 0, 1, 1], [], []>} : vector<6x6xf32>, vector<6x8xf32>, vector<6x8xf32> -> vector<6x8xf32>
    %90 = tpu.reciprocal %87 {approx = true} : vector<6x1xf32> -> vector<6x1xf32>
    %91 = vector.broadcast %90 : vector<6x1xf32> to vector<6x8xf32>
    %92 = arith.mulf %89, %91 : vector<6x8xf32>
    %93 = vector.extract_strided_slice %32 {offsets = [16, 0], sizes = [8, 64], strides = [1, 1]} : vector<64x64xf32> to vector<8x64xf32>
    %cst_37 = arith.constant dense<0.000000e+00> : vector<6x64xf32>
    %94 = tpu.matmul %92, %93, %cst_37 {dimension_numbers = #tpu.dot_dimension_numbers<[1], [0], [0], [1], [0, 0, 1, 1], [], []>} : vector<6x8xf32>, vector<8x64xf32>, vector<6x64xf32> -> vector<6x64xf32>
    %95 = arith.addf %74, %94 : vector<6x64xf32>
    %96 = vector.extract_strided_slice %29 {offsets = [0, 24], sizes = [6, 8], strides = [1, 1]} : vector<6x64xf32> to vector<6x8xf32>
    %97 = vector.extract_strided_slice %30 {offsets = [0, 24], sizes = [6, 8], strides = [1, 1]} : vector<6x64xf32> to vector<6x8xf32>
    %cst_38 = arith.constant dense<0.000000e+00> : vector<6x6xf32>
    %98 = tpu.matmul %96, %97, %cst_38 {dimension_numbers = #tpu.dot_dimension_numbers<[1], [1], [0], [0], [0, 0, 1, 0], [], []>} : vector<6x8xf32>, vector<6x8xf32>, vector<6x6xf32> -> vector<6x6xf32>
    %cst_39 = arith.constant 0.353553385 : f32
    %99 = vector.broadcast %cst_39 : f32 to vector<6x6xf32>
    %100 = arith.mulf %98, %99 : vector<6x6xf32>
    %101 = arith.addf %100, %33 : vector<6x6xf32>
    %cst_40 = arith.constant dense<0xFF800000> : vector<6xf32>
    %102 = vector.multi_reduction <maximumf>, %101, %cst_40 [1] : vector<6x6xf32> to vector<6xf32>
    %103 = vector.shape_cast %102 : vector<6xf32> to vector<6x1xf32>
    %104 = vector.broadcast %103 : vector<6x1xf32> to vector<6x6xf32>
    %105 = arith.subf %101, %104 : vector<6x6xf32>
    %106 = math.exp %105 : vector<6x6xf32>
    %cst_41 = arith.constant dense<0.000000e+00> : vector<6xf32>
    %107 = vector.multi_reduction <add>, %106, %cst_41 [1] : vector<6x6xf32> to vector<6xf32>
    %108 = vector.shape_cast %107 : vector<6xf32> to vector<6x1xf32>
    %109 = vector.extract_strided_slice %31 {offsets = [0, 24], sizes = [6, 8], strides = [1, 1]} : vector<6x64xf32> to vector<6x8xf32>
    %cst_42 = arith.constant dense<0.000000e+00> : vector<6x8xf32>
    %110 = tpu.matmul %106, %109, %cst_42 {dimension_numbers = #tpu.dot_dimension_numbers<[1], [0], [0], [1], [0, 0, 1, 1], [], []>} : vector<6x6xf32>, vector<6x8xf32>, vector<6x8xf32> -> vector<6x8xf32>
    %111 = tpu.reciprocal %108 {approx = true} : vector<6x1xf32> -> vector<6x1xf32>
    %112 = vector.broadcast %111 : vector<6x1xf32> to vector<6x8xf32>
    %113 = arith.mulf %110, %112 : vector<6x8xf32>
    %114 = vector.extract_strided_slice %32 {offsets = [24, 0], sizes = [8, 64], strides = [1, 1]} : vector<64x64xf32> to vector<8x64xf32>
    %cst_43 = arith.constant dense<0.000000e+00> : vector<6x64xf32>
    %115 = tpu.matmul %113, %114, %cst_43 {dimension_numbers = #tpu.dot_dimension_numbers<[1], [0], [0], [1], [0, 0, 1, 1], [], []>} : vector<6x8xf32>, vector<8x64xf32>, vector<6x64xf32> -> vector<6x64xf32>
    %116 = arith.addf %95, %115 : vector<6x64xf32>
    %117 = vector.extract_strided_slice %29 {offsets = [0, 32], sizes = [6, 8], strides = [1, 1]} : vector<6x64xf32> to vector<6x8xf32>
    %118 = vector.extract_strided_slice %30 {offsets = [0, 32], sizes = [6, 8], strides = [1, 1]} : vector<6x64xf32> to vector<6x8xf32>
    %cst_44 = arith.constant dense<0.000000e+00> : vector<6x6xf32>
    %119 = tpu.matmul %117, %118, %cst_44 {dimension_numbers = #tpu.dot_dimension_numbers<[1], [1], [0], [0], [0, 0, 1, 0], [], []>} : vector<6x8xf32>, vector<6x8xf32>, vector<6x6xf32> -> vector<6x6xf32>
    %cst_45 = arith.constant 0.353553385 : f32
    %120 = vector.broadcast %cst_45 : f32 to vector<6x6xf32>
    %121 = arith.mulf %119, %120 : vector<6x6xf32>
    %122 = arith.addf %121, %33 : vector<6x6xf32>
    %cst_46 = arith.constant dense<0xFF800000> : vector<6xf32>
    %123 = vector.multi_reduction <maximumf>, %122, %cst_46 [1] : vector<6x6xf32> to vector<6xf32>
    %124 = vector.shape_cast %123 : vector<6xf32> to vector<6x1xf32>
    %125 = vector.broadcast %124 : vector<6x1xf32> to vector<6x6xf32>
    %126 = arith.subf %122, %125 : vector<6x6xf32>
    %127 = math.exp %126 : vector<6x6xf32>
    %cst_47 = arith.constant dense<0.000000e+00> : vector<6xf32>
    %128 = vector.multi_reduction <add>, %127, %cst_47 [1] : vector<6x6xf32> to vector<6xf32>
    %129 = vector.shape_cast %128 : vector<6xf32> to vector<6x1xf32>
    %130 = vector.extract_strided_slice %31 {offsets = [0, 32], sizes = [6, 8], strides = [1, 1]} : vector<6x64xf32> to vector<6x8xf32>
    %cst_48 = arith.constant dense<0.000000e+00> : vector<6x8xf32>
    %131 = tpu.matmul %127, %130, %cst_48 {dimension_numbers = #tpu.dot_dimension_numbers<[1], [0], [0], [1], [0, 0, 1, 1], [], []>} : vector<6x6xf32>, vector<6x8xf32>, vector<6x8xf32> -> vector<6x8xf32>
    %132 = tpu.reciprocal %129 {approx = true} : vector<6x1xf32> -> vector<6x1xf32>
    %133 = vector.broadcast %132 : vector<6x1xf32> to vector<6x8xf32>
    %134 = arith.mulf %131, %133 : vector<6x8xf32>
    %135 = vector.extract_strided_slice %32 {offsets = [32, 0], sizes = [8, 64], strides = [1, 1]} : vector<64x64xf32> to vector<8x64xf32>
    %cst_49 = arith.constant dense<0.000000e+00> : vector<6x64xf32>
    %136 = tpu.matmul %134, %135, %cst_49 {dimension_numbers = #tpu.dot_dimension_numbers<[1], [0], [0], [1], [0, 0, 1, 1], [], []>} : vector<6x8xf32>, vector<8x64xf32>, vector<6x64xf32> -> vector<6x64xf32>
    %137 = arith.addf %116, %136 : vector<6x64xf32>
    %138 = vector.extract_strided_slice %29 {offsets = [0, 40], sizes = [6, 8], strides = [1, 1]} : vector<6x64xf32> to vector<6x8xf32>
    %139 = vector.extract_strided_slice %30 {offsets = [0, 40], sizes = [6, 8], strides = [1, 1]} : vector<6x64xf32> to vector<6x8xf32>
    %cst_50 = arith.constant dense<0.000000e+00> : vector<6x6xf32>
    %140 = tpu.matmul %138, %139, %cst_50 {dimension_numbers = #tpu.dot_dimension_numbers<[1], [1], [0], [0], [0, 0, 1, 0], [], []>} : vector<6x8xf32>, vector<6x8xf32>, vector<6x6xf32> -> vector<6x6xf32>
    %cst_51 = arith.constant 0.353553385 : f32
    %141 = vector.broadcast %cst_51 : f32 to vector<6x6xf32>
    %142 = arith.mulf %140, %141 : vector<6x6xf32>
    %143 = arith.addf %142, %33 : vector<6x6xf32>
    %cst_52 = arith.constant dense<0xFF800000> : vector<6xf32>
    %144 = vector.multi_reduction <maximumf>, %143, %cst_52 [1] : vector<6x6xf32> to vector<6xf32>
    %145 = vector.shape_cast %144 : vector<6xf32> to vector<6x1xf32>
    %146 = vector.broadcast %145 : vector<6x1xf32> to vector<6x6xf32>
    %147 = arith.subf %143, %146 : vector<6x6xf32>
    %148 = math.exp %147 : vector<6x6xf32>
    %cst_53 = arith.constant dense<0.000000e+00> : vector<6xf32>
    %149 = vector.multi_reduction <add>, %148, %cst_53 [1] : vector<6x6xf32> to vector<6xf32>
    %150 = vector.shape_cast %149 : vector<6xf32> to vector<6x1xf32>
    %151 = vector.extract_strided_slice %31 {offsets = [0, 40], sizes = [6, 8], strides = [1, 1]} : vector<6x64xf32> to vector<6x8xf32>
    %cst_54 = arith.constant dense<0.000000e+00> : vector<6x8xf32>
    %152 = tpu.matmul %148, %151, %cst_54 {dimension_numbers = #tpu.dot_dimension_numbers<[1], [0], [0], [1], [0, 0, 1, 1], [], []>} : vector<6x6xf32>, vector<6x8xf32>, vector<6x8xf32> -> vector<6x8xf32>
    %153 = tpu.reciprocal %150 {approx = true} : vector<6x1xf32> -> vector<6x1xf32>
    %154 = vector.broadcast %153 : vector<6x1xf32> to vector<6x8xf32>
    %155 = arith.mulf %152, %154 : vector<6x8xf32>
    %156 = vector.extract_strided_slice %32 {offsets = [40, 0], sizes = [8, 64], strides = [1, 1]} : vector<64x64xf32> to vector<8x64xf32>
    %cst_55 = arith.constant dense<0.000000e+00> : vector<6x64xf32>
    %157 = tpu.matmul %155, %156, %cst_55 {dimension_numbers = #tpu.dot_dimension_numbers<[1], [0], [0], [1], [0, 0, 1, 1], [], []>} : vector<6x8xf32>, vector<8x64xf32>, vector<6x64xf32> -> vector<6x64xf32>
    %158 = arith.addf %137, %157 : vector<6x64xf32>
    %159 = vector.extract_strided_slice %29 {offsets = [0, 48], sizes = [6, 8], strides = [1, 1]} : vector<6x64xf32> to vector<6x8xf32>
    %160 = vector.extract_strided_slice %30 {offsets = [0, 48], sizes = [6, 8], strides = [1, 1]} : vector<6x64xf32> to vector<6x8xf32>
    %cst_56 = arith.constant dense<0.000000e+00> : vector<6x6xf32>
    %161 = tpu.matmul %159, %160, %cst_56 {dimension_numbers = #tpu.dot_dimension_numbers<[1], [1], [0], [0], [0, 0, 1, 0], [], []>} : vector<6x8xf32>, vector<6x8xf32>, vector<6x6xf32> -> vector<6x6xf32>
    %cst_57 = arith.constant 0.353553385 : f32
    %162 = vector.broadcast %cst_57 : f32 to vector<6x6xf32>
    %163 = arith.mulf %161, %162 : vector<6x6xf32>
    %164 = arith.addf %163, %33 : vector<6x6xf32>
    %cst_58 = arith.constant dense<0xFF800000> : vector<6xf32>
    %165 = vector.multi_reduction <maximumf>, %164, %cst_58 [1] : vector<6x6xf32> to vector<6xf32>
    %166 = vector.shape_cast %165 : vector<6xf32> to vector<6x1xf32>
    %167 = vector.broadcast %166 : vector<6x1xf32> to vector<6x6xf32>
    %168 = arith.subf %164, %167 : vector<6x6xf32>
    %169 = math.exp %168 : vector<6x6xf32>
    %cst_59 = arith.constant dense<0.000000e+00> : vector<6xf32>
    %170 = vector.multi_reduction <add>, %169, %cst_59 [1] : vector<6x6xf32> to vector<6xf32>
    %171 = vector.shape_cast %170 : vector<6xf32> to vector<6x1xf32>
    %172 = vector.extract_strided_slice %31 {offsets = [0, 48], sizes = [6, 8], strides = [1, 1]} : vector<6x64xf32> to vector<6x8xf32>
    %cst_60 = arith.constant dense<0.000000e+00> : vector<6x8xf32>
    %173 = tpu.matmul %169, %172, %cst_60 {dimension_numbers = #tpu.dot_dimension_numbers<[1], [0], [0], [1], [0, 0, 1, 1], [], []>} : vector<6x6xf32>, vector<6x8xf32>, vector<6x8xf32> -> vector<6x8xf32>
    %174 = tpu.reciprocal %171 {approx = true} : vector<6x1xf32> -> vector<6x1xf32>
    %175 = vector.broadcast %174 : vector<6x1xf32> to vector<6x8xf32>
    %176 = arith.mulf %173, %175 : vector<6x8xf32>
    %177 = vector.extract_strided_slice %32 {offsets = [48, 0], sizes = [8, 64], strides = [1, 1]} : vector<64x64xf32> to vector<8x64xf32>
    %cst_61 = arith.constant dense<0.000000e+00> : vector<6x64xf32>
    %178 = tpu.matmul %176, %177, %cst_61 {dimension_numbers = #tpu.dot_dimension_numbers<[1], [0], [0], [1], [0, 0, 1, 1], [], []>} : vector<6x8xf32>, vector<8x64xf32>, vector<6x64xf32> -> vector<6x64xf32>
    %179 = arith.addf %158, %178 : vector<6x64xf32>
    %180 = vector.extract_strided_slice %29 {offsets = [0, 56], sizes = [6, 8], strides = [1, 1]} : vector<6x64xf32> to vector<6x8xf32>
    %181 = vector.extract_strided_slice %30 {offsets = [0, 56], sizes = [6, 8], strides = [1, 1]} : vector<6x64xf32> to vector<6x8xf32>
    %cst_62 = arith.constant dense<0.000000e+00> : vector<6x6xf32>
    %182 = tpu.matmul %180, %181, %cst_62 {dimension_numbers = #tpu.dot_dimension_numbers<[1], [1], [0], [0], [0, 0, 1, 0], [], []>} : vector<6x8xf32>, vector<6x8xf32>, vector<6x6xf32> -> vector<6x6xf32>
    %cst_63 = arith.constant 0.353553385 : f32
    %183 = vector.broadcast %cst_63 : f32 to vector<6x6xf32>
    %184 = arith.mulf %182, %183 : vector<6x6xf32>
    %185 = arith.addf %184, %33 : vector<6x6xf32>
    %cst_64 = arith.constant dense<0xFF800000> : vector<6xf32>
    %186 = vector.multi_reduction <maximumf>, %185, %cst_64 [1] : vector<6x6xf32> to vector<6xf32>
    %187 = vector.shape_cast %186 : vector<6xf32> to vector<6x1xf32>
    %188 = vector.broadcast %187 : vector<6x1xf32> to vector<6x6xf32>
    %189 = arith.subf %185, %188 : vector<6x6xf32>
    %190 = math.exp %189 : vector<6x6xf32>
    %cst_65 = arith.constant dense<0.000000e+00> : vector<6xf32>
    %191 = vector.multi_reduction <add>, %190, %cst_65 [1] : vector<6x6xf32> to vector<6xf32>
    %192 = vector.shape_cast %191 : vector<6xf32> to vector<6x1xf32>
    %193 = vector.extract_strided_slice %31 {offsets = [0, 56], sizes = [6, 8], strides = [1, 1]} : vector<6x64xf32> to vector<6x8xf32>
    %cst_66 = arith.constant dense<0.000000e+00> : vector<6x8xf32>
    %194 = tpu.matmul %190, %193, %cst_66 {dimension_numbers = #tpu.dot_dimension_numbers<[1], [0], [0], [1], [0, 0, 1, 1], [], []>} : vector<6x6xf32>, vector<6x8xf32>, vector<6x8xf32> -> vector<6x8xf32>
    %195 = tpu.reciprocal %192 {approx = true} : vector<6x1xf32> -> vector<6x1xf32>
    %196 = vector.broadcast %195 : vector<6x1xf32> to vector<6x8xf32>
    %197 = arith.mulf %194, %196 : vector<6x8xf32>
    %198 = vector.extract_strided_slice %32 {offsets = [56, 0], sizes = [8, 64], strides = [1, 1]} : vector<64x64xf32> to vector<8x64xf32>
    %cst_67 = arith.constant dense<0.000000e+00> : vector<6x64xf32>
    %199 = tpu.matmul %197, %198, %cst_67 {dimension_numbers = #tpu.dot_dimension_numbers<[1], [0], [0], [1], [0, 0, 1, 1], [], []>} : vector<6x8xf32>, vector<8x64xf32>, vector<6x64xf32> -> vector<6x64xf32>
    %200 = arith.addf %179, %199 : vector<6x64xf32>
    %c0_68 = arith.constant 0 : index
    %c0_69 = arith.constant 0 : index
    %201 = vector.load %arg10[%c0_68, %c0_69] : memref<1x64xf32, #tpu.memory_space<vmem>>, vector<1x64xf32>
    %202 = vector.broadcast %201 : vector<1x64xf32> to vector<6x64xf32>
    %203 = arith.addf %200, %202 : vector<6x64xf32>
    %204 = arith.addf %23, %203 : vector<6x64xf32>
    %c0_70 = arith.constant 0 : index
    %c0_71 = arith.constant 0 : index
    %205 = vector.load %arg11[%c0_70, %c0_71] : memref<1x64xf32, #tpu.memory_space<vmem>>, vector<1x64xf32>
    %c0_72 = arith.constant 0 : index
    %c0_73 = arith.constant 0 : index
    %206 = vector.load %arg12[%c0_72, %c0_73] : memref<1x64xf32, #tpu.memory_space<vmem>>, vector<1x64xf32>
    %cst_74 = arith.constant dense<0.000000e+00> : vector<6xf32>
    %207 = vector.multi_reduction <add>, %204, %cst_74 [1] : vector<6x64xf32> to vector<6xf32>
    %208 = vector.shape_cast %207 : vector<6xf32> to vector<6x1xf32>
    %cst_75 = arith.constant 6.400000e+01 : f32
    %209 = vector.broadcast %cst_75 : f32 to vector<6x1xf32>
    %210 = arith.divf %208, %209 : vector<6x1xf32>
    %211 = vector.broadcast %210 : vector<6x1xf32> to vector<6x64xf32>
    %212 = arith.subf %204, %211 : vector<6x64xf32>
    %213 = arith.mulf %212, %212 : vector<6x64xf32>
    %cst_76 = arith.constant dense<0.000000e+00> : vector<6xf32>
    %214 = vector.multi_reduction <add>, %213, %cst_76 [1] : vector<6x64xf32> to vector<6xf32>
    %215 = vector.shape_cast %214 : vector<6xf32> to vector<6x1xf32>
    %cst_77 = arith.constant 6.400000e+01 : f32
    %216 = vector.broadcast %cst_77 : f32 to vector<6x1xf32>
    %217 = arith.divf %215, %216 : vector<6x1xf32>
    %cst_78 = arith.constant 9.99999974E-6 : f32
    %218 = vector.broadcast %cst_78 : f32 to vector<6x1xf32>
    %219 = arith.addf %217, %218 : vector<6x1xf32>
    %220 = math.rsqrt %219 : vector<6x1xf32>
    %221 = vector.broadcast %220 : vector<6x1xf32> to vector<6x64xf32>
    %222 = arith.mulf %212, %221 : vector<6x64xf32>
    %223 = vector.broadcast %205 : vector<1x64xf32> to vector<6x64xf32>
    %224 = arith.mulf %222, %223 : vector<6x64xf32>
    %225 = vector.broadcast %206 : vector<1x64xf32> to vector<6x64xf32>
    %226 = arith.addf %224, %225 : vector<6x64xf32>
    %c0_79 = arith.constant 0 : index
    %c0_80 = arith.constant 0 : index
    %227 = vector.load %arg13[%c0_79, %c0_80] : memref<64x64xf32, #tpu.memory_space<vmem>>, vector<64x64xf32>
    %cst_81 = arith.constant dense<0.000000e+00> : vector<6x64xf32>
    %228 = tpu.matmul %226, %227, %cst_81 {dimension_numbers = #tpu.dot_dimension_numbers<[1], [0], [0], [1], [0, 0, 1, 1], [], []>} : vector<6x64xf32>, vector<64x64xf32>, vector<6x64xf32> -> vector<6x64xf32>
    %c0_82 = arith.constant 0 : index
    %c0_83 = arith.constant 0 : index
    %229 = vector.load %arg14[%c0_82, %c0_83] : memref<1x64xf32, #tpu.memory_space<vmem>>, vector<1x64xf32>
    %230 = vector.broadcast %229 : vector<1x64xf32> to vector<6x64xf32>
    %231 = arith.addf %228, %230 : vector<6x64xf32>
    %c0_84 = arith.constant 0 : index
    %c0_85 = arith.constant 0 : index
    %232 = vector.load %arg15[%c0_84, %c0_85] : memref<64x128xf32, #tpu.memory_space<vmem>>, vector<64x128xf32>
    %cst_86 = arith.constant dense<0.000000e+00> : vector<16x128xf32>
    %233 = tpu.matmul %22, %232, %cst_86 {dimension_numbers = #tpu.dot_dimension_numbers<[1], [0], [0], [1], [0, 0, 1, 1], [], []>} : vector<16x64xf32>, vector<64x128xf32>, vector<16x128xf32> -> vector<16x128xf32>
    %c0_87 = arith.constant 0 : index
    %c0_88 = arith.constant 0 : index
    %234 = vector.load %arg16[%c0_87, %c0_88] : memref<1x128xf32, #tpu.memory_space<vmem>>, vector<1x128xf32>
    %235 = vector.broadcast %234 : vector<1x128xf32> to vector<16x128xf32>
    %236 = arith.addf %233, %235 : vector<16x128xf32>
    %237 = vector.extract_strided_slice %236 {offsets = [0, 0], sizes = [16, 64], strides = [1, 1]} : vector<16x128xf32> to vector<16x64xf32>
    %238 = vector.extract_strided_slice %236 {offsets = [0, 64], sizes = [16, 64], strides = [1, 1]} : vector<16x128xf32> to vector<16x64xf32>
    %c0_89 = arith.constant 0 : index
    %c0_90 = arith.constant 0 : index
    %239 = vector.load %arg17[%c0_89, %c0_90] : memref<64x64xf32, #tpu.memory_space<vmem>>, vector<64x64xf32>
    %c0_91 = arith.constant 0 : index
    %c0_92 = arith.constant 0 : index
    %240 = vector.load %arg4[%c0_91, %c0_92] : memref<6x16xf32, #tpu.memory_space<vmem>>, vector<6x16xf32>
    %241 = vector.extract_strided_slice %231 {offsets = [0, 0], sizes = [6, 8], strides = [1, 1]} : vector<6x64xf32> to vector<6x8xf32>
    %242 = vector.extract_strided_slice %237 {offsets = [0, 0], sizes = [16, 8], strides = [1, 1]} : vector<16x64xf32> to vector<16x8xf32>
    %cst_93 = arith.constant dense<0.000000e+00> : vector<6x16xf32>
    %243 = tpu.matmul %241, %242, %cst_93 {dimension_numbers = #tpu.dot_dimension_numbers<[1], [1], [0], [0], [0, 0, 1, 0], [], []>} : vector<6x8xf32>, vector<16x8xf32>, vector<6x16xf32> -> vector<6x16xf32>
    %cst_94 = arith.constant 0.353553385 : f32
    %244 = vector.broadcast %cst_94 : f32 to vector<6x16xf32>
    %245 = arith.mulf %243, %244 : vector<6x16xf32>
    %246 = arith.addf %245, %240 : vector<6x16xf32>
    %cst_95 = arith.constant dense<0xFF800000> : vector<6xf32>
    %247 = vector.multi_reduction <maximumf>, %246, %cst_95 [1] : vector<6x16xf32> to vector<6xf32>
    %248 = vector.shape_cast %247 : vector<6xf32> to vector<6x1xf32>
    %249 = vector.broadcast %248 : vector<6x1xf32> to vector<6x16xf32>
    %250 = arith.subf %246, %249 : vector<6x16xf32>
    %251 = math.exp %250 : vector<6x16xf32>
    %cst_96 = arith.constant dense<0.000000e+00> : vector<6xf32>
    %252 = vector.multi_reduction <add>, %251, %cst_96 [1] : vector<6x16xf32> to vector<6xf32>
    %253 = vector.shape_cast %252 : vector<6xf32> to vector<6x1xf32>
    %254 = vector.extract_strided_slice %238 {offsets = [0, 0], sizes = [16, 8], strides = [1, 1]} : vector<16x64xf32> to vector<16x8xf32>
    %cst_97 = arith.constant dense<0.000000e+00> : vector<6x8xf32>
    %255 = tpu.matmul %251, %254, %cst_97 {dimension_numbers = #tpu.dot_dimension_numbers<[1], [0], [0], [1], [0, 0, 1, 1], [], []>} : vector<6x16xf32>, vector<16x8xf32>, vector<6x8xf32> -> vector<6x8xf32>
    %256 = tpu.reciprocal %253 {approx = true} : vector<6x1xf32> -> vector<6x1xf32>
    %257 = vector.broadcast %256 : vector<6x1xf32> to vector<6x8xf32>
    %258 = arith.mulf %255, %257 : vector<6x8xf32>
    %259 = vector.extract_strided_slice %239 {offsets = [0, 0], sizes = [8, 64], strides = [1, 1]} : vector<64x64xf32> to vector<8x64xf32>
    %cst_98 = arith.constant dense<0.000000e+00> : vector<6x64xf32>
    %260 = tpu.matmul %258, %259, %cst_98 {dimension_numbers = #tpu.dot_dimension_numbers<[1], [0], [0], [1], [0, 0, 1, 1], [], []>} : vector<6x8xf32>, vector<8x64xf32>, vector<6x64xf32> -> vector<6x64xf32>
    %261 = vector.extract_strided_slice %231 {offsets = [0, 8], sizes = [6, 8], strides = [1, 1]} : vector<6x64xf32> to vector<6x8xf32>
    %262 = vector.extract_strided_slice %237 {offsets = [0, 8], sizes = [16, 8], strides = [1, 1]} : vector<16x64xf32> to vector<16x8xf32>
    %cst_99 = arith.constant dense<0.000000e+00> : vector<6x16xf32>
    %263 = tpu.matmul %261, %262, %cst_99 {dimension_numbers = #tpu.dot_dimension_numbers<[1], [1], [0], [0], [0, 0, 1, 0], [], []>} : vector<6x8xf32>, vector<16x8xf32>, vector<6x16xf32> -> vector<6x16xf32>
    %cst_100 = arith.constant 0.353553385 : f32
    %264 = vector.broadcast %cst_100 : f32 to vector<6x16xf32>
    %265 = arith.mulf %263, %264 : vector<6x16xf32>
    %266 = arith.addf %265, %240 : vector<6x16xf32>
    %cst_101 = arith.constant dense<0xFF800000> : vector<6xf32>
    %267 = vector.multi_reduction <maximumf>, %266, %cst_101 [1] : vector<6x16xf32> to vector<6xf32>
    %268 = vector.shape_cast %267 : vector<6xf32> to vector<6x1xf32>
    %269 = vector.broadcast %268 : vector<6x1xf32> to vector<6x16xf32>
    %270 = arith.subf %266, %269 : vector<6x16xf32>
    %271 = math.exp %270 : vector<6x16xf32>
    %cst_102 = arith.constant dense<0.000000e+00> : vector<6xf32>
    %272 = vector.multi_reduction <add>, %271, %cst_102 [1] : vector<6x16xf32> to vector<6xf32>
    %273 = vector.shape_cast %272 : vector<6xf32> to vector<6x1xf32>
    %274 = vector.extract_strided_slice %238 {offsets = [0, 8], sizes = [16, 8], strides = [1, 1]} : vector<16x64xf32> to vector<16x8xf32>
    %cst_103 = arith.constant dense<0.000000e+00> : vector<6x8xf32>
    %275 = tpu.matmul %271, %274, %cst_103 {dimension_numbers = #tpu.dot_dimension_numbers<[1], [0], [0], [1], [0, 0, 1, 1], [], []>} : vector<6x16xf32>, vector<16x8xf32>, vector<6x8xf32> -> vector<6x8xf32>
    %276 = tpu.reciprocal %273 {approx = true} : vector<6x1xf32> -> vector<6x1xf32>
    %277 = vector.broadcast %276 : vector<6x1xf32> to vector<6x8xf32>
    %278 = arith.mulf %275, %277 : vector<6x8xf32>
    %279 = vector.extract_strided_slice %239 {offsets = [8, 0], sizes = [8, 64], strides = [1, 1]} : vector<64x64xf32> to vector<8x64xf32>
    %cst_104 = arith.constant dense<0.000000e+00> : vector<6x64xf32>
    %280 = tpu.matmul %278, %279, %cst_104 {dimension_numbers = #tpu.dot_dimension_numbers<[1], [0], [0], [1], [0, 0, 1, 1], [], []>} : vector<6x8xf32>, vector<8x64xf32>, vector<6x64xf32> -> vector<6x64xf32>
    %281 = arith.addf %260, %280 : vector<6x64xf32>
    %282 = vector.extract_strided_slice %231 {offsets = [0, 16], sizes = [6, 8], strides = [1, 1]} : vector<6x64xf32> to vector<6x8xf32>
    %283 = vector.extract_strided_slice %237 {offsets = [0, 16], sizes = [16, 8], strides = [1, 1]} : vector<16x64xf32> to vector<16x8xf32>
    %cst_105 = arith.constant dense<0.000000e+00> : vector<6x16xf32>
    %284 = tpu.matmul %282, %283, %cst_105 {dimension_numbers = #tpu.dot_dimension_numbers<[1], [1], [0], [0], [0, 0, 1, 0], [], []>} : vector<6x8xf32>, vector<16x8xf32>, vector<6x16xf32> -> vector<6x16xf32>
    %cst_106 = arith.constant 0.353553385 : f32
    %285 = vector.broadcast %cst_106 : f32 to vector<6x16xf32>
    %286 = arith.mulf %284, %285 : vector<6x16xf32>
    %287 = arith.addf %286, %240 : vector<6x16xf32>
    %cst_107 = arith.constant dense<0xFF800000> : vector<6xf32>
    %288 = vector.multi_reduction <maximumf>, %287, %cst_107 [1] : vector<6x16xf32> to vector<6xf32>
    %289 = vector.shape_cast %288 : vector<6xf32> to vector<6x1xf32>
    %290 = vector.broadcast %289 : vector<6x1xf32> to vector<6x16xf32>
    %291 = arith.subf %287, %290 : vector<6x16xf32>
    %292 = math.exp %291 : vector<6x16xf32>
    %cst_108 = arith.constant dense<0.000000e+00> : vector<6xf32>
    %293 = vector.multi_reduction <add>, %292, %cst_108 [1] : vector<6x16xf32> to vector<6xf32>
    %294 = vector.shape_cast %293 : vector<6xf32> to vector<6x1xf32>
    %295 = vector.extract_strided_slice %238 {offsets = [0, 16], sizes = [16, 8], strides = [1, 1]} : vector<16x64xf32> to vector<16x8xf32>
    %cst_109 = arith.constant dense<0.000000e+00> : vector<6x8xf32>
    %296 = tpu.matmul %292, %295, %cst_109 {dimension_numbers = #tpu.dot_dimension_numbers<[1], [0], [0], [1], [0, 0, 1, 1], [], []>} : vector<6x16xf32>, vector<16x8xf32>, vector<6x8xf32> -> vector<6x8xf32>
    %297 = tpu.reciprocal %294 {approx = true} : vector<6x1xf32> -> vector<6x1xf32>
    %298 = vector.broadcast %297 : vector<6x1xf32> to vector<6x8xf32>
    %299 = arith.mulf %296, %298 : vector<6x8xf32>
    %300 = vector.extract_strided_slice %239 {offsets = [16, 0], sizes = [8, 64], strides = [1, 1]} : vector<64x64xf32> to vector<8x64xf32>
    %cst_110 = arith.constant dense<0.000000e+00> : vector<6x64xf32>
    %301 = tpu.matmul %299, %300, %cst_110 {dimension_numbers = #tpu.dot_dimension_numbers<[1], [0], [0], [1], [0, 0, 1, 1], [], []>} : vector<6x8xf32>, vector<8x64xf32>, vector<6x64xf32> -> vector<6x64xf32>
    %302 = arith.addf %281, %301 : vector<6x64xf32>
    %303 = vector.extract_strided_slice %231 {offsets = [0, 24], sizes = [6, 8], strides = [1, 1]} : vector<6x64xf32> to vector<6x8xf32>
    %304 = vector.extract_strided_slice %237 {offsets = [0, 24], sizes = [16, 8], strides = [1, 1]} : vector<16x64xf32> to vector<16x8xf32>
    %cst_111 = arith.constant dense<0.000000e+00> : vector<6x16xf32>
    %305 = tpu.matmul %303, %304, %cst_111 {dimension_numbers = #tpu.dot_dimension_numbers<[1], [1], [0], [0], [0, 0, 1, 0], [], []>} : vector<6x8xf32>, vector<16x8xf32>, vector<6x16xf32> -> vector<6x16xf32>
    %cst_112 = arith.constant 0.353553385 : f32
    %306 = vector.broadcast %cst_112 : f32 to vector<6x16xf32>
    %307 = arith.mulf %305, %306 : vector<6x16xf32>
    %308 = arith.addf %307, %240 : vector<6x16xf32>
    %cst_113 = arith.constant dense<0xFF800000> : vector<6xf32>
    %309 = vector.multi_reduction <maximumf>, %308, %cst_113 [1] : vector<6x16xf32> to vector<6xf32>
    %310 = vector.shape_cast %309 : vector<6xf32> to vector<6x1xf32>
    %311 = vector.broadcast %310 : vector<6x1xf32> to vector<6x16xf32>
    %312 = arith.subf %308, %311 : vector<6x16xf32>
    %313 = math.exp %312 : vector<6x16xf32>
    %cst_114 = arith.constant dense<0.000000e+00> : vector<6xf32>
    %314 = vector.multi_reduction <add>, %313, %cst_114 [1] : vector<6x16xf32> to vector<6xf32>
    %315 = vector.shape_cast %314 : vector<6xf32> to vector<6x1xf32>
    %316 = vector.extract_strided_slice %238 {offsets = [0, 24], sizes = [16, 8], strides = [1, 1]} : vector<16x64xf32> to vector<16x8xf32>
    %cst_115 = arith.constant dense<0.000000e+00> : vector<6x8xf32>
    %317 = tpu.matmul %313, %316, %cst_115 {dimension_numbers = #tpu.dot_dimension_numbers<[1], [0], [0], [1], [0, 0, 1, 1], [], []>} : vector<6x16xf32>, vector<16x8xf32>, vector<6x8xf32> -> vector<6x8xf32>
    %318 = tpu.reciprocal %315 {approx = true} : vector<6x1xf32> -> vector<6x1xf32>
    %319 = vector.broadcast %318 : vector<6x1xf32> to vector<6x8xf32>
    %320 = arith.mulf %317, %319 : vector<6x8xf32>
    %321 = vector.extract_strided_slice %239 {offsets = [24, 0], sizes = [8, 64], strides = [1, 1]} : vector<64x64xf32> to vector<8x64xf32>
    %cst_116 = arith.constant dense<0.000000e+00> : vector<6x64xf32>
    %322 = tpu.matmul %320, %321, %cst_116 {dimension_numbers = #tpu.dot_dimension_numbers<[1], [0], [0], [1], [0, 0, 1, 1], [], []>} : vector<6x8xf32>, vector<8x64xf32>, vector<6x64xf32> -> vector<6x64xf32>
    %323 = arith.addf %302, %322 : vector<6x64xf32>
    %324 = vector.extract_strided_slice %231 {offsets = [0, 32], sizes = [6, 8], strides = [1, 1]} : vector<6x64xf32> to vector<6x8xf32>
    %325 = vector.extract_strided_slice %237 {offsets = [0, 32], sizes = [16, 8], strides = [1, 1]} : vector<16x64xf32> to vector<16x8xf32>
    %cst_117 = arith.constant dense<0.000000e+00> : vector<6x16xf32>
    %326 = tpu.matmul %324, %325, %cst_117 {dimension_numbers = #tpu.dot_dimension_numbers<[1], [1], [0], [0], [0, 0, 1, 0], [], []>} : vector<6x8xf32>, vector<16x8xf32>, vector<6x16xf32> -> vector<6x16xf32>
    %cst_118 = arith.constant 0.353553385 : f32
    %327 = vector.broadcast %cst_118 : f32 to vector<6x16xf32>
    %328 = arith.mulf %326, %327 : vector<6x16xf32>
    %329 = arith.addf %328, %240 : vector<6x16xf32>
    %cst_119 = arith.constant dense<0xFF800000> : vector<6xf32>
    %330 = vector.multi_reduction <maximumf>, %329, %cst_119 [1] : vector<6x16xf32> to vector<6xf32>
    %331 = vector.shape_cast %330 : vector<6xf32> to vector<6x1xf32>
    %332 = vector.broadcast %331 : vector<6x1xf32> to vector<6x16xf32>
    %333 = arith.subf %329, %332 : vector<6x16xf32>
    %334 = math.exp %333 : vector<6x16xf32>
    %cst_120 = arith.constant dense<0.000000e+00> : vector<6xf32>
    %335 = vector.multi_reduction <add>, %334, %cst_120 [1] : vector<6x16xf32> to vector<6xf32>
    %336 = vector.shape_cast %335 : vector<6xf32> to vector<6x1xf32>
    %337 = vector.extract_strided_slice %238 {offsets = [0, 32], sizes = [16, 8], strides = [1, 1]} : vector<16x64xf32> to vector<16x8xf32>
    %cst_121 = arith.constant dense<0.000000e+00> : vector<6x8xf32>
    %338 = tpu.matmul %334, %337, %cst_121 {dimension_numbers = #tpu.dot_dimension_numbers<[1], [0], [0], [1], [0, 0, 1, 1], [], []>} : vector<6x16xf32>, vector<16x8xf32>, vector<6x8xf32> -> vector<6x8xf32>
    %339 = tpu.reciprocal %336 {approx = true} : vector<6x1xf32> -> vector<6x1xf32>
    %340 = vector.broadcast %339 : vector<6x1xf32> to vector<6x8xf32>
    %341 = arith.mulf %338, %340 : vector<6x8xf32>
    %342 = vector.extract_strided_slice %239 {offsets = [32, 0], sizes = [8, 64], strides = [1, 1]} : vector<64x64xf32> to vector<8x64xf32>
    %cst_122 = arith.constant dense<0.000000e+00> : vector<6x64xf32>
    %343 = tpu.matmul %341, %342, %cst_122 {dimension_numbers = #tpu.dot_dimension_numbers<[1], [0], [0], [1], [0, 0, 1, 1], [], []>} : vector<6x8xf32>, vector<8x64xf32>, vector<6x64xf32> -> vector<6x64xf32>
    %344 = arith.addf %323, %343 : vector<6x64xf32>
    %345 = vector.extract_strided_slice %231 {offsets = [0, 40], sizes = [6, 8], strides = [1, 1]} : vector<6x64xf32> to vector<6x8xf32>
    %346 = vector.extract_strided_slice %237 {offsets = [0, 40], sizes = [16, 8], strides = [1, 1]} : vector<16x64xf32> to vector<16x8xf32>
    %cst_123 = arith.constant dense<0.000000e+00> : vector<6x16xf32>
    %347 = tpu.matmul %345, %346, %cst_123 {dimension_numbers = #tpu.dot_dimension_numbers<[1], [1], [0], [0], [0, 0, 1, 0], [], []>} : vector<6x8xf32>, vector<16x8xf32>, vector<6x16xf32> -> vector<6x16xf32>
    %cst_124 = arith.constant 0.353553385 : f32
    %348 = vector.broadcast %cst_124 : f32 to vector<6x16xf32>
    %349 = arith.mulf %347, %348 : vector<6x16xf32>
    %350 = arith.addf %349, %240 : vector<6x16xf32>
    %cst_125 = arith.constant dense<0xFF800000> : vector<6xf32>
    %351 = vector.multi_reduction <maximumf>, %350, %cst_125 [1] : vector<6x16xf32> to vector<6xf32>
    %352 = vector.shape_cast %351 : vector<6xf32> to vector<6x1xf32>
    %353 = vector.broadcast %352 : vector<6x1xf32> to vector<6x16xf32>
    %354 = arith.subf %350, %353 : vector<6x16xf32>
    %355 = math.exp %354 : vector<6x16xf32>
    %cst_126 = arith.constant dense<0.000000e+00> : vector<6xf32>
    %356 = vector.multi_reduction <add>, %355, %cst_126 [1] : vector<6x16xf32> to vector<6xf32>
    %357 = vector.shape_cast %356 : vector<6xf32> to vector<6x1xf32>
    %358 = vector.extract_strided_slice %238 {offsets = [0, 40], sizes = [16, 8], strides = [1, 1]} : vector<16x64xf32> to vector<16x8xf32>
    %cst_127 = arith.constant dense<0.000000e+00> : vector<6x8xf32>
    %359 = tpu.matmul %355, %358, %cst_127 {dimension_numbers = #tpu.dot_dimension_numbers<[1], [0], [0], [1], [0, 0, 1, 1], [], []>} : vector<6x16xf32>, vector<16x8xf32>, vector<6x8xf32> -> vector<6x8xf32>
    %360 = tpu.reciprocal %357 {approx = true} : vector<6x1xf32> -> vector<6x1xf32>
    %361 = vector.broadcast %360 : vector<6x1xf32> to vector<6x8xf32>
    %362 = arith.mulf %359, %361 : vector<6x8xf32>
    %363 = vector.extract_strided_slice %239 {offsets = [40, 0], sizes = [8, 64], strides = [1, 1]} : vector<64x64xf32> to vector<8x64xf32>
    %cst_128 = arith.constant dense<0.000000e+00> : vector<6x64xf32>
    %364 = tpu.matmul %362, %363, %cst_128 {dimension_numbers = #tpu.dot_dimension_numbers<[1], [0], [0], [1], [0, 0, 1, 1], [], []>} : vector<6x8xf32>, vector<8x64xf32>, vector<6x64xf32> -> vector<6x64xf32>
    %365 = arith.addf %344, %364 : vector<6x64xf32>
    %366 = vector.extract_strided_slice %231 {offsets = [0, 48], sizes = [6, 8], strides = [1, 1]} : vector<6x64xf32> to vector<6x8xf32>
    %367 = vector.extract_strided_slice %237 {offsets = [0, 48], sizes = [16, 8], strides = [1, 1]} : vector<16x64xf32> to vector<16x8xf32>
    %cst_129 = arith.constant dense<0.000000e+00> : vector<6x16xf32>
    %368 = tpu.matmul %366, %367, %cst_129 {dimension_numbers = #tpu.dot_dimension_numbers<[1], [1], [0], [0], [0, 0, 1, 0], [], []>} : vector<6x8xf32>, vector<16x8xf32>, vector<6x16xf32> -> vector<6x16xf32>
    %cst_130 = arith.constant 0.353553385 : f32
    %369 = vector.broadcast %cst_130 : f32 to vector<6x16xf32>
    %370 = arith.mulf %368, %369 : vector<6x16xf32>
    %371 = arith.addf %370, %240 : vector<6x16xf32>
    %cst_131 = arith.constant dense<0xFF800000> : vector<6xf32>
    %372 = vector.multi_reduction <maximumf>, %371, %cst_131 [1] : vector<6x16xf32> to vector<6xf32>
    %373 = vector.shape_cast %372 : vector<6xf32> to vector<6x1xf32>
    %374 = vector.broadcast %373 : vector<6x1xf32> to vector<6x16xf32>
    %375 = arith.subf %371, %374 : vector<6x16xf32>
    %376 = math.exp %375 : vector<6x16xf32>
    %cst_132 = arith.constant dense<0.000000e+00> : vector<6xf32>
    %377 = vector.multi_reduction <add>, %376, %cst_132 [1] : vector<6x16xf32> to vector<6xf32>
    %378 = vector.shape_cast %377 : vector<6xf32> to vector<6x1xf32>
    %379 = vector.extract_strided_slice %238 {offsets = [0, 48], sizes = [16, 8], strides = [1, 1]} : vector<16x64xf32> to vector<16x8xf32>
    %cst_133 = arith.constant dense<0.000000e+00> : vector<6x8xf32>
    %380 = tpu.matmul %376, %379, %cst_133 {dimension_numbers = #tpu.dot_dimension_numbers<[1], [0], [0], [1], [0, 0, 1, 1], [], []>} : vector<6x16xf32>, vector<16x8xf32>, vector<6x8xf32> -> vector<6x8xf32>
    %381 = tpu.reciprocal %378 {approx = true} : vector<6x1xf32> -> vector<6x1xf32>
    %382 = vector.broadcast %381 : vector<6x1xf32> to vector<6x8xf32>
    %383 = arith.mulf %380, %382 : vector<6x8xf32>
    %384 = vector.extract_strided_slice %239 {offsets = [48, 0], sizes = [8, 64], strides = [1, 1]} : vector<64x64xf32> to vector<8x64xf32>
    %cst_134 = arith.constant dense<0.000000e+00> : vector<6x64xf32>
    %385 = tpu.matmul %383, %384, %cst_134 {dimension_numbers = #tpu.dot_dimension_numbers<[1], [0], [0], [1], [0, 0, 1, 1], [], []>} : vector<6x8xf32>, vector<8x64xf32>, vector<6x64xf32> -> vector<6x64xf32>
    %386 = arith.addf %365, %385 : vector<6x64xf32>
    %387 = vector.extract_strided_slice %231 {offsets = [0, 56], sizes = [6, 8], strides = [1, 1]} : vector<6x64xf32> to vector<6x8xf32>
    %388 = vector.extract_strided_slice %237 {offsets = [0, 56], sizes = [16, 8], strides = [1, 1]} : vector<16x64xf32> to vector<16x8xf32>
    %cst_135 = arith.constant dense<0.000000e+00> : vector<6x16xf32>
    %389 = tpu.matmul %387, %388, %cst_135 {dimension_numbers = #tpu.dot_dimension_numbers<[1], [1], [0], [0], [0, 0, 1, 0], [], []>} : vector<6x8xf32>, vector<16x8xf32>, vector<6x16xf32> -> vector<6x16xf32>
    %cst_136 = arith.constant 0.353553385 : f32
    %390 = vector.broadcast %cst_136 : f32 to vector<6x16xf32>
    %391 = arith.mulf %389, %390 : vector<6x16xf32>
    %392 = arith.addf %391, %240 : vector<6x16xf32>
    %cst_137 = arith.constant dense<0xFF800000> : vector<6xf32>
    %393 = vector.multi_reduction <maximumf>, %392, %cst_137 [1] : vector<6x16xf32> to vector<6xf32>
    %394 = vector.shape_cast %393 : vector<6xf32> to vector<6x1xf32>
    %395 = vector.broadcast %394 : vector<6x1xf32> to vector<6x16xf32>
    %396 = arith.subf %392, %395 : vector<6x16xf32>
    %397 = math.exp %396 : vector<6x16xf32>
    %cst_138 = arith.constant dense<0.000000e+00> : vector<6xf32>
    %398 = vector.multi_reduction <add>, %397, %cst_138 [1] : vector<6x16xf32> to vector<6xf32>
    %399 = vector.shape_cast %398 : vector<6xf32> to vector<6x1xf32>
    %400 = vector.extract_strided_slice %238 {offsets = [0, 56], sizes = [16, 8], strides = [1, 1]} : vector<16x64xf32> to vector<16x8xf32>
    %cst_139 = arith.constant dense<0.000000e+00> : vector<6x8xf32>
    %401 = tpu.matmul %397, %400, %cst_139 {dimension_numbers = #tpu.dot_dimension_numbers<[1], [0], [0], [1], [0, 0, 1, 1], [], []>} : vector<6x16xf32>, vector<16x8xf32>, vector<6x8xf32> -> vector<6x8xf32>
    %402 = tpu.reciprocal %399 {approx = true} : vector<6x1xf32> -> vector<6x1xf32>
    %403 = vector.broadcast %402 : vector<6x1xf32> to vector<6x8xf32>
    %404 = arith.mulf %401, %403 : vector<6x8xf32>
    %405 = vector.extract_strided_slice %239 {offsets = [56, 0], sizes = [8, 64], strides = [1, 1]} : vector<64x64xf32> to vector<8x64xf32>
    %cst_140 = arith.constant dense<0.000000e+00> : vector<6x64xf32>
    %406 = tpu.matmul %404, %405, %cst_140 {dimension_numbers = #tpu.dot_dimension_numbers<[1], [0], [0], [1], [0, 0, 1, 1], [], []>} : vector<6x8xf32>, vector<8x64xf32>, vector<6x64xf32> -> vector<6x64xf32>
    %407 = arith.addf %386, %406 : vector<6x64xf32>
    %c0_141 = arith.constant 0 : index
    %c0_142 = arith.constant 0 : index
    %408 = vector.load %arg18[%c0_141, %c0_142] : memref<1x64xf32, #tpu.memory_space<vmem>>, vector<1x64xf32>
    %409 = vector.broadcast %408 : vector<1x64xf32> to vector<6x64xf32>
    %410 = arith.addf %407, %409 : vector<6x64xf32>
    %411 = arith.addf %226, %410 : vector<6x64xf32>
    %c0_143 = arith.constant 0 : index
    %c0_144 = arith.constant 0 : index
    %412 = vector.load %arg19[%c0_143, %c0_144] : memref<1x64xf32, #tpu.memory_space<vmem>>, vector<1x64xf32>
    %c0_145 = arith.constant 0 : index
    %c0_146 = arith.constant 0 : index
    %413 = vector.load %arg20[%c0_145, %c0_146] : memref<1x64xf32, #tpu.memory_space<vmem>>, vector<1x64xf32>
    %cst_147 = arith.constant dense<0.000000e+00> : vector<6xf32>
    %414 = vector.multi_reduction <add>, %411, %cst_147 [1] : vector<6x64xf32> to vector<6xf32>
    %415 = vector.shape_cast %414 : vector<6xf32> to vector<6x1xf32>
    %cst_148 = arith.constant 6.400000e+01 : f32
    %416 = vector.broadcast %cst_148 : f32 to vector<6x1xf32>
    %417 = arith.divf %415, %416 : vector<6x1xf32>
    %418 = vector.broadcast %417 : vector<6x1xf32> to vector<6x64xf32>
    %419 = arith.subf %411, %418 : vector<6x64xf32>
    %420 = arith.mulf %419, %419 : vector<6x64xf32>
    %cst_149 = arith.constant dense<0.000000e+00> : vector<6xf32>
    %421 = vector.multi_reduction <add>, %420, %cst_149 [1] : vector<6x64xf32> to vector<6xf32>
    %422 = vector.shape_cast %421 : vector<6xf32> to vector<6x1xf32>
    %cst_150 = arith.constant 6.400000e+01 : f32
    %423 = vector.broadcast %cst_150 : f32 to vector<6x1xf32>
    %424 = arith.divf %422, %423 : vector<6x1xf32>
    %cst_151 = arith.constant 9.99999974E-6 : f32
    %425 = vector.broadcast %cst_151 : f32 to vector<6x1xf32>
    %426 = arith.addf %424, %425 : vector<6x1xf32>
    %427 = math.rsqrt %426 : vector<6x1xf32>
    %428 = vector.broadcast %427 : vector<6x1xf32> to vector<6x64xf32>
    %429 = arith.mulf %419, %428 : vector<6x64xf32>
    %430 = vector.broadcast %412 : vector<1x64xf32> to vector<6x64xf32>
    %431 = arith.mulf %429, %430 : vector<6x64xf32>
    %432 = vector.broadcast %413 : vector<1x64xf32> to vector<6x64xf32>
    %433 = arith.addf %431, %432 : vector<6x64xf32>
    %c0_152 = arith.constant 0 : index
    %c0_153 = arith.constant 0 : index
    %434 = vector.load %arg21[%c0_152, %c0_153] : memref<64x128xf32, #tpu.memory_space<vmem>>, vector<64x128xf32>
    %cst_154 = arith.constant dense<0.000000e+00> : vector<6x128xf32>
    %435 = tpu.matmul %433, %434, %cst_154 {dimension_numbers = #tpu.dot_dimension_numbers<[1], [0], [0], [1], [0, 0, 1, 1], [], []>} : vector<6x64xf32>, vector<64x128xf32>, vector<6x128xf32> -> vector<6x128xf32>
    %c0_155 = arith.constant 0 : index
    %c0_156 = arith.constant 0 : index
    %436 = vector.load %arg22[%c0_155, %c0_156] : memref<1x128xf32, #tpu.memory_space<vmem>>, vector<1x128xf32>
    %437 = vector.broadcast %436 : vector<1x128xf32> to vector<6x128xf32>
    %438 = arith.addf %435, %437 : vector<6x128xf32>
    %cst_157 = arith.constant 0.000000e+00 : f32
    %439 = vector.broadcast %cst_157 : f32 to vector<6x128xf32>
    %440 = arith.maximumf %438, %439 : vector<6x128xf32>
    %c0_158 = arith.constant 0 : index
    %c0_159 = arith.constant 0 : index
    %441 = vector.load %arg23[%c0_158, %c0_159] : memref<128x64xf32, #tpu.memory_space<vmem>>, vector<128x64xf32>
    %cst_160 = arith.constant dense<0.000000e+00> : vector<6x64xf32>
    %442 = tpu.matmul %440, %441, %cst_160 {dimension_numbers = #tpu.dot_dimension_numbers<[1], [0], [0], [1], [0, 0, 1, 1], [], []>} : vector<6x128xf32>, vector<128x64xf32>, vector<6x64xf32> -> vector<6x64xf32>
    %c0_161 = arith.constant 0 : index
    %c0_162 = arith.constant 0 : index
    %443 = vector.load %arg24[%c0_161, %c0_162] : memref<1x64xf32, #tpu.memory_space<vmem>>, vector<1x64xf32>
    %444 = vector.broadcast %443 : vector<1x64xf32> to vector<6x64xf32>
    %445 = arith.addf %442, %444 : vector<6x64xf32>
    %446 = arith.addf %433, %445 : vector<6x64xf32>
    %c0_163 = arith.constant 0 : index
    %c0_164 = arith.constant 0 : index
    %447 = vector.load %arg25[%c0_163, %c0_164] : memref<1x64xf32, #tpu.memory_space<vmem>>, vector<1x64xf32>
    %c0_165 = arith.constant 0 : index
    %c0_166 = arith.constant 0 : index
    %448 = vector.load %arg26[%c0_165, %c0_166] : memref<1x64xf32, #tpu.memory_space<vmem>>, vector<1x64xf32>
    %cst_167 = arith.constant dense<0.000000e+00> : vector<6xf32>
    %449 = vector.multi_reduction <add>, %446, %cst_167 [1] : vector<6x64xf32> to vector<6xf32>
    %450 = vector.shape_cast %449 : vector<6xf32> to vector<6x1xf32>
    %cst_168 = arith.constant 6.400000e+01 : f32
    %451 = vector.broadcast %cst_168 : f32 to vector<6x1xf32>
    %452 = arith.divf %450, %451 : vector<6x1xf32>
    %453 = vector.broadcast %452 : vector<6x1xf32> to vector<6x64xf32>
    %454 = arith.subf %446, %453 : vector<6x64xf32>
    %455 = arith.mulf %454, %454 : vector<6x64xf32>
    %cst_169 = arith.constant dense<0.000000e+00> : vector<6xf32>
    %456 = vector.multi_reduction <add>, %455, %cst_169 [1] : vector<6x64xf32> to vector<6xf32>
    %457 = vector.shape_cast %456 : vector<6xf32> to vector<6x1xf32>
    %cst_170 = arith.constant 6.400000e+01 : f32
    %458 = vector.broadcast %cst_170 : f32 to vector<6x1xf32>
    %459 = arith.divf %457, %458 : vector<6x1xf32>
    %cst_171 = arith.constant 9.99999974E-6 : f32
    %460 = vector.broadcast %cst_171 : f32 to vector<6x1xf32>
    %461 = arith.addf %459, %460 : vector<6x1xf32>
    %462 = math.rsqrt %461 : vector<6x1xf32>
    %463 = vector.broadcast %462 : vector<6x1xf32> to vector<6x64xf32>
    %464 = arith.mulf %454, %463 : vector<6x64xf32>
    %465 = vector.broadcast %447 : vector<1x64xf32> to vector<6x64xf32>
    %466 = arith.mulf %464, %465 : vector<6x64xf32>
    %467 = vector.broadcast %448 : vector<1x64xf32> to vector<6x64xf32>
    %468 = arith.addf %466, %467 : vector<6x64xf32>
    %c0_172 = arith.constant 0 : index
    %c0_173 = arith.constant 0 : index
    %469 = vector.load %arg27[%c0_172, %c0_173] : memref<1x64xf32, #tpu.memory_space<vmem>>, vector<1x64xf32>
    %c0_174 = arith.constant 0 : index
    %c0_175 = arith.constant 0 : index
    %470 = vector.load %arg28[%c0_174, %c0_175] : memref<1x64xf32, #tpu.memory_space<vmem>>, vector<1x64xf32>
    %cst_176 = arith.constant dense<0.000000e+00> : vector<6xf32>
    %471 = vector.multi_reduction <add>, %468, %cst_176 [1] : vector<6x64xf32> to vector<6xf32>
    %472 = vector.shape_cast %471 : vector<6xf32> to vector<6x1xf32>
    %cst_177 = arith.constant 6.400000e+01 : f32
    %473 = vector.broadcast %cst_177 : f32 to vector<6x1xf32>
    %474 = arith.divf %472, %473 : vector<6x1xf32>
    %475 = vector.broadcast %474 : vector<6x1xf32> to vector<6x64xf32>
    %476 = arith.subf %468, %475 : vector<6x64xf32>
    %477 = arith.mulf %476, %476 : vector<6x64xf32>
    %cst_178 = arith.constant dense<0.000000e+00> : vector<6xf32>
    %478 = vector.multi_reduction <add>, %477, %cst_178 [1] : vector<6x64xf32> to vector<6xf32>
    %479 = vector.shape_cast %478 : vector<6xf32> to vector<6x1xf32>
    %cst_179 = arith.constant 6.400000e+01 : f32
    %480 = vector.broadcast %cst_179 : f32 to vector<6x1xf32>
    %481 = arith.divf %479, %480 : vector<6x1xf32>
    %cst_180 = arith.constant 9.99999974E-6 : f32
    %482 = vector.broadcast %cst_180 : f32 to vector<6x1xf32>
    %483 = arith.addf %481, %482 : vector<6x1xf32>
    %484 = math.rsqrt %483 : vector<6x1xf32>
    %485 = vector.broadcast %484 : vector<6x1xf32> to vector<6x64xf32>
    %486 = arith.mulf %476, %485 : vector<6x64xf32>
    %487 = vector.broadcast %469 : vector<1x64xf32> to vector<6x64xf32>
    %488 = arith.mulf %486, %487 : vector<6x64xf32>
    %489 = vector.broadcast %470 : vector<1x64xf32> to vector<6x64xf32>
    %490 = arith.addf %488, %489 : vector<6x64xf32>
    %491 = vector.extract_strided_slice %490 {offsets = [0, 0], sizes = [2, 64], strides = [1, 1]} : vector<6x64xf32> to vector<2x64xf32>
    %c0_181 = arith.constant 0 : index
    %c0_182 = arith.constant 0 : index
    %492 = vector.load %arg29[%c0_181, %c0_182] : memref<1x64xf32, #tpu.memory_space<vmem>>, vector<1x64xf32>
    %493 = vector.broadcast %492 : vector<1x64xf32> to vector<2x64xf32>
    %494 = arith.mulf %491, %493 : vector<2x64xf32>
    %cst_183 = arith.constant dense<0.000000e+00> : vector<2xf32>
    %495 = vector.multi_reduction <add>, %494, %cst_183 [1] : vector<2x64xf32> to vector<2xf32>
    %496 = vector.shape_cast %495 : vector<2xf32> to vector<2x1xf32>
    %c0_184 = arith.constant 0 : index
    %c0_185 = arith.constant 0 : index
    %497 = vector.load %arg30[%c0_184, %c0_185] : memref<1x1xf32, #tpu.memory_space<vmem>>, vector<1x1xf32>
    %498 = vector.broadcast %497 : vector<1x1xf32> to vector<2x1xf32>
    %499 = arith.addf %496, %498 : vector<2x1xf32>
    %c0_186 = arith.constant 0 : index
    %c0_187 = arith.constant 0 : index
    %500 = vector.load %arg31[%c0_186, %c0_187] : memref<2x1xf32, #tpu.memory_space<vmem>>, vector<2x1xf32>
    tpu.vector_store %arg31[%c0_186, %c0_187], %499 {strides = array<i32>} : memref<2x1xf32, #tpu.memory_space<vmem>>, vector<2x1xf32>,
    return
  }
  func.func @transform_0(%arg0: i32) -> (i32, i32) {
    %c0_i32 = arith.constant 0 : i32
    %c0_i32_0 = arith.constant 0 : i32
    %c0_i32_1 = arith.constant 0 : i32
    return %c0_i32, %c0_i32_0 : i32, i32
  }
  func.func @transform_1(%arg0: i32) -> (i32, i32) {
    %c0_i32 = arith.constant 0 : i32
    %c0_i32_0 = arith.constant 0 : i32
    %c0_i32_1 = arith.constant 0 : i32
    return %c0_i32, %c0_i32_0 : i32, i32
  }
  func.func @transform_2(%arg0: i32) -> (i32, i32) {
    %c0_i32 = arith.constant 0 : i32
    %c0_i32_0 = arith.constant 0 : i32
    %c0_i32_1 = arith.constant 0 : i32
    return %c0_i32, %c0_i32_0 : i32, i32
  }
  func.func @transform_3(%arg0: i32) -> (i32, i32) {
    %c0_i32 = arith.constant 0 : i32
    %c0_i32_0 = arith.constant 0 : i32
    %c0_i32_1 = arith.constant 0 : i32
    return %c0_i32, %c0_i32_0 : i32, i32
  }
  func.func @transform_4(%arg0: i32) -> (i32, i32) {
    %c0_i32 = arith.constant 0 : i32
    %c0_i32_0 = arith.constant 0 : i32
    %c0_i32_1 = arith.constant 0 : i32
    return %c0_i32, %c0_i32_0 : i32, i32
  }
  func.func @transform_5(%arg0: i32) -> (i32, i32) {
    %c0_i32 = arith.constant 0 : i32
    %c0_i32_0 = arith.constant 0 : i32
    %c0_i32_1 = arith.constant 0 : i32
    return %c0_i32, %c0_i32_0 : i32, i32
  }
  func.func @transform_6(%arg0: i32) -> (i32, i32) {
    %c0_i32 = arith.constant 0 : i32
    %c0_i32_0 = arith.constant 0 : i32
    %c0_i32_1 = arith.constant 0 : i32
    return %c0_i32, %c0_i32_0 : i32, i32
  }
  func.func @transform_7(%arg0: i32) -> (i32, i32) {
    %c0_i32 = arith.constant 0 : i32
    %c0_i32_0 = arith.constant 0 : i32
    %c0_i32_1 = arith.constant 0 : i32
    return %c0_i32, %c0_i32_0 : i32, i32
  }
  func.func @transform_8(%arg0: i32) -> (i32, i32) {
    %c0_i32 = arith.constant 0 : i32
    %c0_i32_0 = arith.constant 0 : i32
    %c0_i32_1 = arith.constant 0 : i32
    return %c0_i32, %c0_i32_0 : i32, i32
  }
  func.func @transform_9(%arg0: i32) -> (i32, i32) {
    %c0_i32 = arith.constant 0 : i32
    %c0_i32_0 = arith.constant 0 : i32
    %c0_i32_1 = arith.constant 0 : i32
    return %c0_i32, %c0_i32_0 : i32, i32
  }
  func.func @transform_10(%arg0: i32) -> (i32, i32) {
    %c0_i32 = arith.constant 0 : i32
    %c0_i32_0 = arith.constant 0 : i32
    %c0_i32_1 = arith.constant 0 : i32
    return %c0_i32, %c0_i32_0 : i32, i32
  }
  func.func @transform_11(%arg0: i32) -> (i32, i32) {
    %c0_i32 = arith.constant 0 : i32
    %c0_i32_0 = arith.constant 0 : i32
    %c0_i32_1 = arith.constant 0 : i32
    return %c0_i32, %c0_i32_0 : i32, i32
  }
  func.func @transform_12(%arg0: i32) -> (i32, i32) {
    %c0_i32 = arith.constant 0 : i32
    %c0_i32_0 = arith.constant 0 : i32
    %c0_i32_1 = arith.constant 0 : i32
    return %c0_i32, %c0_i32_0 : i32, i32
  }
  func.func @transform_13(%arg0: i32) -> (i32, i32) {
    %c0_i32 = arith.constant 0 : i32
    %c0_i32_0 = arith.constant 0 : i32
    %c0_i32_1 = arith.constant 0 : i32
    return %c0_i32, %c0_i32_0 : i32, i32
  }
  func.func @transform_14(%arg0: i32) -> (i32, i32) {
    %c0_i32 = arith.constant 0 : i32
    %c0_i32_0 = arith.constant 0 : i32
    %c0_i32_1 = arith.constant 0 : i32
    return %c0_i32, %c0_i32_0 : i32, i32
  }
  func.func @transform_15(%arg0: i32) -> (i32, i32) {
    %c0_i32 = arith.constant 0 : i32
    %c0_i32_0 = arith.constant 0 : i32
    %c0_i32_1 = arith.constant 0 : i32
    return %c0_i32, %c0_i32_0 : i32, i32
  }
  func.func @transform_16(%arg0: i32) -> (i32, i32) {
    %c0_i32 = arith.constant 0 : i32
    %c0_i32_0 = arith.constant 0 : i32
    %c0_i32_1 = arith.constant 0 : i32
    return %c0_i32, %c0_i32_0 : i32, i32
  }
  func.func @transform_17(%arg0: i32) -> (i32, i32) {
    %c0_i32 = arith.constant 0 : i32
    %c0_i32_0 = arith.constant 0 : i32
    %c0_i32_1 = arith.constant 0 : i32
    return %c0_i32, %c0_i32_0 : i32, i32
  }
  func.func @transform_18(%arg0: i32) -> (i32, i32) {
    %c0_i32 = arith.constant 0 : i32
    %c0_i32_0 = arith.constant 0 : i32
    %c0_i32_1 = arith.constant 0 : i32
    return %c0_i32, %c0_i32_0 : i32, i32
  }
  func.func @transform_19(%arg0: i32) -> (i32, i32) {
    %c0_i32 = arith.constant 0 : i32
    %c0_i32_0 = arith.constant 0 : i32
    %c0_i32_1 = arith.constant 0 : i32
    return %c0_i32, %c0_i32_0 : i32, i32
  }
  func.func @transform_20(%arg0: i32) -> (i32, i32) {
    %c0_i32 = arith.constant 0 : i32
    %c0_i32_0 = arith.constant 0 : i32
    %c0_i32_1 = arith.constant 0 : i32
    return %c0_i32, %c0_i32_0 : i32, i32
  }
  func.func @transform_21(%arg0: i32) -> (i32, i32) {
    %c0_i32 = arith.constant 0 : i32
    %c0_i32_0 = arith.constant 0 : i32
    %c0_i32_1 = arith.constant 0 : i32
    return %c0_i32, %c0_i32_0 : i32, i32
  }
  func.func @transform_22(%arg0: i32) -> (i32, i32) {
    %c0_i32 = arith.constant 0 : i32
    %c0_i32_0 = arith.constant 0 : i32
    %c0_i32_1 = arith.constant 0 : i32
    return %c0_i32, %c0_i32_0 : i32, i32
  }
  func.func @transform_23(%arg0: i32) -> (i32, i32) {
    %c0_i32 = arith.constant 0 : i32
    %c0_i32_0 = arith.constant 0 : i32
    %c0_i32_1 = arith.constant 0 : i32
    return %c0_i32, %c0_i32_0 : i32, i32
  }
  func.func @transform_24(%arg0: i32) -> (i32, i32) {
    %c0_i32 = arith.constant 0 : i32
    %c0_i32_0 = arith.constant 0 : i32
    %c0_i32_1 = arith.constant 0 : i32
    return %c0_i32, %c0_i32_0 : i32, i32
  }
  func.func @transform_25(%arg0: i32) -> (i32, i32) {
    %c0_i32 = arith.constant 0 : i32
    %c0_i32_0 = arith.constant 0 : i32
    %c0_i32_1 = arith.constant 0 : i32
    return %c0_i32, %c0_i32_0 : i32, i32
  }
  func.func @transform_26(%arg0: i32) -> (i32, i32) {
    %c0_i32 = arith.constant 0 : i32
    %c0_i32_0 = arith.constant 0 : i32
    %c0_i32_1 = arith.constant 0 : i32
    return %c0_i32, %c0_i32_0 : i32, i32
  }
  func.func @transform_27(%arg0: i32) -> (i32, i32) {
    %c0_i32 = arith.constant 0 : i32
    %c0_i32_0 = arith.constant 0 : i32
    %c0_i32_1 = arith.constant 0 : i32
    return %c0_i32, %c0_i32_0 : i32, i32
  }
  func.func @transform_28(%arg0: i32) -> (i32, i32) {
    %c0_i32 = arith.constant 0 : i32
    %c0_i32_0 = arith.constant 0 : i32
    %c0_i32_1 = arith.constant 0 : i32
    return %c0_i32, %c0_i32_0 : i32, i32
  }
  func.func @transform_29(%arg0: i32) -> (i32, i32) {
    %c0_i32 = arith.constant 0 : i32
    %c0_i32_0 = arith.constant 0 : i32
    %c0_i32_1 = arith.constant 0 : i32
    return %c0_i32, %c0_i32_0 : i32, i32
  }
  func.func @transform_30(%arg0: i32) -> (i32, i32) {
    %c0_i32 = arith.constant 0 : i32
    %c0_i32_0 = arith.constant 0 : i32
    %c0_i32_1 = arith.constant 0 : i32
    return %c0_i32, %c0_i32_0 : i32, i32
  }
}

</mosaic_0001>

<bundles_post_ra>
// kernel: transam_forward.5
= control target key start
LH: loop header
LB: loop body
LE: loop exit
PB: predicated region body
PF: predicated region fallthrough
CT: control target
= control target key end

     0   :  { %vm48_vm0 = vcmask 1043456   ;;  %vm41_vm1 = vcmask 31744   ;;  %v396_v15 = vmov 0.0   ;;  %vm397_vm2 = vmmov 0   ;;  %s518_s2 = inlined_call_operand.vmem [shape: f32[4,64], index: 2, kind: input, shape index: {}]   ;;  %s519_s0 = inlined_call_operand.vmem [shape: f32[16,4], index: 0, kind: input, shape index: {}]   ;;  %s520_s4 = inlined_call_operand.vmem [shape: f32[64,64], index: 4, kind: input, shape index: {}]   ;;  %s521_s1 = inlined_call_operand.vmem [shape: f32[6,4], index: 1, kind: input, shape index: {}]   ;;  %s522_s3 = inlined_call_operand.vmem [shape: f32[1,64], index: 3, kind: input, shape index: {}]   ;;  %s523_s7 = inlined_call_operand.vmem [shape: f32[6,64], index: 7, kind: input, shape index: {}]   ;;  %s524_s9 = inlined_call_operand.vmem [shape: f32[6,64], index: 9, kind: output, shape index: {1}]   ;;  %s525_s5 = inlined_call_operand.vmem [shape: f32[1,64], index: 5, kind: input, shape index: {}]   ;;  %s526_s6 = inlined_call_operand.vmem [shape: f32[16,64], index: 6, kind: input, shape index: {}]   ;;  %s527_s8 = inlined_call_operand.vmem [shape: f32[16,64], index: 8, kind: output, shape index: {0}]  }
   0x1   :  { %v31_v0 = vld [vmem:[%s518_s2] sm:$0xf]  ;;  %v34_v2 = vld [vmem:[%s519_s0 + $0x8] sm:$0xff]  ;;  %v210_v5 = vld [vmem:[%s520_s4 + $0x10] sm:$0xff]  ;;  %vm223_vm3 = vcmask 523264   ;;  %vm206_vm4 = vcmask 521216  }
   0x2   :  { %v33_v1 = vld [vmem:[%s519_s0] sm:$0xff]  ;;  %345 = vmatprep.subr.msk.mxu1 %vm48_vm0, %v31_v0  ;;  %v209_v4 = vld [vmem:[%s520_s4 + $0x8] sm:$0xff]  ;;  %v211_v7 = vld [vmem:[%s520_s4 + $0x18] sm:$0xff] }
   0x3   :  { %347 = vmatprep.mubr.msk.f32.mxu1 %vm41_vm1, %v33_v1  ;;  %v208_v3 = vld [vmem:[%s520_s4] sm:$0xff]  ;;  %346 = vmatpush3.msk.msra.mxu1 %vm48_vm0, %v31_v0  ;;  %v378_v8 = vpack.c.bf16 %v211_v7, %v210_v5  ;;  %v213_v10 = vld [vmem:[%s520_s4 + $0x28] sm:$0xff]  ;;  %v214_v12 = vld [vmem:[%s520_s4 + $0x30] sm:$0xff] }
   0x4   :  { %v374_v6 = vpack.c.bf16 %v209_v4, %v208_v3  ;;  %348 = vmatmul.mubr.msk.f32.vlgmr.msra.gmra.mrb[0].mxu1 %vm41_vm1, %v34_v2  ;;  %v212_v9 = vld [vmem:[%s520_s4 + $0x20] sm:$0xff]  ;;  %v215_v13 = vld [vmem:[%s520_s4 + $0x38] sm:$0xff]  ;;  %350 = vmatprep.subr.mxu1 %v396_v15  ;;  %v308_v35 = vld [vmem:[%s526_s6 + $0x8] sm:$0xff] }
   0x5   :  { %v382_v11 = vpack.c.bf16 %v213_v10, %v212_v9  ;;  %v386_v14 = vpack.c.bf16 %v215_v13, %v214_v12  ;;  %352 = vmatprep.mubr.msk.f32.mxu1 %vm397_vm2, %v396_v15  ;;  %v129_v16 = vld [vmem:[%s521_s1] sm:$0x3f]  ;;  %351 = vmatpush3.msk.msra.mxu1 %vm48_vm0, %v31_v0 }
   0x6   :  { %375 = vmatprep.subr.bf16.mxu0 %v374_v6  ;;  %v321_v17 = vld [vmem:[%s522_s3] ss:$0 sm:$0xff] }
   0x7   :  { %377 = vmatpush3.bf16.msra.mxu0 %v374_v6  ;;  %v204_v28 = vld [vmem:[%s523_s7] sm:$0x3f] }
   0x8   :  { %379 = vmatprep.subr.bf16.mxu0 %v378_v8  ;;  %353 = vmatmul.mubr.msk.f32.vlgmr.msra.gmra.mrb[2].mxu1 %vm41_vm1, %v129_v16  ;;  %v327_v30 = vld [vmem:[%s525_s5] ss:$0 sm:$0xff] }
   0x9   :  { %v307_v36 = vld [vmem:[%s526_s6] sm:$0xff] }
   0xb   :  { %381 = vmatpush3.bf16.msra.mxu0 %v378_v8 }
   0xc   :  { %383 = vmatprep.subr.bf16.mxu0 %v382_v11 }
   0xf   :  { %385 = vmatpush3.bf16.msra.mxu0 %v382_v11 }
  0x10   :  { %387 = vmatprep.subr.bf16.mxu0 %v386_v14 }
  0x13   :  { %389 = vmatpush3.bf16.msra.mxu0 %v386_v14 }
  0xd7   :  { %v349_v18 = vpop.f32.mrb[0].mxu1 }
  0xd8   :  { %v124_v19 = vadd.f32 %v349_v18, %v321_v17  ;;  %v118_v20 = vpop.f32.mrb[1].mxu1 }
  0xd9   :  { %v119_v21 = vadd.f32 %v321_v17, %v118_v20 }
  0xda   :  { %v128_v23 = vmul.f32 8.0, %v124_v19 }
  0xdb   :  { %v127_v22 = vmul.f32 8.0, %v119_v21  ;;  %v199_v24 = vpop.f32.mrb[2].mxu1 }
  0xdc   :  { %v354_v25 = vpop.f32.mrb[3].mxu1  ;;  %v200_v26 = vadd.f32 %v321_v17, %v199_v24 }
  0xdd   :  { %371 = vmatprep.mubr.msk.f32.mxu0 %vm223_vm3, %v127_v22 }
  0xde   :  { %372 = vmatmul.mubr.msk.f32.vlgmr.msra.gmra.mrb[0].mxu0 %vm223_vm3, %v128_v23  ;;  %v203_v27 = vmul.f32 8.0, %v200_v26 }
  0xe0   :  { %v205_v29 = vadd.f32 %v204_v28, %v203_v27 }
  0xe2   :  { %207 = vst.msk [vmem:[%s524_s9] sm:$0x3f] %vm206_vm4, %v205_v29 }
 0x1b1   :  { %v373_v31 = vpop.f32.mrb[0].mxu0 }
 0x1b2   :  { %v302_v32 = vadd.f32 %v373_v31, %v327_v30  ;;  %v296_v33 = vpop.f32.mrb[1].mxu0 }
 0x1b3   :  { %v297_v34 = vadd.f32 %v327_v30, %v296_v33 }
 0x1b4   :  { %392 = vtanh.f32 %v302_v32 }
 0x1b5   :  { %394 = vtanh.f32 %v297_v34 }
 0x1be   :  { %v393_v37 = vpop.eup %392 }
 0x1bf   :  { %v395_v38 = vpop.eup %394  ;;  %v310_v39 = vadd.f32 %v393_v37, %v308_v35 }
 0x1c0   :  { %v309_v40 = vadd.f32 %v395_v38, %v307_v36 }
 0x1c1   :  { %312 = vst.msk [vmem:[%s527_s8 + $0x8] sm:$0xff] %vm223_vm3, %v310_v39 }
 0x1c2   :  { %311 = vst.msk [vmem:[%s527_s8] sm:$0xff] %vm223_vm3, %v309_v40 }

// kernel: transam_forward.6
= control target key start
LH: loop header
LB: loop body
LE: loop exit
PB: predicated region body
PF: predicated region fallthrough
CT: control target
= control target key end

     0   :  { %v3483_v3 = vmov 0.0   ;;  %vm77_vm0 = vcmask 523264   ;;  %v67_v27 = vlaneseq  ;;  %vm177_vm1 = vcmask 64512   ;;  %s3484_s18 = smov 120   ;;  %s3486_s19 = smov 56   ;;  %s3990_s2 = inlined_call_operand.vmem [shape: f32[64,192], index: 2, kind: input, shape index: {}]   ;;  %s3991_s0 = inlined_call_operand.vmem [shape: f32[16,64], index: 0, kind: input, shape index: {}]   ;;  %s3992_s3 = inlined_call_operand.vmem [shape: f32[1,192], index: 3, kind: input, shape index: {}]   ;;  %s3993_s1 = inlined_call_operand.vmem [shape: f32[16,16], index: 1, kind: input, shape index: {}]   ;;  %s3994_s4 = inlined_call_operand.vmem [shape: f32[64,64], index: 4, kind: input, shape index: {}]   ;;  %s3995_s5 = inlined_call_operand.vmem [shape: f32[1,64], index: 5, kind: input, shape index: {}]   ;;  %s3996_s8 = inlined_call_operand.vmem [shape: f32[64,128], index: 8, kind: input, shape index: {}]   ;;  %s3997_s10 = inlined_call_operand.vmem [shape: f32[128,64], index: 10, kind: input, shape index: {}]   ;;  %s3998_s6 = inlined_call_operand.vmem [shape: f32[1,64], index: 6, kind: input, shape index: {}]   ;;  %s3999_s7 = inlined_call_operand.vmem [shape: f32[1,64], index: 7, kind: input, shape index: {}]   ;;  %s4000_s9 = inlined_call_operand.vmem [shape: f32[1,128], index: 9, kind: input, shape index: {}]   ;;  %s4001_s11 = inlined_call_operand.vmem [shape: f32[1,64], index: 11, kind: input, shape index: {}]   ;;  %s4002_s12 = inlined_call_operand.vmem [shape: f32[1,64], index: 12, kind: input, shape index: {}]   ;;  %s4003_s13 = inlined_call_operand.vmem [shape: f32[1,64], index: 13, kind: input, shape index: {}]   ;;  %s4004_s14 = inlined_call_operand.vmem [shape: f32[16,64], index: 14, kind: output, shape index: {}]  }
   0x1   :  { %v50_v0 = vld [vmem:[%s3990_s2 + $0x8] sm:$0xff]  ;;  %v52_v1 = vld [vmem:[%s3990_s2 + $0x18] sm:$0xff]  ;;  %v49_v2 = vld [vmem:[%s3990_s2] sm:$0xff]  ;;  %148 = vmatprep.mubr.f32.mxu0 %v3483_v3  ;;  %vm265_vm3 = vcmask 130048   ;;  %s3488_s24 = smov 104   ;;  %s3489_s25 = smov 48  }
   0x2   :  { %v3160_v4 = vpack.c.bf16 %v52_v1, %v50_v0  ;;  %v51_v5 = vld [vmem:[%s3990_s2 + $0x10] sm:$0xff]  ;;  %v54_v6 = vld [vmem:[%s3990_s2 + $0x28] sm:$0xff]  ;;  %v56_v7 = vld [vmem:[%s3990_s2 + $0x38] sm:$0xff]  ;;  %v68_v28 = vshrl.u32 %v67_v27, 7  ;;  %s3490_s26 = smov 40   ;;  %s3491_s15 = smov 32  }
   0x3   :  { %v3162_v8 = vpack.c.bf16 %v51_v5, %v49_v2  ;;  %v3164_v9 = vpack.c.bf16 %v56_v7, %v54_v6  ;;  %v53_v10 = vld [vmem:[%s3990_s2 + $0x20] sm:$0xff]  ;;  %v55_v11 = vld [vmem:[%s3990_s2 + $0x30] sm:$0xff]  ;;  %v58_v12 = vld [vmem:[%s3990_s2 + $0x48] sm:$0xff]  ;;  %s3492_s16 = smov 96   ;;  %s3496_s20 = smov 80  }
   0x4   :  { %3161 = vmatprep.subr.bf16.mxu0 %v3160_v4  ;;  %v60_v13 = vld [vmem:[%s3990_s2 + $0x58] sm:$0xff]  ;;  %v3166_v14 = vpack.c.bf16 %v55_v11, %v53_v10  ;;  %v57_v16 = vld [vmem:[%s3990_s2 + $0x40] sm:$0xff]  ;;  %v59_v17 = vld [vmem:[%s3990_s2 + $0x50] sm:$0xff]  ;;  %v69_v29 = vsub.s32 0, %v68_v28  ;;  %v73_v32 = vsub.s32 1, %v68_v28  ;;  %s3497_s23 = smov 8  }
   0x5   :  { %3163 = vmatpush1.bf16.msra.mxu0 %v3162_v8  ;;  %v3168_v15 = vpack.c.bf16 %v60_v13, %v58_v12  ;;  %v62_v18 = vld [vmem:[%s3990_s2 + $0x68] sm:$0xff]  ;;  %v64_v19 = vld [vmem:[%s3990_s2 + $0x78] sm:$0xff]  ;;  %v3170_v20 = vpack.c.bf16 %v59_v17, %v57_v16  ;;  %v61_v22 = vld [vmem:[%s3990_s2 + $0x60] sm:$0xff] }
   0x6   :  { %3165 = vmatprep.subr.bf16.mxu0 %v3164_v9  ;;  %v3172_v21 = vpack.c.bf16 %v64_v19, %v62_v18  ;;  %v63_v23 = vld [vmem:[%s3990_s2 + $0x70] sm:$0xff]  ;;  %v47_v25 = vld [vmem:[%s3991_s0] sm:$0xff]  ;;  %v48_v26 = vld [vmem:[%s3991_s0 + $0x8] sm:$0xff] }
   0x7   :  { %v3174_v24 = vpack.c.bf16 %v63_v23, %v61_v22  ;;  %v65_v30 = vld [vmem:[%s3992_s3] sm:$0x3]  ;;  %s3485_s3 = smov 64   ;;  %vm3654_vm2 = vmpackc.low %vm177_vm1, %vm177_vm1  ;;  %v3672_v57 = vld [vmem:[%s3993_s1 + $0x8] sm:$0xff] }
   0x8   :  { %v70_v31 = vrot.slane %v65_v30, %v69_v29  ;;  %v74_v36 = vrot.slane %v65_v30, %v73_v32  ;;  %v3677_v60 = vld [vmem:[%s3993_s1] sm:$0xff]  ;;  %s3487_s1 = smov 112  }
   0x9   :  { %3167 = vmatpush1.bf16.msra.mxu0 %v3166_v14 }
   0xa   :  { %3169 = vmatprep.subr.bf16.mxu0 %v3168_v15 }
   0xd   :  { %3171 = vmatpush1.bf16.msra.mxu0 %v3170_v20 }
   0xe   :  { %3173 = vmatprep.subr.bf16.mxu0 %v3172_v21 }
  0x11   :  { %3175 = vmatpush1.bf16.msra.mxu0 %v3174_v24 }
  0x14   :  { %2763 = vmatmul.mubr.msk.f32.vlgmr.msra.gmra.mrb[0].mxu0 %vm77_vm0, %v47_v25 }
  0x15   :  { %154 = vmatprep.mubr.f32.mxu0 %v3483_v3 }
  0x18   :  { %2764 = vmatmul.mubr.msk.f32.gmra.mrb[2].mxu0 %vm77_vm0, %v48_v26 }
  0xe7   :  { %v150_v33 = vpop.f32.mrb[0].mxu0 }
  0xe8   :  { %v3633_v34 = vadd.f32 %v150_v33, %v70_v31  ;;  %v152_v35 = vpop.f32.mrb[1].mxu0 }
  0xe9   :  { %v153_v40 = vadd.f32 %v152_v35, %v74_v36 }
  0xea   :  { %369 = vrot.lane.b32.xlu1 %v3633_v34, %s3484_s18  ;;  %2958 = vmatprep.mubr.msk.f32.mxu0 %vm177_vm1, %v3633_v34 }
  0xeb   :  { %v156_v37 = vpop.f32.mrb[2].mxu0 }
  0xec   :  { %v3639_v38 = vadd.f32 %v156_v37, %v70_v31  ;;  %v158_v39 = vpop.f32.mrb[3].mxu0 }
  0xed   :  { %v159_v41 = vadd.f32 %v158_v39, %v74_v36 }
  0xee   :  { %371 = vrot.lane.b32.xlu1 %v3639_v38, %s3484_s18  ;;  %v3645_v42 = vpack.i.bf16 %v3639_v38, %v3633_v34 }
  0xef   :  { %v3182_v43 = vpack.c.bf16 %v159_v41, %v153_v40  ;;  %v3647_v44 = vpack.i.bf16 %v159_v41, %v153_v40 }
  0xf0   :  { %3335 = vrot.lane.b32.xlu0 %v3645_v42, %s3485_s3  ;;  %s3494_s3 = smov 88  }
  0xf4   :  { %3340 = vrot.lane.b32.xlu0 %v3645_v42, %s3486_s19  ;;  %s3495_s19 = smov 16  }
 0x15c   :  { %v370_v45 = vpop.permute.xlu1 %369 }
 0x15d   :  { %2972 = vmatprep.mubr.msk.f32.mxu1 %vm177_vm1, %v370_v45 }
 0x160   :  { %v372_v55 = vpop.permute.xlu1 %371 }
 0x162   :  { %v3336_v46 = vpop.permute.xlu0 %3335 }
 0x163   :  { %v3338_v47 = vunpack.i.h.bf16 %v3336_v46  ;;  %v3337_v48 = vunpack.i.l.bf16 %v3336_v46 }
 0x165   :  { %v3176_v50 = vpack.c.bf16 %v3338_v47, %v3337_v48 }
 0x166   :  { %v3341_v51 = vpop.permute.xlu0 %3340 }
 0x167   :  { %v3343_v52 = vunpack.i.h.bf16 %v3341_v51  ;;  %v3342_v53 = vunpack.i.l.bf16 %v3341_v51  ;;  %3178 = vmatprep.subr.msk.bf16.mxu0 %vm3654_vm2, %v3176_v50  ;;  %v162_v51 = vld [vmem:[%s3994_s4 + $0x8] sm:$0xff] }
 0x168   :  { %3181 = vmatpush3.bf16.xpose.msk.msra.mxu0 %vm3654_vm2, %v3176_v50 }
 0x169   :  { %3183 = vmatprep.subr.bf16.mxu0 %v3182_v43  ;;  %v3186_v54 = vpack.c.bf16 %v3343_v52, %v3342_v53  ;;  %v161_v52 = vld [vmem:[%s3994_s4] sm:$0xff] }
 0x16b   :  { %3188 = vmatprep.subr.msk.bf16.mxu1 %vm3654_vm2, %v3186_v54 }
 0x16c   :  { %3191 = vmatpush3.bf16.xpose.msk.msra.mxu1 %vm3654_vm2, %v3186_v54 }
 0x16d   :  { %2982 = vmatprep.subr.mxu1 %v162_v51 }
 0x16f   :  { %2959 = vmatmul.mubr.msk.f32.vlgmr.msra.gmra.mrb[4].mxu0 %vm177_vm1, %v3639_v38 }
 0x170   :  { %3185 = vmatpush3.bf16.msra.mxu0 %v3182_v43 }
 0x173   :  { %2973 = vmatmul.mubr.msk.f32.vlgmr.msra.gmra.mrb[0].mxu1 %vm177_vm1, %v372_v55 }
 0x174   :  { %2983 = vmatpush3.msra.mxu1 %v162_v51 }
 0x175   :  { %2987 = vmatprep.subr.mxu1 %v161_v52 }
 0x242   :  { %v2960_v56 = vpop.f32.mrb[4].mxu0 }
 0x243   :  { %v262_v58 = vmul.f32 0.35355338, %v2960_v56  ;;  %v252_v59 = vpop.f32.mrb[5].mxu0 }
 0x244   :  { %v261_v61 = vmul.f32 0.35355338, %v252_v59 }
 0x245   :  { %v264_v62 = vadd.f32 %v262_v58, %v3672_v57 }
 0x246   :  { %v2974_v63 = vpop.f32.mrb[0].mxu1  ;;  %v263_v0 = vadd.f32 %v261_v61, %v3677_v60 }
 0x247   :  { %v461_v1 = vmul.f32 0.35355338, %v2974_v63  ;;  %v451_v2 = vpop.f32.mrb[1].mxu1  ;;  %v269_v3 = vsel %vm265_vm3, %v264_v62, -inf }
 0x248   :  { %v460_v4 = vmul.f32 0.35355338, %v451_v2  ;;  %270 = vmax.xlane.f32.xlu1 %v269_v3  ;;  %v266_v5 = vsel %vm265_vm3, %v263_v0, -inf }
 0x249   :  { %267 = vmax.xlane.f32.xlu0 %v266_v5  ;;  %v463_v6 = vadd.f32 %v461_v1, %v3672_v57 }
 0x24a   :  { %v462_v8 = vadd.f32 %v460_v4, %v3677_v60 }
 0x24b   :  { %v467_v7 = vsel %vm265_vm3, %v463_v6, -inf }
 0x24c   :  { %v464_v9 = vsel %vm265_vm3, %v462_v8, -inf }
 0x24d   :  { %468 = vmax.xlane.f32.xlu0 %v467_v7 }
 0x251   :  { %465 = vmax.xlane.f32.xlu0 %v464_v9 }
 0x259   :  { %3345 = vrot.lane.b32.xlu1 %v3647_v44, %s3484_s18  ;;  %s3493_s18 = smov 24  }
 0x25d   :  { %737 = vrot.lane.b32.xlu1 %v3633_v34, %s3487_s1 }
 0x261   :  { %739 = vrot.lane.b32.xlu1 %v3639_v38, %s3487_s1 }
 0x265   :  { %1024 = vrot.lane.b32.xlu1 %v3633_v34, %s3488_s24 }
 0x267   :  { %3350 = vrot.lane.b32.xlu0 %v3645_v42, %s3489_s25 }
 0x26b   :  { %3355 = vrot.lane.b32.xlu0 %v3645_v42, %s3490_s26 }
 0x26f   :  { %1026 = vrot.lane.b32.xlu0 %v3639_v38, %s3488_s24 }
 0x2d5   :  { %v271_v10 = vpop.xlane.xlu1 %270 }
 0x2d6   :  { %v273_v11 = vsub.f32 %v264_v62, %v271_v10  ;;  %v268_v12 = vpop.xlane.xlu0 %267 }
 0x2d7   :  { %v272_v13 = vsub.f32 %v263_v0, %v268_v12 }
 0x2d8   :  { %v276_v14 = vmul.f32 1.442695, %v273_v11 }
 0x2d9   :  { %v274_v15 = vmul.f32 1.442695, %v272_v13  ;;  %v3346_v16 = vpop.permute.xlu1 %3345 }
 0x2da   :  { %v3348_v17 = vunpack.i.h.bf16 %v3346_v16  ;;  %v3347_v18 = vunpack.i.l.bf16 %v3346_v16  ;;  %v469_v19 = vpop.xlane.xlu0 %468 }
 0x2db   :  { %3409 = vpow2.f32 %v274_v15  ;;  %v471_v20 = vsub.f32 %v463_v6, %v469_v19 }
 0x2dc   :  { %3411 = vpow2.f32 %v276_v14  ;;  %v3192_v21 = vpack.c.bf16 %v3348_v17, %v3347_v18 }
 0x2dd   :  { %v474_v22 = vmul.f32 1.442695, %v471_v20  ;;  %v738_v36 = vpop.permute.xlu1 %737 }
 0x2de   :  { %3193 = vmatprep.subr.bf16.mxu0 %v3192_v21  ;;  %v466_v23 = vpop.xlane.xlu0 %465 }
 0x2df   :  { %3413 = vpow2.f32 %v474_v22  ;;  %v470_v24 = vsub.f32 %v462_v8, %v466_v23 }
 0x2e1   :  { %v472_v25 = vmul.f32 1.442695, %v470_v24  ;;  %v740_v46 = vpop.permute.xlu1 %739 }
 0x2e2   :  { %v3351_v26 = vpop.permute.xlu0 %3350 }
 0x2e3   :  { %3415 = vpow2.f32 %v472_v25  ;;  %v3353_v27 = vunpack.i.h.bf16 %v3351_v26  ;;  %v3352_v28 = vunpack.i.l.bf16 %v3351_v26 }
 0x2e5   :  { %v3410_v29 = vpop.eup %3409  ;;  %v3196_v30 = vpack.c.bf16 %v3353_v27, %v3352_v28  ;;  %v1025_v48 = vpop.permute.xlu1 %1024 }
 0x2e6   :  { %v3412_v31 = vpop.eup %3411  ;;  %2965 = vmatprep.mubr.msk.f32.mxu0 %vm265_vm3, %v3410_v29  ;;  %v3356_v33 = vpop.permute.xlu0 %3355  ;;  %v278_v41 = vsel %vm265_vm3, %v3410_v29, 0.0 }
 0x2e7   :  { %2966 = vmatmul.mubr.msk.f32.vlgmr.msra.gmra.mrb[6].mxu0 %vm265_vm3, %v3412_v31  ;;  %v3358_v37 = vunpack.i.h.bf16 %v3356_v33  ;;  %v3357_v39 = vunpack.i.l.bf16 %v3356_v33  ;;  %v281_v47 = vsel %vm265_vm3, %v3412_v31, 0.0 }
 0x2e8   :  { %3195 = vmatpush3.bf16.msra.mxu0 %v3192_v21 }
 0x2e9   :  { %v3414_v32 = vpop.eup %3413  ;;  %3198 = vmatprep.subr.msk.bf16.mxu0 %vm3654_vm2, %v3196_v30  ;;  %v3206_v45 = vpack.c.bf16 %v3358_v37, %v3357_v39 }
 0x2ea   :  { %v479_v35 = vsel %vm265_vm3, %v3414_v32, 0.0  ;;  %v1027_v50 = vpop.permute.xlu0 %1026 }
 0x2eb   :  { %480 = vadd.xlane.f32.xlu0 %v479_v35 }
 0x2ed   :  { %v3416_v40 = vpop.eup %3415 }
 0x2ee   :  { %2979 = vmatprep.mubr.msk.f32.mxu0 %vm265_vm3, %v3416_v40  ;;  %v476_v43 = vsel %vm265_vm3, %v3416_v40, 0.0 }
 0x2ef   :  { %279 = vadd.xlane.f32.xlu0 %v278_v41  ;;  %2980 = vmatmul.mubr.msk.f32.vlgmr.msra.gmra.mrb[8].mxu0 %vm265_vm3, %v3414_v32 }
 0x2f0   :  { %477 = vadd.xlane.f32.xlu1 %v476_v43  ;;  %2996 = vmatprep.mubr.msk.f32.mxu0 %vm177_vm1, %v738_v36 }
 0x2f1   :  { %3201 = vmatpush3.bf16.xpose.msk.msra.mxu0 %vm3654_vm2, %v3196_v30 }
 0x2f2   :  { %3208 = vmatprep.subr.msk.bf16.mxu0 %vm3654_vm2, %v3206_v45 }
 0x2f4   :  { %282 = vadd.xlane.f32.xlu1 %v281_v47  ;;  %v163_v47 = vld [vmem:[%s3994_s4 + $0x10] sm:$0xff] }
 0x2f8   :  { %2997 = vmatmul.mubr.msk.f32.vlgmr.msra.gmra.mrb[10].mxu0 %vm177_vm1, %v740_v46 }
 0x2f9   :  { %3211 = vmatpush3.bf16.xpose.msk.msra.mxu0 %vm3654_vm2, %v3206_v45  ;;  %3015 = vmatprep.mubr.msk.f32.mxu0 %vm177_vm1, %v1025_v48 }
 0x300   :  { %3016 = vmatmul.mubr.msk.f32.vlgmr.msra.gmra.mrb[12].mxu0 %vm177_vm1, %v1027_v50 }
 0x378   :  { %v481_v53 = vpop.xlane.xlu0 %480 }
 0x37c   :  { %v280_v55 = vpop.xlane.xlu0 %279 }
 0x37d   :  { %v478_v54 = vpop.xlane.xlu1 %477 }
 0x37e   :  { %3417 = vrcp.f32 %v478_v54 }
 0x37f   :  { %3419 = vrcp.f32 %v481_v53 }
 0x380   :  { %3421 = vrcp.f32 %v280_v55 }
 0x381   :  { %v283_v59 = vpop.xlane.xlu1 %282 }
 0x382   :  { %3423 = vrcp.f32 %v283_v59 }
 0x388   :  { %v3418_v62 = vpop.eup %3417 }
 0x389   :  { %v3420_v0 = vpop.eup %3419 }
 0x38a   :  { %v3422_v2 = vpop.eup %3421 }
 0x38c   :  { %v3424_v6 = vpop.eup %3423 }
 0x3ba   :  { %v2967_v56 = vpop.f32.mrb[6].mxu0 }
 0x3bb   :  { %v356_v58 = vpop.f32.mrb[7].mxu0  ;;  %v368_v9 = vmul.f32 %v3424_v6, %v2967_v56 }
 0x3bc   :  { %v367_v4 = vmul.f32 %v3422_v2, %v356_v58 }
 0x3c2   :  { %v2981_v61 = vpop.f32.mrb[8].mxu0 }
 0x3c3   :  { %v562_v63 = vpop.f32.mrb[9].mxu0  ;;  %v574_v3 = vmul.f32 %v3420_v0, %v2981_v61 }
 0x3c4   :  { %v573_v1 = vmul.f32 %v3418_v62, %v562_v63 }
 0x3c6   :  { %2984 = vmatprep.mubr.msk.f32.mxu1 %vm177_vm1, %v573_v1 }
 0x3c7   :  { %2985 = vmatmul.mubr.msk.f32.vlgmr.msra.gmra.mrb[2].mxu1 %vm177_vm1, %v574_v3 }
 0x3c8   :  { %2989 = vmatprep.mubr.msk.f32.mxu1 %vm177_vm1, %v367_v4  ;;  %2988 = vmatpush3.msra.mxu1 %v161_v52 }
 0x3cb   :  { %v2998_v5 = vpop.f32.mrb[10].mxu0 }
 0x3cc   :  { %v829_v7 = vmul.f32 0.35355338, %v2998_v5  ;;  %v819_v8 = vpop.f32.mrb[11].mxu0 }
 0x3cd   :  { %v828_v10 = vmul.f32 0.35355338, %v819_v8 }
 0x3ce   :  { %v831_v11 = vadd.f32 %v829_v7, %v3672_v57 }
 0x3cf   :  { %2990 = vmatmul.mubr.msk.f32.vlgmr.msra.gmra.mrb[2].mxu1 %vm177_vm1, %v368_v9  ;;  %v830_v12 = vadd.f32 %v828_v10, %v3677_v60 }
 0x3d0   :  { %v835_v13 = vsel %vm265_vm3, %v831_v11, -inf }
 0x3d1   :  { %836 = vmax.xlane.f32.xlu1 %v835_v13  ;;  %v832_v14 = vsel %vm265_vm3, %v830_v12, -inf }
 0x3d2   :  { %833 = vmax.xlane.f32.xlu0 %v832_v14 }
 0x3d3   :  { %v3017_v15 = vpop.f32.mrb[12].mxu0 }
 0x3d4   :  { %v1106_v16 = vpop.f32.mrb[13].mxu0  ;;  %v1116_v36 = vmul.f32 0.35355338, %v3017_v15 }
 0x3d5   :  { %v1115_v17 = vmul.f32 0.35355338, %v1106_v16 }
 0x3d6   :  { %v1118_v45 = vadd.f32 %v1116_v36, %v3672_v57 }
 0x3d7   :  { %v1117_v18 = vadd.f32 %v1115_v17, %v3677_v60 }
 0x3d8   :  { %v1122_v46 = vsel %vm265_vm3, %v1118_v45, -inf }
 0x3d9   :  { %v1119_v19 = vsel %vm265_vm3, %v1117_v18, -inf }
 0x3e2   :  { %3365 = vrot.lane.b32.xlu1 %v3645_v42, %s3491_s15 }
 0x3e6   :  { %1311 = vrot.lane.b32.xlu1 %v3633_v34, %s3492_s16 }
 0x3e8   :  { %3360 = vrot.lane.b32.xlu0 %v3647_v44, %s3487_s1  ;;  %s3498_s1 = smov 72  }
 0x3ec   :  { %1313 = vrot.lane.b32.xlu0 %v3639_v38, %s3492_s16 }
 0x40b   :  { %1120 = vmax.xlane.f32.xlu0 %v1119_v19 }
 0x45e   :  { %v837_v20 = vpop.xlane.xlu1 %836 }
 0x45f   :  { %v839_v21 = vsub.f32 %v831_v11, %v837_v20  ;;  %v834_v22 = vpop.xlane.xlu0 %833 }
 0x460   :  { %v838_v23 = vsub.f32 %v830_v12, %v834_v22 }
 0x461   :  { %v842_v24 = vmul.f32 1.442695, %v839_v21 }
 0x462   :  { %v840_v25 = vmul.f32 1.442695, %v838_v23  ;;  %v3366_v26 = vpop.permute.xlu1 %3365  ;;  %v164_v23 = vld [vmem:[%s3994_s4 + $0x18] sm:$0xff] }
 0x463   :  { %3425 = vpow2.f32 %v842_v24  ;;  %v3368_v27 = vunpack.i.h.bf16 %v3366_v26  ;;  %v3367_v28 = vunpack.i.l.bf16 %v3366_v26  ;;  %v3361_v29 = vpop.permute.xlu0 %3360 }
 0x464   :  { %3427 = vpow2.f32 %v840_v25  ;;  %v3363_v30 = vunpack.i.h.bf16 %v3361_v29  ;;  %v3362_v31 = vunpack.i.l.bf16 %v3361_v29 }
 0x465   :  { %v3216_v32 = vpack.c.bf16 %v3368_v27, %v3367_v28 }
 0x466   :  { %v3202_v33 = vpack.c.bf16 %v3363_v30, %v3362_v31  ;;  %v1312_v35 = vpop.permute.xlu1 %1311 }
 0x467   :  { %3218 = vmatprep.subr.msk.bf16.mxu0 %vm3654_vm2, %v3216_v32  ;;  %3034 = vmatprep.mubr.msk.f32.mxu0 %vm177_vm1, %v1312_v35  ;;  %v1314_v41 = vpop.permute.xlu0 %1313 }
 0x468   :  { %3203 = vmatprep.subr.bf16.mxu1 %v3202_v33  ;;  %3221 = vmatpush3.bf16.xpose.msk.msra.mxu0 %vm3654_vm2, %v3216_v32 }
 0x469   :  { %3205 = vmatpush3.bf16.msra.mxu1 %v3202_v33 }
 0x46a   :  { %3006 = vmatprep.subr.mxu1 %v163_v47 }
 0x46d   :  { %v3426_v37 = vpop.eup %3425 }
 0x46e   :  { %v3428_v39 = vpop.eup %3427  ;;  %v847_v40 = vsel %vm265_vm3, %v3426_v37, 0.0 }
 0x46f   :  { %848 = vadd.xlane.f32.xlu0 %v847_v40  ;;  %3003 = vmatprep.mubr.msk.f32.mxu1 %vm265_vm3, %v3428_v39  ;;  %v844_v43 = vsel %vm265_vm3, %v3428_v39, 0.0 }
 0x470   :  { %3035 = vmatmul.mubr.msk.f32.vlgmr.msra.gmra.mrb[14].mxu0 %vm177_vm1, %v1314_v41  ;;  %845 = vadd.xlane.f32.xlu1 %v844_v43 }
 0x471   :  { %3004 = vmatmul.mubr.msk.f32.vlgmr.msra.gmra.mrb[4].mxu1 %vm265_vm3, %v3426_v37 }
 0x472   :  { %3007 = vmatpush3.msra.mxu1 %v163_v47 }
 0x474   :  { %1123 = vmax.xlane.f32.xlu1 %v1122_v46 }
 0x485   :  { %3370 = vrot.lane.b32.xlu0 %v3647_v44, %s3488_s24  ;;  %3375 = vrot.lane.b32.xlu1 %v3645_v42, %s3493_s18 }
 0x489   :  { %1600 = vrot.lane.b32.xlu0 %v3639_v38, %s3494_s3  ;;  %1598 = vrot.lane.b32.xlu1 %v3633_v34, %s3494_s3 }
 0x498   :  { %v1121_v48 = vpop.xlane.xlu0 %1120 }
 0x499   :  { %v1125_v50 = vsub.f32 %v1117_v18, %v1121_v48 }
 0x49b   :  { %v1127_v51 = vmul.f32 1.442695, %v1125_v50 }
 0x49d   :  { %3429 = vpow2.f32 %v1127_v51 }
 0x4a7   :  { %v3430_v52 = vpop.eup %3429 }
 0x4a8   :  { %v1131_v53 = vsel %vm265_vm3, %v3430_v52, 0.0 }
 0x4ad   :  { %1132 = vadd.xlane.f32.xlu1 %v1131_v53 }
 0x4fc   :  { %v849_v54 = vpop.xlane.xlu0 %848 }
 0x4fd   :  { %v846_v55 = vpop.xlane.xlu1 %845 }
 0x4fe   :  { %3431 = vrcp.f32 %v846_v55 }
 0x4ff   :  { %3433 = vrcp.f32 %v849_v54 }
 0x500   :  { %v3371_v56 = vpop.permute.xlu0 %3370 }
 0x501   :  { %v3373_v58 = vunpack.i.h.bf16 %v3371_v56  ;;  %v3372_v59 = vunpack.i.l.bf16 %v3371_v56  ;;  %v1124_v61 = vpop.xlane.xlu1 %1123 }
 0x502   :  { %v1126_v5 = vsub.f32 %v1118_v45, %v1124_v61 }
 0x503   :  { %v3212_v62 = vpack.c.bf16 %v3373_v58, %v3372_v59 }
 0x504   :  { %v1601_v4 = vpop.permute.xlu0 %1600  ;;  %v1129_v6 = vmul.f32 1.442695, %v1126_v5 }
 0x505   :  { %v3376_v63 = vpop.permute.xlu1 %3375  ;;  %3213 = vmatprep.subr.bf16.mxu1 %v3212_v62 }
 0x506   :  { %v3378_v0 = vunpack.i.h.bf16 %v3376_v63  ;;  %v3377_v1 = vunpack.i.l.bf16 %v3376_v63  ;;  %3435 = vpow2.f32 %v1129_v6 }
 0x508   :  { %v3226_v2 = vpack.c.bf16 %v3378_v0, %v3377_v1  ;;  %v3432_v11 = vpop.eup %3431 }
 0x509   :  { %v1599_v3 = vpop.permute.xlu1 %1598  ;;  %v3434_v14 = vpop.eup %3433 }
 0x50a   :  { %3228 = vmatprep.subr.msk.bf16.mxu0 %vm3654_vm2, %v3226_v2  ;;  %3053 = vmatprep.mubr.msk.f32.mxu0 %vm177_vm1, %v1599_v3 }
 0x50b   :  { %3231 = vmatpush3.bf16.xpose.msk.msra.mxu0 %vm3654_vm2, %v3226_v2 }
 0x510   :  { %v3436_v21 = vpop.eup %3435 }
 0x511   :  { %v1134_v22 = vsel %vm265_vm3, %v3436_v21, 0.0 }
 0x512   :  { %3054 = vmatmul.mubr.msk.f32.vlgmr.msra.gmra.mrb[16].mxu0 %vm177_vm1, %v1601_v4 }
 0x53a   :  { %v1133_v24 = vpop.xlane.xlu1 %1132 }
 0x543   :  { %v3036_v7 = vpop.f32.mrb[14].mxu0 }
 0x544   :  { %v1403_v8 = vmul.f32 0.35355338, %v3036_v7  ;;  %v3005_v9 = vpop.f32.mrb[4].mxu1  ;;  %v1393_v10 = vpop.f32.mrb[15].mxu0 }
 0x545   :  { %v1402_v12 = vmul.f32 0.35355338, %v1393_v10  ;;  %v928_v13 = vpop.f32.mrb[5].mxu1  ;;  %v940_v17 = vmul.f32 %v3434_v14, %v3005_v9 }
 0x546   :  { %v939_v15 = vmul.f32 %v3432_v11, %v928_v13  ;;  %v1405_v16 = vadd.f32 %v1403_v8, %v3672_v57 }
 0x547   :  { %v1404_v18 = vadd.f32 %v1402_v12, %v3677_v60 }
 0x548   :  { %3008 = vmatprep.mubr.msk.f32.mxu1 %vm177_vm1, %v939_v15  ;;  %v1409_v19 = vsel %vm265_vm3, %v1405_v16, -inf }
 0x549   :  { %1410 = vmax.xlane.f32.xlu1 %v1409_v19  ;;  %3009 = vmatmul.mubr.msk.f32.vlgmr.msra.gmra.mrb[2].mxu1 %vm177_vm1, %v940_v17  ;;  %v1406_v20 = vsel %vm265_vm3, %v1404_v18, -inf }
 0x54a   :  { %3215 = vmatpush3.bf16.msra.mxu1 %v3212_v62  ;;  %1407 = vmax.xlane.f32.xlu0 %v1406_v20 }
 0x54b   :  { %3022 = vmatprep.mubr.msk.f32.mxu1 %vm265_vm3, %v3430_v52  ;;  %3025 = vmatprep.subr.mxu1 %v164_v23 }
 0x54d   :  { %3023 = vmatmul.mubr.msk.f32.vlgmr.msra.gmra.mrb[6].mxu1 %vm265_vm3, %v3436_v21 }
 0x54e   :  { %1135 = vadd.xlane.f32.xlu0 %v1134_v22  ;;  %3026 = vmatpush3.msra.mxu1 %v164_v23 }
 0x55a   :  { %3385 = vrot.lane.b32.xlu1 %v3645_v42, %s3495_s19 }
 0x55e   :  { %1885 = vrot.lane.b32.xlu1 %v3633_v34, %s3496_s20 }
 0x564   :  { %3380 = vrot.lane.b32.xlu0 %v3647_v44, %s3492_s16 }
 0x568   :  { %1887 = vrot.lane.b32.xlu0 %v3639_v38, %s3496_s20 }
 0x5d6   :  { %v1411_v25 = vpop.xlane.xlu1 %1410 }
 0x5d7   :  { %v1408_v26 = vpop.xlane.xlu0 %1407  ;;  %v1413_v28 = vsub.f32 %v1405_v16, %v1411_v25 }
 0x5d8   :  { %v1412_v27 = vsub.f32 %v1404_v18, %v1408_v26 }
 0x5d9   :  { %v1416_v36 = vmul.f32 1.442695, %v1413_v28 }
 0x5da   :  { %v1414_v29 = vmul.f32 1.442695, %v1412_v27  ;;  %v3386_v30 = vpop.permute.xlu1 %3385 }
 0x5db   :  { %v3388_v31 = vunpack.i.h.bf16 %v3386_v30  ;;  %v3387_v32 = vunpack.i.l.bf16 %v3386_v30  ;;  %v1136_v33 = vpop.xlane.xlu0 %1135 }
 0x5dc   :  { %3437 = vpow2.f32 %v1414_v29 }
 0x5dd   :  { %v3236_v35 = vpack.c.bf16 %v3388_v31, %v3387_v32  ;;  %3439 = vpow2.f32 %v1416_v36 }
 0x5de   :  { %v1886_v37 = vpop.permute.xlu1 %1885  ;;  %3441 = vrcp.f32 %v1133_v24 }
 0x5df   :  { %3238 = vmatprep.subr.msk.bf16.mxu0 %vm3654_vm2, %v3236_v35  ;;  %3072 = vmatprep.mubr.msk.f32.mxu0 %vm177_vm1, %v1886_v37  ;;  %v3381_v39 = vpop.permute.xlu0 %3380  ;;  %3443 = vrcp.f32 %v1136_v33  ;;  %v166_v37 = vld [vmem:[%s3994_s4 + $0x28] sm:$0xff] }
 0x5e0   :  { %v3383_v40 = vunpack.i.h.bf16 %v3381_v39  ;;  %v3382_v41 = vunpack.i.l.bf16 %v3381_v39  ;;  %3241 = vmatpush3.bf16.xpose.msk.msra.mxu0 %vm3654_vm2, %v3236_v35 }
 0x5e2   :  { %v3222_v43 = vpack.c.bf16 %v3383_v40, %v3382_v41 }
 0x5e3   :  { %v1888_v47 = vpop.permute.xlu0 %1887 }
 0x5e4   :  { %3223 = vmatprep.subr.bf16.mxu1 %v3222_v43 }
 0x5e5   :  { %v3055_v45 = vpop.f32.mrb[16].mxu0 }
 0x5e6   :  { %v3438_v46 = vpop.eup %3437  ;;  %v1690_v48 = vmul.f32 0.35355338, %v3055_v45  ;;  %v1680_v50 = vpop.f32.mrb[17].mxu0 }
 0x5e7   :  { %v1689_v51 = vmul.f32 0.35355338, %v1680_v50  ;;  %3073 = vmatmul.mubr.msk.f32.vlgmr.msra.gmra.mrb[18].mxu0 %vm177_vm1, %v1888_v47  ;;  %v1418_v52 = vsel %vm265_vm3, %v3438_v46, 0.0  ;;  %v3440_v58 = vpop.eup %3439 }
 0x5e8   :  { %1419 = vadd.xlane.f32.xlu1 %v1418_v52  ;;  %v1692_v53 = vadd.f32 %v1690_v48, %v3672_v57  ;;  %v1421_v59 = vsel %vm265_vm3, %v3440_v58, 0.0  ;;  %v3442_v62 = vpop.eup %3441 }
 0x5e9   :  { %v1691_v54 = vadd.f32 %v1689_v51, %v3677_v60  ;;  %v3444_v0 = vpop.eup %3443 }
 0x5ea   :  { %v1696_v55 = vsel %vm265_vm3, %v1692_v53, -inf }
 0x5eb   :  { %v1693_v56 = vsel %vm265_vm3, %v1691_v54, -inf }
 0x5ec   :  { %1697 = vmax.xlane.f32.xlu1 %v1696_v55  ;;  %1694 = vmax.xlane.f32.xlu0 %v1693_v56 }
 0x5f0   :  { %1422 = vadd.xlane.f32.xlu0 %v1421_v59 }
 0x5fd   :  { %3395 = vrot.lane.b32.xlu1 %v3645_v42, %s3497_s23 }
 0x601   :  { %2172 = vrot.lane.b32.xlu1 %v3633_v34, %s3498_s1  ;;  %v165_v34 = vld [vmem:[%s3994_s4 + $0x20] sm:$0xff] }
 0x606   :  { %3390 = vrot.lane.b32.xlu0 %v3647_v44, %s3494_s3 }
 0x60a   :  { %2174 = vrot.lane.b32.xlu0 %v3639_v38, %s3498_s1 }
 0x620   :  { %v3024_v61 = vpop.f32.mrb[6].mxu1 }
 0x621   :  { %v1215_v63 = vpop.f32.mrb[7].mxu1  ;;  %v1227_v2 = vmul.f32 %v3444_v0, %v3024_v61 }
 0x622   :  { %v1226_v1 = vmul.f32 %v3442_v62, %v1215_v63 }
 0x624   :  { %3027 = vmatprep.mubr.msk.f32.mxu1 %vm177_vm1, %v1226_v1 }
 0x625   :  { %3028 = vmatmul.mubr.msk.f32.vlgmr.msra.gmra.mrb[2].mxu1 %vm177_vm1, %v1227_v2 }
 0x626   :  { %3225 = vmatpush3.bf16.msra.mxu1 %v3222_v43  ;;  %3041 = vmatprep.mubr.msk.f32.mxu1 %vm265_vm3, %v3438_v46 }
 0x627   :  { %3044 = vmatprep.subr.mxu1 %v165_v34 }
 0x629   :  { %3042 = vmatmul.mubr.msk.f32.vlgmr.msra.gmra.mrb[8].mxu1 %vm265_vm3, %v3440_v58 }
 0x62a   :  { %3045 = vmatpush3.msra.mxu1 %v165_v34 }
 0x675   :  { %v1420_v38 = vpop.xlane.xlu1 %1419 }
 0x679   :  { %v1698_v42 = vpop.xlane.xlu1 %1697  ;;  %v1695_v3 = vpop.xlane.xlu0 %1694 }
 0x67a   :  { %v1699_v4 = vsub.f32 %v1691_v54, %v1695_v3  ;;  %v1700_v19 = vsub.f32 %v1692_v53, %v1698_v42 }
 0x67c   :  { %v1701_v5 = vmul.f32 1.442695, %v1699_v4  ;;  %v1703_v20 = vmul.f32 1.442695, %v1700_v19 }
 0x67d   :  { %v3396_v6 = vpop.permute.xlu1 %3395  ;;  %v1423_v7 = vpop.xlane.xlu0 %1422 }
 0x67e   :  { %v3398_v8 = vunpack.i.h.bf16 %v3396_v6  ;;  %v3397_v9 = vunpack.i.l.bf16 %v3396_v6  ;;  %3445 = vpow2.f32 %v1701_v5  ;;  %v167_v5 = vld [vmem:[%s3994_s4 + $0x30] sm:$0xff] }
 0x67f   :  { %3447 = vpow2.f32 %v1703_v20 }
 0x680   :  { %v3246_v10 = vpack.c.bf16 %v3398_v8, %v3397_v9  ;;  %3449 = vrcp.f32 %v1423_v7 }
 0x681   :  { %v2173_v11 = vpop.permute.xlu1 %2172  ;;  %v3391_v12 = vpop.permute.xlu0 %3390  ;;  %3451 = vrcp.f32 %v1420_v38 }
 0x682   :  { %3248 = vmatprep.subr.msk.bf16.mxu0 %vm3654_vm2, %v3246_v10  ;;  %3091 = vmatprep.mubr.msk.f32.mxu0 %vm177_vm1, %v2173_v11  ;;  %v3393_v13 = vunpack.i.h.bf16 %v3391_v12  ;;  %v3392_v14 = vunpack.i.l.bf16 %v3391_v12 }
 0x683   :  { %3251 = vmatpush3.bf16.xpose.msk.msra.mxu0 %vm3654_vm2, %v3246_v10 }
 0x684   :  { %v3232_v15 = vpack.c.bf16 %v3393_v13, %v3392_v14 }
 0x685   :  { %v2175_v17 = vpop.permute.xlu0 %2174 }
 0x686   :  { %3233 = vmatprep.subr.bf16.mxu1 %v3232_v15 }
 0x688   :  { %v3446_v16 = vpop.eup %3445 }
 0x689   :  { %v1705_v18 = vsel %vm265_vm3, %v3446_v16, 0.0  ;;  %v3448_v28 = vpop.eup %3447 }
 0x68a   :  { %3092 = vmatmul.mubr.msk.f32.vlgmr.msra.gmra.mrb[20].mxu0 %vm177_vm1, %v2175_v17  ;;  %1706 = vadd.xlane.f32.xlu1 %v1705_v18  ;;  %v1708_v29 = vsel %vm265_vm3, %v3448_v28, 0.0  ;;  %v3450_v30 = vpop.eup %3449 }
 0x68b   :  { %v3452_v32 = vpop.eup %3451 }
 0x6ba   :  { %v3074_v21 = vpop.f32.mrb[18].mxu0 }
 0x6bb   :  { %v1977_v22 = vmul.f32 0.35355338, %v3074_v21  ;;  %v1967_v23 = vpop.f32.mrb[19].mxu0 }
 0x6bc   :  { %v1976_v24 = vmul.f32 0.35355338, %v1967_v23 }
 0x6bd   :  { %v1979_v25 = vadd.f32 %v1977_v22, %v3672_v57 }
 0x6be   :  { %v1978_v49 = vadd.f32 %v1976_v24, %v3677_v60 }
 0x6bf   :  { %v1983_v26 = vsel %vm265_vm3, %v1979_v25, -inf }
 0x6c0   :  { %1984 = vmax.xlane.f32.xlu1 %v1983_v26  ;;  %v1980_v27 = vsel %vm265_vm3, %v1978_v49, -inf  ;;  %v168_v26 = vld [vmem:[%s3994_s4 + $0x38] sm:$0xff] }
 0x6c1   :  { %1981 = vmax.xlane.f32.xlu0 %v1980_v27 }
 0x6c5   :  { %1709 = vadd.xlane.f32.xlu0 %v1708_v29 }
 0x6db   :  { %3400 = vrot.lane.b32.xlu0 %v3647_v44, %s3496_s20 }
 0x6fc   :  { %v3043_v31 = vpop.f32.mrb[8].mxu1 }
 0x6fd   :  { %v1514_v33 = vmul.f32 %v3450_v30, %v3043_v31  ;;  %v1502_v35 = vpop.f32.mrb[9].mxu1 }
 0x6fe   :  { %v1513_v36 = vmul.f32 %v3452_v32, %v1502_v35 }
 0x700   :  { %3046 = vmatprep.mubr.msk.f32.mxu1 %vm177_vm1, %v1513_v36  ;;  %v2829_v36 = vld [vmem:[%s3995_s5] ss:$0 sm:$0xff] }
 0x701   :  { %3047 = vmatmul.mubr.msk.f32.vlgmr.msra.gmra.mrb[2].mxu1 %vm177_vm1, %v1514_v33 }
 0x702   :  { %3235 = vmatpush3.bf16.msra.mxu1 %v3232_v15  ;;  %3060 = vmatprep.mubr.msk.f32.mxu1 %vm265_vm3, %v3446_v16 }
 0x703   :  { %3063 = vmatprep.subr.mxu1 %v166_v37 }
 0x705   :  { %3061 = vmatmul.mubr.msk.f32.vlgmr.msra.gmra.mrb[10].mxu1 %vm265_vm3, %v3448_v28 }
 0x706   :  { %3064 = vmatpush3.msra.mxu1 %v166_v37 }
 0x717   :  { %v1707_v40 = vpop.xlane.xlu1 %1706 }
 0x74d   :  { %v1985_v43 = vpop.xlane.xlu1 %1984 }
 0x74e   :  { %v1982_v39 = vpop.xlane.xlu0 %1981  ;;  %v1987_v45 = vsub.f32 %v1979_v25, %v1985_v43  ;;  %v3481_v43 = vld [vmem:[%s3991_s0] sm:$0xff] }
 0x74f   :  { %v1986_v52 = vsub.f32 %v1978_v49, %v1982_v39 }
 0x750   :  { %v1990_v51 = vmul.f32 1.442695, %v1987_v45 }
 0x751   :  { %v1988_v54 = vmul.f32 1.442695, %v1986_v52 }
 0x752   :  { %v1710_v41 = vpop.xlane.xlu0 %1709  ;;  %3453 = vpow2.f32 %v1990_v51 }
 0x753   :  { %3455 = vpow2.f32 %v1988_v54 }
 0x754   :  { %3457 = vrcp.f32 %v1710_v41 }
 0x755   :  { %3459 = vrcp.f32 %v1707_v40 }
 0x756   :  { %v3401_v46 = vpop.permute.xlu0 %3400 }
 0x757   :  { %v3403_v47 = vunpack.i.h.bf16 %v3401_v46  ;;  %v3402_v48 = vunpack.i.l.bf16 %v3401_v46 }
 0x759   :  { %v3242_v50 = vpack.c.bf16 %v3403_v47, %v3402_v48  ;;  %v3482_v47 = vld [vmem:[%s3991_s0 + $0x8] sm:$0xff] }
 0x75b   :  { %3243 = vmatprep.subr.bf16.mxu1 %v3242_v50 }
 0x75c   :  { %v3454_v0 = vpop.eup %3453 }
 0x75d   :  { %v3093_v53 = vpop.f32.mrb[20].mxu0  ;;  %v1995_v1 = vsel %vm265_vm3, %v3454_v0, 0.0  ;;  %v3456_v2 = vpop.eup %3455 }
 0x75e   :  { %v2254_v55 = vpop.f32.mrb[21].mxu0  ;;  %v2264_v56 = vmul.f32 0.35355338, %v3093_v53  ;;  %v1992_v34 = vsel %vm265_vm3, %v3456_v2, 0.0 }
 0x75f   :  { %v2263_v58 = vmul.f32 0.35355338, %v2254_v55 }
 0x760   :  { %v2266_v62 = vadd.f32 %v2264_v56, %v3672_v57 }
 0x761   :  { %v2265_v59 = vadd.f32 %v2263_v58, %v3677_v60  ;;  %v3458_v60 = vpop.eup %3457 }
 0x762   :  { %v2270_v63 = vsel %vm265_vm3, %v2266_v62, -inf  ;;  %v3460_v57 = vpop.eup %3459 }
 0x763   :  { %v2267_v61 = vsel %vm265_vm3, %v2265_v59, -inf }
 0x764   :  { %2268 = vmax.xlane.f32.xlu1 %v2267_v61 }
 0x768   :  { %2271 = vmax.xlane.f32.xlu1 %v2270_v63  ;;  %v2515_v63 = vld [vmem:[%s3996_s8] sm:$0xff] }
 0x76c   :  { %1996 = vadd.xlane.f32.xlu1 %v1995_v1 }
 0x770   :  { %1993 = vadd.xlane.f32.xlu1 %v1992_v34  ;;  %v2518_v34 = vld [vmem:[%s3996_s8 + $0x18] sm:$0xff] }
 0x781   :  { %3405 = vrot.lane.b32.xlu1 %v3647_v44, %s3498_s1 }
 0x7d8   :  { %v3062_v38 = vpop.f32.mrb[10].mxu1 }
 0x7d9   :  { %v1801_v42 = vmul.f32 %v3458_v60, %v3062_v38  ;;  %v1789_v3 = vpop.f32.mrb[11].mxu1  ;;  %v2519_v38 = vld [vmem:[%s3996_s8 + $0x20] sm:$0xff] }
 0x7da   :  { %v1800_v4 = vmul.f32 %v3460_v57, %v1789_v3  ;;  %v2520_v57 = vld [vmem:[%s3996_s8 + $0x28] sm:$0xff]  ;;  %v2521_v3 = vld [vmem:[%s3996_s8 + $0x30] sm:$0xff] }
 0x7dc   :  { %3065 = vmatprep.mubr.msk.f32.mxu1 %vm177_vm1, %v1800_v4  ;;  %v2522_v4 = vld [vmem:[%s3996_s8 + $0x38] sm:$0xff] }
 0x7dd   :  { %3066 = vmatmul.mubr.msk.f32.vlgmr.msra.gmra.mrb[2].mxu1 %vm177_vm1, %v1801_v42  ;;  %v3264_v42 = vpack.c.bf16 %v2520_v57, %v2519_v38 }
 0x7de   :  { %3245 = vmatpush3.bf16.msra.mxu1 %v3242_v50  ;;  %3079 = vmatprep.mubr.msk.f32.mxu1 %vm265_vm3, %v3456_v2  ;;  %v2517_v2 = vld [vmem:[%s3996_s8 + $0x10] sm:$0xff] }
 0x7df   :  { %3082 = vmatprep.subr.mxu1 %v167_v5  ;;  %v3260_v60 = vpack.c.bf16 %v2518_v34, %v2517_v2 }
 0x7e1   :  { %3080 = vmatmul.mubr.msk.f32.vlgmr.msra.gmra.mrb[12].mxu1 %vm265_vm3, %v3454_v0  ;;  %v2516_v0 = vld [vmem:[%s3996_s8 + $0x8] sm:$0xff] }
 0x7e2   :  { %3083 = vmatpush3.msra.mxu1 %v167_v5  ;;  %v3256_v1 = vpack.c.bf16 %v2516_v0, %v2515_v63  ;;  %v3268_v5 = vpack.c.bf16 %v2522_v4, %v2521_v3 }
 0x7e4   :  { %3257 = vmatprep.subr.bf16.mxu0 %v3256_v1 }
 0x7e5   :  { %3259 = vmatpush3.bf16.msra.mxu0 %v3256_v1 }
 0x7e6   :  { %3261 = vmatprep.subr.bf16.mxu0 %v3260_v60 }
 0x7e9   :  { %3263 = vmatpush3.bf16.msra.mxu0 %v3260_v60 }
 0x7ea   :  { %3265 = vmatprep.subr.bf16.mxu0 %v3264_v42 }
 0x7ed   :  { %3267 = vmatpush3.bf16.msra.mxu0 %v3264_v42 }
 0x7ee   :  { %3269 = vmatprep.subr.bf16.mxu0 %v3268_v5 }
 0x7f1   :  { %v2269_v44 = vpop.xlane.xlu1 %2268  ;;  %3271 = vmatpush3.bf16.msra.mxu0 %v3268_v5 }
 0x7f2   :  { %v2273_v6 = vsub.f32 %v2265_v59, %v2269_v44  ;;  %v2613_v44 = vld [vmem:[%s3997_s10] sm:$0xff] }
 0x7f4   :  { %v2275_v7 = vmul.f32 1.442695, %v2273_v6  ;;  %v2614_v6 = vld [vmem:[%s3997_s10 + $0x8] sm:$0xff] }
 0x7f5   :  { %v2272_v8 = vpop.xlane.xlu1 %2271 }
 0x7f6   :  { %3461 = vpow2.f32 %v2275_v7  ;;  %v2274_v9 = vsub.f32 %v2266_v62, %v2272_v8  ;;  %v2615_v7 = vld [vmem:[%s3997_s10 + $0x10] sm:$0xff]  ;;  %v3272_v8 = vpack.c.bf16 %v2614_v6, %v2613_v44 }
 0x7f8   :  { %v2277_v10 = vmul.f32 1.442695, %v2274_v9  ;;  %v2616_v9 = vld [vmem:[%s3997_s10 + $0x18] sm:$0xff] }
 0x7f9   :  { %v1997_v11 = vpop.xlane.xlu1 %1996 }
 0x7fa   :  { %3463 = vpow2.f32 %v2277_v10  ;;  %v3276_v10 = vpack.c.bf16 %v2616_v9, %v2615_v7 }
 0x7fb   :  { %3465 = vrcp.f32 %v1997_v11  ;;  %v2617_v11 = vld [vmem:[%s3997_s10 + $0x20] sm:$0xff] }
 0x7fd   :  { %v1994_v12 = vpop.xlane.xlu1 %1993 }
 0x7fe   :  { %3467 = vrcp.f32 %v1994_v12  ;;  %v2618_v12 = vld [vmem:[%s3997_s10 + $0x28] sm:$0xff] }
 0x800   :  { %v3462_v13 = vpop.eup %3461 }
 0x801   :  { %v3406_v14 = vpop.permute.xlu1 %3405  ;;  %v2279_v15 = vsel %vm265_vm3, %v3462_v13, 0.0 }
 0x802   :  { %v3408_v16 = vunpack.i.h.bf16 %v3406_v14  ;;  %v3407_v17 = vunpack.i.l.bf16 %v3406_v14  ;;  %2280 = vadd.xlane.f32.xlu0 %v2279_v15  ;;  %v2619_v14 = vld [vmem:[%s3997_s10 + $0x30] sm:$0xff]  ;;  %v2620_v15 = vld [vmem:[%s3997_s10 + $0x38] sm:$0xff] }
 0x804   :  { %v3464_v18 = vpop.eup %3463  ;;  %v3252_v19 = vpack.c.bf16 %v3408_v16, %v3407_v17  ;;  %v3284_v16 = vpack.c.bf16 %v2620_v15, %v2619_v14  ;;  %v2621_v17 = vld [vmem:[%s3997_s10 + $0x40] sm:$0xff] }
 0x805   :  { %v2282_v20 = vsel %vm265_vm3, %v3464_v18, 0.0  ;;  %v3466_v21 = vpop.eup %3465  ;;  %v2836_v14 = vld [vmem:[%s4002_s12] ss:$0 sm:$0xff] }
 0x806   :  { %2283 = vadd.xlane.f32.xlu1 %v2282_v20  ;;  %3253 = vmatprep.subr.bf16.mxu1 %v3252_v19  ;;  %v2623_v20 = vld [vmem:[%s3997_s10 + $0x50] sm:$0xff] }
 0x808   :  { %v3468_v23 = vpop.eup %3467 }
 0x88f   :  { %v2281_v27 = vpop.xlane.xlu0 %2280 }
 0x890   :  { %3469 = vrcp.f32 %v2281_v27 }
 0x893   :  { %v2284_v28 = vpop.xlane.xlu1 %2283 }
 0x894   :  { %3471 = vrcp.f32 %v2284_v28 }
 0x89a   :  { %v3470_v30 = vpop.eup %3469 }
 0x89e   :  { %v3472_v32 = vpop.eup %3471 }
 0x8b4   :  { %v3081_v22 = vpop.f32.mrb[12].mxu1 }
 0x8b5   :  { %v2088_v24 = vmul.f32 %v3466_v21, %v3081_v22  ;;  %v2076_v25 = vpop.f32.mrb[13].mxu1  ;;  %v2624_v21 = vld [vmem:[%s3997_s10 + $0x58] sm:$0xff] }
 0x8b6   :  { %v2087_v49 = vmul.f32 %v3468_v23, %v2076_v25  ;;  %v3292_v22 = vpack.c.bf16 %v2624_v21, %v2623_v20  ;;  %v2625_v23 = vld [vmem:[%s3997_s10 + $0x60] sm:$0xff] }
 0x8b8   :  { %3084 = vmatprep.mubr.msk.f32.mxu1 %vm177_vm1, %v2087_v49 }
 0x8b9   :  { %3085 = vmatmul.mubr.msk.f32.vlgmr.msra.gmra.mrb[2].mxu1 %vm177_vm1, %v2088_v24  ;;  %v2626_v24 = vld [vmem:[%s3997_s10 + $0x68] sm:$0xff] }
 0x8ba   :  { %3255 = vmatpush3.bf16.msra.mxu1 %v3252_v19  ;;  %3098 = vmatprep.mubr.msk.f32.mxu1 %vm265_vm3, %v3462_v13  ;;  %v3280_v13 = vpack.c.bf16 %v2618_v12, %v2617_v11  ;;  %v3296_v25 = vpack.c.bf16 %v2626_v24, %v2625_v23 }
 0x8bb   :  { %3101 = vmatprep.subr.mxu1 %v168_v26 }
 0x8bd   :  { %3099 = vmatmul.mubr.msk.f32.vlgmr.msra.gmra.mrb[14].mxu1 %vm265_vm3, %v3464_v18  ;;  %v2622_v18 = vld [vmem:[%s3997_s10 + $0x48] sm:$0xff] }
 0x8be   :  { %3102 = vmatpush3.msra.mxu1 %v168_v26  ;;  %v3288_v19 = vpack.c.bf16 %v2622_v18, %v2621_v17  ;;  %v2837_v17 = vld [vmem:[%s4003_s13] ss:$0 sm:$0xff] }
 0x8bf   :  { %3273 = vmatprep.subr.bf16.mxu1 %v3272_v8 }
 0x990   :  { %v3100_v29 = vpop.f32.mrb[14].mxu1 }
 0x991   :  { %v2363_v31 = vpop.f32.mrb[15].mxu1  ;;  %v2375_v35 = vmul.f32 %v3472_v32, %v3100_v29  ;;  %v2830_v32 = vld [vmem:[%s3998_s6] ss:$0 sm:$0xff] }
 0x992   :  { %v2374_v33 = vmul.f32 %v3470_v30, %v2363_v31 }
 0x994   :  { %3103 = vmatprep.mubr.msk.f32.mxu1 %vm177_vm1, %v2374_v33 }
 0x995   :  { %3104 = vmatmul.mubr.msk.f32.vlgmr.msra.gmra.mrb[2].mxu1 %vm177_vm1, %v2375_v35  ;;  %v2831_v35 = vld [vmem:[%s3999_s7] ss:$0 sm:$0xff] }
 0x996   :  { %3275 = vmatpush3.bf16.msra.mxu1 %v3272_v8 }
 0x997   :  { %3277 = vmatprep.subr.bf16.mxu1 %v3276_v10 }
 0x99a   :  { %3279 = vmatpush3.bf16.msra.mxu1 %v3276_v10 }
 0x99b   :  { %3281 = vmatprep.subr.bf16.mxu1 %v3280_v13 }
 0x99e   :  { %3283 = vmatpush3.bf16.msra.mxu1 %v3280_v13 }
 0x99f   :  { %3285 = vmatprep.subr.bf16.mxu1 %v3284_v16 }
 0x9a2   :  { %3287 = vmatpush3.bf16.msra.mxu1 %v3284_v16 }
 0x9a3   :  { %3289 = vmatprep.subr.bf16.mxu1 %v3288_v19 }
 0x9a6   :  { %3291 = vmatpush3.bf16.msra.mxu1 %v3288_v19 }
 0x9a7   :  { %3293 = vmatprep.subr.bf16.mxu1 %v3292_v22 }
 0x9aa   :  { %3295 = vmatpush3.bf16.msra.mxu1 %v3292_v22 }
 0x9ab   :  { %3297 = vmatprep.subr.bf16.mxu1 %v3296_v25 }
 0x9ae   :  { %3299 = vmatpush3.bf16.msra.mxu1 %v3296_v25 }
 0xa68   :  { %v3105_v37 = vpop.f32.mrb[2].mxu1 }
 0xa69   :  { %v2448_v39 = vpop.f32.mrb[3].mxu1  ;;  %v2467_v40 = vadd.f32 %v3105_v37, %v2829_v36 }
 0xa6a   :  { %v2466_v41 = vadd.f32 %v2829_v36, %v2448_v39 }
 0xa6b   :  { %v2469_v48 = vadd.f32 %v3482_v47, %v2467_v40 }
 0xa6c   :  { %v2468_v45 = vadd.f32 %v3481_v43, %v2466_v41 }
 0xa6d   :  { %v2475_v50 = vsel %vm77_vm0, %v2469_v48, 0.0 }
 0xa6e   :  { %v2472_v46 = vsel %vm77_vm0, %v2468_v45, 0.0 }
 0xa6f   :  { %2473 = vadd.xlane.f32.xlu0 %v2472_v46  ;;  %v2628_v46 = vld [vmem:[%s3997_s10 + $0x78] sm:$0xff] }
 0xa73   :  { %2476 = vadd.xlane.f32.xlu0 %v2475_v50 }
 0xafc   :  { %v2474_v51 = vpop.xlane.xlu0 %2473 }
 0xafd   :  { %v2479_v52 = vmul.f32 0.015625, %v2474_v51 }
 0xaff   :  { %v3874_v53 = vsub.f32 %v2468_v45, %v2479_v52  ;;  %v2627_v45 = vld [vmem:[%s3997_s10 + $0x70] sm:$0xff] }
 0xb00   :  { %v2477_v54 = vpop.xlane.xlu0 %2476  ;;  %v3300_v47 = vpack.c.bf16 %v2628_v46, %v2627_v45 }
 0xb01   :  { %v2480_v55 = vmul.f32 0.015625, %v2477_v54  ;;  %v2483_v56 = vmul.f32 %v3874_v53, %v3874_v53 }
 0xb02   :  { %3301 = vmatprep.subr.bf16.mxu1 %v3300_v47 }
 0xb03   :  { %v3878_v58 = vsub.f32 %v2469_v48, %v2480_v55  ;;  %v2485_v59 = vsel %vm77_vm0, %v2483_v56, 0.0  ;;  %3303 = vmatpush3.bf16.msra.mxu1 %v3300_v47  ;;  %v2832_v48 = vld [vmem:[%s4000_s9] ss:$0 sm:$0xff] }
 0xb04   :  { %2486 = vadd.xlane.f32.xlu0 %v2485_v59  ;;  %v2835_v56 = vld [vmem:[%s4001_s11] ss:$0 sm:$0xff] }
 0xb05   :  { %v2484_v61 = vmul.f32 %v3878_v58, %v3878_v58 }
 0xb07   :  { %v2488_v62 = vsel %vm77_vm0, %v2484_v61, 0.0 }
 0xb08   :  { %2489 = vadd.xlane.f32.xlu0 %v2488_v62 }
 0xb91   :  { %v2487_v49 = vpop.xlane.xlu0 %2486 }
 0xb92   :  { %v2491_v26 = vmul.f32 0.015625, %v2487_v49 }
 0xb94   :  { %v2493_v27 = vadd.f32 1e-05, %v2491_v26 }
 0xb95   :  { %v2490_v28 = vpop.xlane.xlu0 %2489 }
 0xb96   :  { %3473 = vrsqrt.f32 %v2493_v27  ;;  %v2492_v29 = vmul.f32 0.015625, %v2490_v28 }
 0xb98   :  { %v2494_v30 = vadd.f32 1e-05, %v2492_v29 }
 0xb9a   :  { %3475 = vrsqrt.f32 %v2494_v30 }
 0xba0   :  { %v3474_v31 = vpop.eup %3473 }
 0xba1   :  { %v2497_v33 = vmul.f32 %v3474_v31, %v3874_v53 }
 0xba3   :  { %v2505_v36 = vmul.f32 %v2830_v32, %v2497_v33 }
 0xba4   :  { %v3476_v37 = vpop.eup %3475 }
 0xba5   :  { %v2498_v39 = vmul.f32 %v3476_v37, %v3878_v58  ;;  %v2513_v40 = vadd.f32 %v2831_v35, %v2505_v36 }
 0xba7   :  { %v2506_v41 = vmul.f32 %v2830_v32, %v2498_v39  ;;  %3122 = vmatprep.mubr.msk.f32.mxu0 %vm77_vm0, %v2513_v40 }
 0xba9   :  { %v2514_v43 = vadd.f32 %v2831_v35, %v2506_v41 }
 0xbab   :  { %3123 = vmatmul.mubr.msk.f32.vlgmr.msra.gmra.mrb[22].mxu0 %vm77_vm0, %v2514_v43 }
 0xc7e   :  { %v3124_v50 = vpop.f32.mrb[22].mxu0 }
 0xc7f   :  { %v2608_v51 = vadd.f32 %v3124_v50, %v2832_v48  ;;  %v2602_v52 = vpop.f32.mrb[23].mxu0 }
 0xc80   :  { %v2603_v53 = vadd.f32 %v2832_v48, %v2602_v52 }
 0xc81   :  { %v2612_v55 = vmax.f32 %v2608_v51, 0.0 }
 0xc82   :  { %v2611_v54 = vmax.f32 %v2603_v53, 0.0 }
 0xc84   :  { %3157 = vmatprep.mubr.f32.mxu1 %v2611_v54 }
 0xc85   :  { %3158 = vmatmul.mubr.f32.vlgmr.msra.gmra.mrb[16].mxu1 %v2612_v55 }
 0xd58   :  { %v3159_v58 = vpop.f32.mrb[16].mxu1 }
 0xd59   :  { %v2708_v59 = vadd.f32 %v3159_v58, %v2835_v56  ;;  %v2702_v61 = vpop.f32.mrb[17].mxu1 }
 0xd5a   :  { %v2703_v62 = vadd.f32 %v2835_v56, %v2702_v61 }
 0xd5b   :  { %v2712_v63 = vadd.f32 %v2708_v59, %v2514_v43 }
 0xd5c   :  { %v2711_v0 = vadd.f32 %v2703_v62, %v2513_v40 }
 0xd5d   :  { %v2718_v1 = vsel %vm77_vm0, %v2712_v63, 0.0 }
 0xd5e   :  { %2719 = vadd.xlane.f32.xlu1 %v2718_v1  ;;  %v2715_v2 = vsel %vm77_vm0, %v2711_v0, 0.0 }
 0xd5f   :  { %2716 = vadd.xlane.f32.xlu0 %v2715_v2 }
 0xdeb   :  { %v2720_v34 = vpop.xlane.xlu1 %2719 }
 0xdec   :  { %v2722_v60 = vmul.f32 0.015625, %v2720_v34  ;;  %v2717_v38 = vpop.xlane.xlu0 %2716 }
 0xded   :  { %v2721_v57 = vmul.f32 0.015625, %v2717_v38 }
 0xdee   :  { %v2724_v42 = vsub.f32 %v2712_v63, %v2722_v60 }
 0xdef   :  { %v2723_v3 = vsub.f32 %v2711_v0, %v2721_v57 }
 0xdf0   :  { %v2726_v4 = vmul.f32 %v2724_v42, %v2724_v42 }
 0xdf1   :  { %v2725_v5 = vmul.f32 %v2723_v3, %v2723_v3 }
 0xdf2   :  { %v2730_v44 = vsel %vm77_vm0, %v2726_v4, 0.0 }
 0xdf3   :  { %2731 = vadd.xlane.f32.xlu1 %v2730_v44  ;;  %v2727_v6 = vsel %vm77_vm0, %v2725_v5, 0.0 }
 0xdf4   :  { %2728 = vadd.xlane.f32.xlu0 %v2727_v6 }
 0xe80   :  { %v2732_v7 = vpop.xlane.xlu1 %2731 }
 0xe81   :  { %v2734_v8 = vmul.f32 0.015625, %v2732_v7  ;;  %v2729_v9 = vpop.xlane.xlu0 %2728 }
 0xe82   :  { %v2733_v10 = vmul.f32 0.015625, %v2729_v9 }
 0xe83   :  { %v2736_v11 = vadd.f32 1e-05, %v2734_v8 }
 0xe84   :  { %v2735_v12 = vadd.f32 1e-05, %v2733_v10 }
 0xe85   :  { %3477 = vrsqrt.f32 %v2736_v11 }
 0xe86   :  { %3479 = vrsqrt.f32 %v2735_v12 }
 0xe8f   :  { %v3478_v13 = vpop.eup %3477 }
 0xe90   :  { %v3480_v15 = vpop.eup %3479  ;;  %v2740_v16 = vmul.f32 %v3478_v13, %v2724_v42 }
 0xe91   :  { %v2739_v18 = vmul.f32 %v3480_v15, %v2723_v3 }
 0xe92   :  { %v2748_v19 = vmul.f32 %v2836_v14, %v2740_v16 }
 0xe93   :  { %v2747_v20 = vmul.f32 %v2836_v14, %v2739_v18 }
 0xe94   :  { %v2756_v21 = vadd.f32 %v2837_v17, %v2748_v19 }
 0xe95   :  { %v2755_v22 = vadd.f32 %v2837_v17, %v2747_v20 }
 0xe96   :  { %2758 = vst.msk [vmem:[%s4004_s14 + $0x8] sm:$0xff] %vm77_vm0, %v2756_v21 }
 0xe97   :  { %2757 = vst.msk [vmem:[%s4004_s14] sm:$0xff] %vm77_vm0, %v2755_v22 }

// kernel: transam_forward.9
= control target key start
LH: loop header
LB: loop body
LE: loop exit
PB: predicated region body
PF: predicated region fallthrough
CT: control target
= control target key end

     0   :  { %s5728_s3 = smov 6   ;;  %v5729_v0 = vmov 0.0   ;;  %vm132_vm0 = vcmask 523264   ;;  %v195_v26 = vlaneseq  ;;  %s5730_s10 = smov 7   ;;  %vm5731_vm1 = vmmov 0   ;;  %s6370_s0 = inlined_call_operand.smem [shape: u32[31], index: -1, kind: input, shape index: {}] }
   0x1   :  { %s5781_s6 = sld [smem:[%s6370_s0 + %s5728_s3]]   ;;  %272 = vmatprep.mubr.f32.mxu0 %v5729_v0  ;;  %5032 = vmatprep.subr.mxu1 %v5729_v0  ;;  %s5732_s14 = smov 56   ;;  %vm291_vm2 = vcmask 64512   ;;  %vm382_vm3 = vcmask 1045504   ;;  %vm368_vm4 = vcmask 46080   ;;  %vm378_vm5 = vcmask 48128  }
   0x2   :  { %s1_s9 = sld [smem:[%s6370_s0]]   ;;  %v196_v27 = vshrl.u32 %v195_v26, 7  ;;  %5034 = vmatprep.mubr.msk.f32.mxu1 %vm5731_vm1, %v5729_v0  ;;  %s5733_s15 = smov 64   ;;  %vm2235_vm6 = vcmask 521216   ;;  %vm6074_vm7 = vmpackc.low %vm291_vm2, %vm291_vm2  ;;  %vm2537_vm8 = vcmask 128000   ;;  %vm2553_vm9 = vcmask 130048  }
   0x3   :  { %s4748_s13 = sld [smem:[%s6370_s0 + %s5730_s10]]   ;;  %s5734_s16 = smov 120   ;;  %vm4724_vm10 = vcmask 517120   ;;  %vm4736_vm11 = vcmask 1024  }
   0x4   :  { %v197_v28 = vsub.s32 0, %v196_v27  ;;  %v201_v34 = vsub.s32 1, %v196_v27  ;;  %s5735_s17 = smov 2   ;;  %s5736_s21 = smov 112  }
   0x5   :  { %s4743_s20 = sld [smem:[%s6370_s0 + %s5735_s17]]   ;;  %s5737_s22 = smov 104  }
   0x6   :  { %s5738_s23 = smov 8   ;;  %s5739_s27 = smov 48  }
   0x7   :  { %v178_v1 = vld [vmem:[%s5781_s6 + $0x8] sm:$0xff]  ;;  %v180_v2 = vld [vmem:[%s5781_s6 + $0x18] sm:$0xff]  ;;  %v177_v3 = vld [vmem:[%s5781_s6] sm:$0xff]  ;;  %s5867_s26 = sld [smem:[%s6370_s0 + %s5738_s23]]   ;;  %s5740_s28 = smov 40  }
   0x8   :  { %v5396_v4 = vpack.c.bf16 %v180_v2, %v178_v1  ;;  %v179_v5 = vld [vmem:[%s5781_s6 + $0x10] sm:$0xff]  ;;  %v182_v6 = vld [vmem:[%s5781_s6 + $0x28] sm:$0xff]  ;;  %v184_v7 = vld [vmem:[%s5781_s6 + $0x38] sm:$0xff]  ;;  %s5741_s29 = smov 96   ;;  %s5742_s30 = smov 32  }
   0x9   :  { %v5398_v8 = vpack.c.bf16 %v179_v5, %v177_v3  ;;  %v5400_v9 = vpack.c.bf16 %v184_v7, %v182_v6  ;;  %v181_v10 = vld [vmem:[%s5781_s6 + $0x20] sm:$0xff]  ;;  %v183_v11 = vld [vmem:[%s5781_s6 + $0x30] sm:$0xff]  ;;  %v186_v12 = vld [vmem:[%s5781_s6 + $0x48] sm:$0xff]  ;;  %s5743_s1 = smov 24   ;;  %s5744_s2 = smov 88  }
   0xa   :  { %5397 = vmatprep.subr.bf16.mxu0 %v5396_v4  ;;  %v188_v13 = vld [vmem:[%s5781_s6 + $0x58] sm:$0xff]  ;;  %v5402_v14 = vpack.c.bf16 %v183_v11, %v181_v10  ;;  %v185_v16 = vld [vmem:[%s5781_s6 + $0x40] sm:$0xff]  ;;  %v187_v17 = vld [vmem:[%s5781_s6 + $0x50] sm:$0xff]  ;;  %s5745_s3 = smov 80   ;;  %s5746_s4 = smov 16  }
   0xb   :  { %5399 = vmatpush1.bf16.msra.mxu0 %v5398_v8  ;;  %v5404_v15 = vpack.c.bf16 %v188_v13, %v186_v12  ;;  %v190_v18 = vld [vmem:[%s5781_s6 + $0x68] sm:$0xff]  ;;  %v192_v19 = vld [vmem:[%s5781_s6 + $0x78] sm:$0xff]  ;;  %v5406_v20 = vpack.c.bf16 %v187_v17, %v185_v16  ;;  %v189_v22 = vld [vmem:[%s5781_s6 + $0x60] sm:$0xff]  ;;  %s5747_s5 = smov 72   ;;  %s5749_s10 = smov 9  }
   0xc   :  { %5401 = vmatprep.subr.bf16.mxu0 %v5400_v9  ;;  %v5408_v21 = vpack.c.bf16 %v192_v19, %v190_v18  ;;  %v191_v23 = vld [vmem:[%s5781_s6 + $0x70] sm:$0xff]  ;;  %v5804_v25 = vld [vmem:[%s1_s9] sm:$0x3f]  ;;  %s5748_s6 = smov 1   ;;  %s5750_s17 = smov 14  }
   0xd   :  { %v5410_v24 = vpack.c.bf16 %v191_v23, %v189_v22  ;;  %v193_v29 = vld [vmem:[%s4748_s13] sm:$0x3]  ;;  %v280_v7 = vld [vmem:[%s5867_s26 + $0x8] sm:$0xff]  ;;  %s4742_s9 = sld [smem:[%s6370_s0 + %s5748_s6]]   ;;  %s5751_s24 = smov 4  }
   0xe   :  { %v198_v30 = vrot.slane %v193_v29, %v197_v28  ;;  %v202_v35 = vrot.slane %v193_v29, %v201_v34  ;;  %v5838_v39 = vld [vmem:[%s4743_s20] sm:$0x3f]  ;;  %s4750_s13 = sld [smem:[%s6370_s0 + %s5749_s10]]   ;;  %s5752_s7 = smov 5  }
   0xf   :  { %5403 = vmatpush1.bf16.msra.mxu0 %v5402_v14  ;;  %v279_v1 = vld [vmem:[%s5867_s26] sm:$0xff]  ;;  %s4755_s20 = sld [smem:[%s6370_s0 + %s5750_s17]]   ;;  %s5753_s11 = smov 12  }
  0x10   :  { %5405 = vmatprep.subr.bf16.mxu0 %v5404_v15  ;;  %s4745_s6 = sld [smem:[%s6370_s0 + %s5751_s24]]   ;;  %s5755_s18 = smov 10  }
  0x11   :  { %s4746_s10 = sld [smem:[%s6370_s0 + %s5752_s7]]   ;;  %s5756_s25 = smov 11  }
  0x12   :  { %s4753_s17 = sld [smem:[%s6370_s0 + %s5753_s11]]   ;;  %s5757_s8 = smov 15  }
  0x13   :  { %5407 = vmatpush1.bf16.msra.mxu0 %v5406_v20  ;;  %s4751_s24 = sld [smem:[%s6370_s0 + %s5755_s18]]   ;;  %s5758_s12 = smov 13  }
  0x14   :  { %5409 = vmatprep.subr.bf16.mxu0 %v5408_v21  ;;  %s4752_s7 = sld [smem:[%s6370_s0 + %s5756_s25]]   ;;  %s5766_s19 = smov 23  }
  0x15   :  { %s4756_s11 = sld [smem:[%s6370_s0 + %s5757_s8]]  }
  0x16   :  { %s4754_s18 = sld [smem:[%s6370_s0 + %s5758_s12]]  }
  0x17   :  { %5411 = vmatpush1.bf16.msra.mxu0 %v5410_v24 }
  0x18   :  { %5052 = vmatprep.subr.mxu0 %v5729_v0 }
  0x1a   :  { %4774 = vmatmul.mubr.msk.f32.vlgmr.msra.gmra.mrb[0].mxu0 %vm132_vm0, %v5804_v25 }
  0x1b   :  { %5054 = vmatprep.mubr.msk.f32.mxu0 %vm5731_vm1, %v5729_v0  ;;  %5053 = vmatpush3.msra.mxu0 %v280_v7 }
  0x1c   :  { %5062 = vmatprep.subr.mxu0 %v5729_v0 }
  0xed   :  { %v274_v31 = vpop.f32.mrb[0].mxu0 }
  0xee   :  { %v5816_v32 = vadd.f32 %v274_v31, %v198_v30  ;;  %v276_v33 = vpop.f32.mrb[1].mxu0 }
  0xef   :  { %v5826_v37 = vadd.f32 %v276_v33, %v202_v35  ;;  %v281_v33 = vld [vmem:[%s5867_s26 + $0x10] sm:$0xff] }
  0xf0   :  { %460 = vrot.lane.b32.xlu1 %v5816_v32, %s5732_s14  ;;  %289 = vrot.lane.b32.xlu0 %v5816_v32, %s5733_s15 }
  0xf4   :  { %458 = vrot.lane.b32.xlu1 %v5816_v32, %s5734_s16 }
 0x162   :  { %v290_v36 = vpop.permute.xlu0 %289  ;;  %v461_v47 = vpop.permute.xlu1 %460 }
 0x163   :  { %5033 = vmatpush3.xpose.msk.msra.mxu1 %vm291_vm2, %v290_v36 }
 0x164   :  { %5037 = vmatprep.subr.mxu1 %v5729_v0 }
 0x166   :  { %5035 = vmatmul.mubr.msk.f32.vlgmr.msra.gmra.mrb[0].mxu1 %vm291_vm2, %v5816_v32  ;;  %v459_v50 = vpop.permute.xlu1 %458 }
 0x167   :  { %5038 = vmatpush3.msk.msra.mxu1 %vm382_vm3, %v5826_v37  ;;  %5039 = vmatprep.mubr.msk.f32.mxu1 %vm5731_vm1, %v5729_v0 }
 0x168   :  { %5042 = vmatprep.subr.mxu1 %v5729_v0 }
 0x239   :  { %v362_v38 = vpop.f32.mrb[0].mxu1 }
 0x23a   :  { %v366_v40 = vmul.f32 0.35355338, %v362_v38  ;;  %v5036_v41 = vpop.f32.mrb[1].mxu1 }
 0x23c   :  { %v367_v42 = vadd.f32 %v366_v40, %v5838_v39 }
 0x23e   :  { %v369_v43 = vsel %vm368_vm4, %v367_v42, -inf }
 0x23f   :  { %370 = vmax.xlane.f32.xlu0 %v369_v43 }
 0x255   :  { %547 = vrot.lane.b32.xlu0 %v5826_v37, %s5734_s16 }
 0x259   :  { %772 = vrot.lane.b32.xlu0 %v5816_v32, %s5736_s21 }
 0x2cc   :  { %v371_v44 = vpop.xlane.xlu0 %370 }
 0x2cd   :  { %v372_v45 = vsub.f32 %v367_v42, %v371_v44 }
 0x2cf   :  { %v373_v46 = vmul.f32 1.442695, %v372_v45 }
 0x2d0   :  { %v548_v51 = vpop.permute.xlu0 %547 }
 0x2d1   :  { %5652 = vpow2.f32 %v373_v46 }
 0x2d4   :  { %v773_v59 = vpop.permute.xlu0 %772 }
 0x2db   :  { %v5653_v48 = vpop.eup %5652 }
 0x2dc   :  { %5040 = vmatmul.mubr.msk.f32.vlgmr.msra.gmra.mrb[2].mxu1 %vm378_vm5, %v5653_v48  ;;  %v375_v49 = vsel %vm368_vm4, %v5653_v48, 0.0 }
 0x2dd   :  { %5043 = vmatpush3.xpose.msk.msra.mxu1 %vm291_vm2, %v461_v47  ;;  %376 = vadd.xlane.f32.xlu0 %v375_v49 }
 0x2de   :  { %5044 = vmatprep.mubr.msk.f32.mxu1 %vm5731_vm1, %v5729_v0  ;;  %5047 = vmatprep.subr.mxu1 %v5729_v0 }
 0x2e0   :  { %5045 = vmatmul.mubr.msk.f32.vlgmr.msra.gmra.mrb[4].mxu1 %vm291_vm2, %v459_v50 }
 0x2e1   :  { %5048 = vmatpush3.msk.msra.mxu1 %vm382_vm3, %v548_v51  ;;  %5049 = vmatprep.mubr.msk.f32.mxu1 %vm5731_vm1, %v5729_v0 }
 0x2e2   :  { %5057 = vmatprep.subr.mxu1 %v5729_v0 }
 0x2f3   :  { %861 = vrot.lane.b32.xlu0 %v5826_v37, %s5736_s21 }
 0x2f7   :  { %1014 = vrot.lane.b32.xlu0 %v5816_v32, %s5737_s22 }
 0x36a   :  { %v377_v63 = vpop.xlane.xlu0 %376 }
 0x36e   :  { %v862_v6 = vpop.permute.xlu0 %861 }
 0x372   :  { %v1015_v31 = vpop.permute.xlu0 %1014 }
 0x3af   :  { %v452_v52 = vpop.f32.mrb[2].mxu1 }
 0x3b0   :  { %v5041_v53 = vpop.f32.mrb[3].mxu1 }
 0x3b3   :  { %v532_v54 = vpop.f32.mrb[4].mxu1 }
 0x3b4   :  { %v536_v55 = vmul.f32 0.35355338, %v532_v54  ;;  %v5046_v56 = vpop.f32.mrb[5].mxu1 }
 0x3b6   :  { %v537_v57 = vadd.f32 %v536_v55, %v5838_v39 }
 0x3b8   :  { %v538_v58 = vsel %vm368_vm4, %v537_v57, -inf }
 0x3b9   :  { %539 = vmax.xlane.f32.xlu1 %v538_v58 }
 0x446   :  { %v540_v60 = vpop.xlane.xlu1 %539 }
 0x447   :  { %v541_v61 = vsub.f32 %v537_v57, %v540_v60  ;;  %v282_v57 = vld [vmem:[%s5867_s26 + $0x18] sm:$0xff] }
 0x449   :  { %v542_v62 = vmul.f32 1.442695, %v541_v61 }
 0x44b   :  { %5654 = vpow2.f32 %v542_v62 }
 0x44c   :  { %5656 = vrcp.f32 %v377_v63 }
 0x455   :  { %v5655_v2 = vpop.eup %5654 }
 0x456   :  { %5050 = vmatmul.mubr.msk.f32.vlgmr.msra.gmra.mrb[6].mxu1 %vm378_vm5, %v5655_v2  ;;  %v544_v3 = vsel %vm368_vm4, %v5655_v2, 0.0  ;;  %v5657_v4 = vpop.eup %5656 }
 0x457   :  { %545 = vadd.xlane.f32.xlu1 %v544_v3  ;;  %5058 = vmatpush3.msra.mxu1 %v279_v1  ;;  %v457_v5 = vmul.f32 %v5657_v4, %v452_v52 }
 0x458   :  { %5059 = vmatprep.mubr.msk.f32.mxu1 %vm5731_vm1, %v5729_v0  ;;  %5067 = vmatprep.subr.mxu1 %v5729_v0 }
 0x45a   :  { %5060 = vmatmul.mubr.msk.f32.vlgmr.msra.gmra.mrb[8].mxu1 %vm291_vm2, %v457_v5 }
 0x45b   :  { %5068 = vmatpush3.msk.msra.mxu1 %vm382_vm3, %v862_v6  ;;  %5069 = vmatprep.mubr.msk.f32.mxu1 %vm5731_vm1, %v5729_v0 }
 0x45c   :  { %5077 = vmatprep.subr.mxu1 %v5729_v0 }
 0x468   :  { %774 = vrot.lane.b32.xlu1 %v5816_v32, %s5739_s27 }
 0x4e4   :  { %v546_v8 = vpop.xlane.xlu1 %545 }
 0x4e5   :  { %5658 = vrcp.f32 %v546_v8 }
 0x4e8   :  { %v775_v13 = vpop.permute.xlu1 %774 }
 0x4ef   :  { %v5659_v9 = vpop.eup %5658 }
 0x529   :  { %v620_v10 = vpop.f32.mrb[6].mxu1 }
 0x52a   :  { %v625_v11 = vmul.f32 %v5659_v9, %v620_v10  ;;  %v5051_v12 = vpop.f32.mrb[7].mxu1 }
 0x52c   :  { %5055 = vmatmul.mubr.msk.f32.vlgmr.msra.gmra.mrb[2].mxu0 %vm291_vm2, %v625_v11 }
 0x52d   :  { %5063 = vmatpush3.xpose.msk.msra.mxu0 %vm291_vm2, %v775_v13  ;;  %v768_v14 = vpop.f32.mrb[8].mxu1  ;;  %5064 = vmatprep.mubr.msk.f32.mxu0 %vm5731_vm1, %v5729_v0 }
 0x52e   :  { %v5061_v15 = vpop.f32.mrb[9].mxu1  ;;  %5072 = vmatprep.subr.mxu0 %v5729_v0 }
 0x530   :  { %5065 = vmatmul.mubr.msk.f32.vlgmr.msra.gmra.mrb[4].mxu0 %vm291_vm2, %v773_v59 }
 0x531   :  { %5074 = vmatprep.mubr.msk.f32.mxu0 %vm5731_vm1, %v5729_v0  ;;  %5073 = vmatpush3.msra.mxu0 %v281_v33 }
 0x532   :  { %5082 = vmatprep.subr.mxu0 %v5729_v0 }
 0x5ff   :  { %v695_v16 = vpop.f32.mrb[2].mxu0 }
 0x600   :  { %v5892_v17 = vadd.f32 %v768_v14, %v695_v16  ;;  %v5056_v18 = vpop.f32.mrb[3].mxu0  ;;  %v283_v16 = vld [vmem:[%s5867_s26 + $0x20] sm:$0xff] }
 0x603   :  { %v846_v19 = vpop.f32.mrb[4].mxu0 }
 0x604   :  { %v850_v20 = vmul.f32 0.35355338, %v846_v19  ;;  %v5066_v21 = vpop.f32.mrb[5].mxu0 }
 0x606   :  { %v851_v22 = vadd.f32 %v850_v20, %v5838_v39 }
 0x608   :  { %v852_v23 = vsel %vm368_vm4, %v851_v22, -inf }
 0x609   :  { %853 = vmax.xlane.f32.xlu1 %v852_v23 }
 0x61a   :  { %1016 = vrot.lane.b32.xlu1 %v5816_v32, %s5740_s28 }
 0x696   :  { %v854_v24 = vpop.xlane.xlu1 %853 }
 0x697   :  { %v855_v26 = vsub.f32 %v851_v22, %v854_v24 }
 0x699   :  { %v856_v27 = vmul.f32 1.442695, %v855_v26 }
 0x69a   :  { %v1017_v29 = vpop.permute.xlu1 %1016 }
 0x69b   :  { %5660 = vpow2.f32 %v856_v27 }
 0x6a5   :  { %v5661_v28 = vpop.eup %5660 }
 0x6a6   :  { %5070 = vmatmul.mubr.msk.f32.vlgmr.msra.gmra.mrb[10].mxu1 %vm378_vm5, %v5661_v28  ;;  %v858_v30 = vsel %vm368_vm4, %v5661_v28, 0.0 }
 0x6a7   :  { %5078 = vmatpush3.xpose.msk.msra.mxu1 %vm291_vm2, %v1017_v29  ;;  %859 = vadd.xlane.f32.xlu0 %v858_v30 }
 0x6a8   :  { %5079 = vmatprep.mubr.msk.f32.mxu1 %vm5731_vm1, %v5729_v0  ;;  %5087 = vmatprep.subr.mxu1 %v5729_v0 }
 0x6aa   :  { %5080 = vmatmul.mubr.msk.f32.vlgmr.msra.gmra.mrb[12].mxu1 %vm291_vm2, %v1015_v31 }
 0x6ab   :  { %5089 = vmatprep.mubr.msk.f32.mxu1 %vm5731_vm1, %v5729_v0  ;;  %5088 = vmatpush3.msra.mxu1 %v282_v57 }
 0x6ac   :  { %5097 = vmatprep.subr.mxu1 %v5729_v0 }
 0x6bd   :  { %1103 = vrot.lane.b32.xlu0 %v5826_v37, %s5737_s22 }
 0x6c1   :  { %1256 = vrot.lane.b32.xlu0 %v5816_v32, %s5741_s29 }
 0x734   :  { %v860_v34 = vpop.xlane.xlu0 %859 }
 0x735   :  { %5662 = vrcp.f32 %v860_v34 }
 0x738   :  { %v1104_v41 = vpop.permute.xlu0 %1103 }
 0x73c   :  { %v1257_v53 = vpop.permute.xlu0 %1256 }
 0x73f   :  { %v5663_v35 = vpop.eup %5662 }
 0x779   :  { %v934_v36 = vpop.f32.mrb[10].mxu1 }
 0x77a   :  { %v939_v38 = vmul.f32 %v5663_v35, %v934_v36  ;;  %v5071_v40 = vpop.f32.mrb[11].mxu1 }
 0x77c   :  { %5075 = vmatmul.mubr.msk.f32.vlgmr.msra.gmra.mrb[6].mxu0 %vm291_vm2, %v939_v38 }
 0x77d   :  { %5083 = vmatpush3.msk.msra.mxu0 %vm382_vm3, %v1104_v41  ;;  %v1088_v42 = vpop.f32.mrb[12].mxu1  ;;  %5084 = vmatprep.mubr.msk.f32.mxu0 %vm5731_vm1, %v5729_v0 }
 0x77e   :  { %v1092_v43 = vmul.f32 0.35355338, %v1088_v42  ;;  %v5081_v44 = vpop.f32.mrb[13].mxu1  ;;  %5092 = vmatprep.subr.mxu0 %v5729_v0  ;;  %v284_v42 = vld [vmem:[%s5867_s26 + $0x28] sm:$0xff] }
 0x780   :  { %v1093_v45 = vadd.f32 %v1092_v43, %v5838_v39 }
 0x782   :  { %v1094_v46 = vsel %vm368_vm4, %v1093_v45, -inf }
 0x783   :  { %1095 = vmax.xlane.f32.xlu1 %v1094_v46 }
 0x794   :  { %1258 = vrot.lane.b32.xlu1 %v5816_v32, %s5742_s30 }
 0x810   :  { %v1096_v47 = vpop.xlane.xlu1 %1095 }
 0x811   :  { %v1097_v48 = vsub.f32 %v1093_v45, %v1096_v47 }
 0x813   :  { %v1098_v49 = vmul.f32 1.442695, %v1097_v48 }
 0x814   :  { %v1259_v51 = vpop.permute.xlu1 %1258 }
 0x815   :  { %5664 = vpow2.f32 %v1098_v49 }
 0x81f   :  { %v5665_v50 = vpop.eup %5664 }
 0x820   :  { %5085 = vmatmul.mubr.msk.f32.vlgmr.msra.gmra.mrb[8].mxu0 %vm378_vm5, %v5665_v50  ;;  %v1100_v52 = vsel %vm368_vm4, %v5665_v50, 0.0 }
 0x821   :  { %5093 = vmatpush3.xpose.msk.msra.mxu0 %vm291_vm2, %v1259_v51  ;;  %1101 = vadd.xlane.f32.xlu1 %v1100_v52 }
 0x822   :  { %5094 = vmatprep.mubr.msk.f32.mxu0 %vm5731_vm1, %v5729_v0  ;;  %5102 = vmatprep.subr.mxu0 %v5729_v0 }
 0x824   :  { %5095 = vmatmul.mubr.msk.f32.vlgmr.msra.gmra.mrb[10].mxu0 %vm291_vm2, %v1257_v53 }
 0x825   :  { %5104 = vmatprep.mubr.msk.f32.mxu0 %vm5731_vm1, %v5729_v0  ;;  %5103 = vmatpush3.msra.mxu0 %v283_v16  ;;  %v286_v16 = vld [vmem:[%s5867_s26 + $0x38] sm:$0xff] }
 0x826   :  { %5112 = vmatprep.subr.mxu0 %v5729_v0 }
 0x832   :  { %1500 = vrot.lane.b32.xlu1 %v5816_v32, %s5743_s1 }
 0x836   :  { %1498 = vrot.lane.b32.xlu1 %v5816_v32, %s5744_s2 }
 0x84f   :  { %v1009_v54 = vpop.f32.mrb[6].mxu0 }
 0x850   :  { %v1013_v55 = vadd.f32 %v1009_v54, %v5892_v17  ;;  %v5076_v56 = vpop.f32.mrb[7].mxu0 }
 0x8ae   :  { %v1102_v58 = vpop.xlane.xlu1 %1101 }
 0x8af   :  { %5666 = vrcp.f32 %v1102_v58 }
 0x8b2   :  { %v1501_v9 = vpop.permute.xlu1 %1500 }
 0x8b6   :  { %v1499_v12 = vpop.permute.xlu1 %1498 }
 0x8b9   :  { %v5667_v59 = vpop.eup %5666 }
 0x8f3   :  { %v1176_v60 = vpop.f32.mrb[8].mxu0 }
 0x8f4   :  { %v1181_v61 = vmul.f32 %v5667_v59, %v1176_v60  ;;  %v5086_v62 = vpop.f32.mrb[9].mxu0 }
 0x8f6   :  { %5090 = vmatmul.mubr.msk.f32.vlgmr.msra.gmra.mrb[14].mxu1 %vm291_vm2, %v1181_v61 }
 0x8f7   :  { %v1330_v63 = vpop.f32.mrb[10].mxu0  ;;  %5099 = vmatprep.mubr.msk.f32.mxu1 %vm5731_vm1, %v5729_v0 }
 0x8f8   :  { %v1334_v1 = vmul.f32 0.35355338, %v1330_v63  ;;  %v5096_v2 = vpop.f32.mrb[11].mxu0  ;;  %v285_v63 = vld [vmem:[%s5867_s26 + $0x30] sm:$0xff] }
 0x8fa   :  { %v1335_v3 = vadd.f32 %v1334_v1, %v5838_v39 }
 0x8fc   :  { %v1336_v4 = vsel %vm368_vm4, %v1335_v3, -inf }
 0x8fd   :  { %1337 = vmax.xlane.f32.xlu0 %v1336_v4 }
 0x913   :  { %1345 = vrot.lane.b32.xlu0 %v5826_v37, %s5741_s29 }
 0x98a   :  { %v1338_v5 = vpop.xlane.xlu0 %1337 }
 0x98b   :  { %v1339_v6 = vsub.f32 %v1335_v3, %v1338_v5 }
 0x98d   :  { %v1340_v7 = vmul.f32 1.442695, %v1339_v6 }
 0x98e   :  { %v1346_v8 = vpop.permute.xlu0 %1345 }
 0x98f   :  { %5668 = vpow2.f32 %v1340_v7  ;;  %5098 = vmatpush3.msk.msra.mxu1 %vm382_vm3, %v1346_v8 }
 0x990   :  { %5107 = vmatprep.subr.mxu1 %v5729_v0 }
 0x999   :  { %v5669_v10 = vpop.eup %5668 }
 0x99a   :  { %5100 = vmatmul.mubr.msk.f32.vlgmr.msra.gmra.mrb[16].mxu1 %vm378_vm5, %v5669_v10  ;;  %v1342_v11 = vsel %vm368_vm4, %v5669_v10, 0.0 }
 0x99b   :  { %5108 = vmatpush3.xpose.msk.msra.mxu1 %vm291_vm2, %v1501_v9  ;;  %1343 = vadd.xlane.f32.xlu0 %v1342_v11 }
 0x99c   :  { %5109 = vmatprep.mubr.msk.f32.mxu1 %vm5731_vm1, %v5729_v0  ;;  %5117 = vmatprep.subr.mxu1 %v5729_v0 }
 0x99e   :  { %5110 = vmatmul.mubr.msk.f32.vlgmr.msra.gmra.mrb[18].mxu1 %vm291_vm2, %v1499_v12 }
 0x99f   :  { %5119 = vmatprep.mubr.msk.f32.mxu1 %vm5731_vm1, %v5729_v0  ;;  %5118 = vmatpush3.msra.mxu1 %v284_v42 }
 0x9a0   :  { %5127 = vmatprep.subr.mxu1 %v5729_v0 }
 0x9b1   :  { %1587 = vrot.lane.b32.xlu0 %v5826_v37, %s5744_s2 }
 0x9b5   :  { %1740 = vrot.lane.b32.xlu0 %v5816_v32, %s5745_s3 }
 0x9c9   :  { %v1251_v13 = vpop.f32.mrb[14].mxu1 }
 0x9ca   :  { %v1255_v14 = vadd.f32 %v1251_v13, %v1013_v55  ;;  %v5091_v15 = vpop.f32.mrb[15].mxu1 }
 0xa28   :  { %v1344_v17 = vpop.xlane.xlu0 %1343 }
 0xa29   :  { %5670 = vrcp.f32 %v1344_v17 }
 0xa2c   :  { %v1588_v22 = vpop.permute.xlu0 %1587 }
 0xa30   :  { %v1741_v36 = vpop.permute.xlu0 %1740 }
 0xa33   :  { %v5671_v18 = vpop.eup %5670 }
 0xa6d   :  { %v1418_v19 = vpop.f32.mrb[16].mxu1 }
 0xa6e   :  { %v1423_v20 = vmul.f32 %v5671_v18, %v1418_v19  ;;  %v5101_v21 = vpop.f32.mrb[17].mxu1  ;;  %v128_v19 = vld [vmem:[%s4742_s9] sm:$0xff] }
 0xa6f   :  { %v133_v21 = vsel %vm132_vm0, %v128_v19, 0.0 }
 0xa70   :  { %5105 = vmatmul.mubr.msk.f32.vlgmr.msra.gmra.mrb[12].mxu0 %vm291_vm2, %v1423_v20  ;;  %v129_v20 = vld [vmem:[%s4742_s9 + $0x8] sm:$0xff] }
 0xa71   :  { %5113 = vmatpush3.msk.msra.mxu0 %vm382_vm3, %v1588_v22  ;;  %v1572_v23 = vpop.f32.mrb[18].mxu1  ;;  %5114 = vmatprep.mubr.msk.f32.mxu0 %vm5731_vm1, %v5729_v0  ;;  %v136_v22 = vsel %vm132_vm0, %v129_v20, 0.0 }
 0xa72   :  { %v1576_v24 = vmul.f32 0.35355338, %v1572_v23  ;;  %v5111_v26 = vpop.f32.mrb[19].mxu1  ;;  %5122 = vmatprep.subr.mxu0 %v5729_v0 }
 0xa74   :  { %v1577_v27 = vadd.f32 %v1576_v24, %v5838_v39 }
 0xa76   :  { %v1578_v28 = vsel %vm368_vm4, %v1577_v27, -inf }
 0xa77   :  { %1579 = vmax.xlane.f32.xlu1 %v1578_v28 }
 0xa88   :  { %1742 = vrot.lane.b32.xlu1 %v5816_v32, %s5746_s4 }
 0xb04   :  { %v1580_v29 = vpop.xlane.xlu1 %1579 }
 0xb05   :  { %v1581_v30 = vsub.f32 %v1577_v27, %v1580_v29 }
 0xb07   :  { %v1582_v31 = vmul.f32 1.442695, %v1581_v30 }
 0xb08   :  { %v1743_v34 = vpop.permute.xlu1 %1742 }
 0xb09   :  { %5672 = vpow2.f32 %v1582_v31 }
 0xb13   :  { %v5673_v33 = vpop.eup %5672 }
 0xb14   :  { %5115 = vmatmul.mubr.msk.f32.vlgmr.msra.gmra.mrb[14].mxu0 %vm378_vm5, %v5673_v33  ;;  %v1584_v35 = vsel %vm368_vm4, %v5673_v33, 0.0 }
 0xb15   :  { %5123 = vmatpush3.xpose.msk.msra.mxu0 %vm291_vm2, %v1743_v34  ;;  %1585 = vadd.xlane.f32.xlu1 %v1584_v35 }
 0xb16   :  { %5124 = vmatprep.mubr.msk.f32.mxu0 %vm5731_vm1, %v5729_v0  ;;  %5132 = vmatprep.subr.mxu0 %v5729_v0 }
 0xb18   :  { %5125 = vmatmul.mubr.msk.f32.vlgmr.msra.gmra.mrb[16].mxu0 %vm291_vm2, %v1741_v36 }
 0xb19   :  { %5134 = vmatprep.mubr.msk.f32.mxu0 %vm5731_vm1, %v5729_v0  ;;  %5133 = vmatpush3.msra.mxu0 %v285_v63 }
 0xb1a   :  { %5142 = vmatprep.subr.mxu0 %v5729_v0 }
 0xb26   :  { %1984 = vrot.lane.b32.xlu1 %v5816_v32, %s5738_s23 }
 0xb2a   :  { %1982 = vrot.lane.b32.xlu1 %v5816_v32, %s5747_s5 }
 0xb43   :  { %v1493_v38 = vpop.f32.mrb[12].mxu0 }
 0xb44   :  { %v1497_v40 = vadd.f32 %v1493_v38, %v1255_v14  ;;  %v5106_v41 = vpop.f32.mrb[13].mxu0 }
 0xba2   :  { %v1586_v43 = vpop.xlane.xlu1 %1585 }
 0xba3   :  { %5674 = vrcp.f32 %v1586_v43 }
 0xba6   :  { %v1985_v56 = vpop.permute.xlu1 %1984 }
 0xbaa   :  { %v1983_v59 = vpop.permute.xlu1 %1982 }
 0xbad   :  { %v5675_v44 = vpop.eup %5674 }
 0xbe7   :  { %v1660_v45 = vpop.f32.mrb[14].mxu0 }
 0xbe8   :  { %v1665_v46 = vmul.f32 %v5675_v44, %v1660_v45  ;;  %v5116_v47 = vpop.f32.mrb[15].mxu0 }
 0xbea   :  { %5120 = vmatmul.mubr.msk.f32.vlgmr.msra.gmra.mrb[20].mxu1 %vm291_vm2, %v1665_v46 }
 0xbeb   :  { %v1814_v48 = vpop.f32.mrb[16].mxu0  ;;  %5129 = vmatprep.mubr.msk.f32.mxu1 %vm5731_vm1, %v5729_v0 }
 0xbec   :  { %v1818_v32 = vmul.f32 0.35355338, %v1814_v48  ;;  %v5126_v49 = vpop.f32.mrb[17].mxu0 }
 0xbed   :  { %v2352_v49 = vld [vmem:[%s4755_s20 + $0x8] sm:$0xff] }
 0xbee   :  { %v1819_v50 = vadd.f32 %v1818_v32, %v5838_v39  ;;  %v2351_v32 = vld [vmem:[%s4755_s20] sm:$0xff] }
 0xbf0   :  { %v1820_v51 = vsel %vm368_vm4, %v1819_v50, -inf }
 0xbf1   :  { %1821 = vmax.xlane.f32.xlu0 %v1820_v51  ;;  %v5424_v51 = vpack.c.bf16 %v2352_v49, %v2351_v32 }
 0xc07   :  { %1829 = vrot.lane.b32.xlu0 %v5826_v37, %s5745_s3 }
 0xc7e   :  { %v1822_v52 = vpop.xlane.xlu0 %1821 }
 0xc7f   :  { %v1823_v53 = vsub.f32 %v1819_v50, %v1822_v52  ;;  %v2353_v50 = vld [vmem:[%s4755_s20 + $0x10] sm:$0xff]  ;;  %v2354_v52 = vld [vmem:[%s4755_s20 + $0x18] sm:$0xff] }
 0xc81   :  { %v1824_v54 = vmul.f32 1.442695, %v1823_v53  ;;  %v5428_v53 = vpack.c.bf16 %v2354_v52, %v2353_v50 }
 0xc82   :  { %v1830_v55 = vpop.permute.xlu0 %1829 }
 0xc83   :  { %5676 = vpow2.f32 %v1824_v54  ;;  %5128 = vmatpush3.msk.msra.mxu1 %vm382_vm3, %v1830_v55  ;;  %v2355_v54 = vld [vmem:[%s4755_s20 + $0x20] sm:$0xff] }
 0xc84   :  { %5137 = vmatprep.subr.mxu1 %v5729_v0 }
 0xc8d   :  { %v5677_v57 = vpop.eup %5676 }
 0xc8e   :  { %5130 = vmatmul.mubr.msk.f32.vlgmr.msra.gmra.mrb[22].mxu1 %vm378_vm5, %v5677_v57  ;;  %v1826_v58 = vsel %vm368_vm4, %v5677_v57, 0.0  ;;  %v2358_v57 = vld [vmem:[%s4755_s20 + $0x38] sm:$0xff] }
 0xc8f   :  { %5138 = vmatpush3.xpose.msk.msra.mxu1 %vm291_vm2, %v1985_v56  ;;  %1827 = vadd.xlane.f32.xlu0 %v1826_v58  ;;  %v2357_v56 = vld [vmem:[%s4755_s20 + $0x30] sm:$0xff] }
 0xc90   :  { %5139 = vmatprep.mubr.msk.f32.mxu1 %vm5731_vm1, %v5729_v0  ;;  %5147 = vmatprep.subr.mxu1 %v5729_v0  ;;  %v5436_v58 = vpack.c.bf16 %v2358_v57, %v2357_v56 }
 0xc92   :  { %5140 = vmatmul.mubr.msk.f32.vlgmr.msra.gmra.mrb[24].mxu1 %vm291_vm2, %v1983_v59 }
 0xc93   :  { %5149 = vmatprep.mubr.msk.f32.mxu1 %vm5731_vm1, %v5729_v0  ;;  %5148 = vmatpush3.msra.mxu1 %v286_v16  ;;  %v2263_v16 = vld [vmem:[%s4753_s17] sm:$0xff] }
 0xc94   :  { %5425 = vmatprep.subr.bf16.mxu1 %v5424_v51 }
 0xca5   :  { %2071 = vrot.lane.b32.xlu0 %v5826_v37, %s5747_s5 }
 0xcbd   :  { %v1735_v60 = vpop.f32.mrb[20].mxu1 }
 0xcbe   :  { %v1739_v61 = vadd.f32 %v1735_v60, %v1497_v40  ;;  %v5121_v62 = vpop.f32.mrb[21].mxu1  ;;  %v4815_v40 = vld [vmem:[%s4750_s13] ss:$0 sm:$0xff] }
 0xd1c   :  { %v1828_v1 = vpop.xlane.xlu0 %1827 }
 0xd1d   :  { %5678 = vrcp.f32 %v1828_v1 }
 0xd20   :  { %v2072_v6 = vpop.permute.xlu0 %2071 }
 0xd27   :  { %v5679_v2 = vpop.eup %5678 }
 0xd61   :  { %v1902_v3 = vpop.f32.mrb[22].mxu1 }
 0xd62   :  { %v1907_v4 = vmul.f32 %v5679_v2, %v1902_v3  ;;  %v5131_v5 = vpop.f32.mrb[23].mxu1 }
 0xd64   :  { %5135 = vmatmul.mubr.msk.f32.vlgmr.msra.gmra.mrb[18].mxu0 %vm291_vm2, %v1907_v4 }
 0xd65   :  { %5143 = vmatpush3.msk.msra.mxu0 %vm382_vm3, %v2072_v6  ;;  %v2056_v7 = vpop.f32.mrb[24].mxu1  ;;  %5144 = vmatprep.mubr.msk.f32.mxu0 %vm5731_vm1, %v5729_v0 }
 0xd66   :  { %v2060_v37 = vmul.f32 0.35355338, %v2056_v7  ;;  %v5141_v8 = vpop.f32.mrb[25].mxu1 }
 0xd67   :  { %v4772_v8 = vld [vmem:[%s4745_s6] ss:$0 sm:$0xff]  ;;  %s5763_s6 = smov 18  }
 0xd68   :  { %v2061_v9 = vadd.f32 %v2060_v37, %v5838_v39  ;;  %s4759_s9 = sld [smem:[%s6370_s0 + %s5763_s6]]  }
 0xd6a   :  { %v2062_v10 = vsel %vm368_vm4, %v2061_v9, -inf }
 0xd6b   :  { %2063 = vmax.xlane.f32.xlu1 %v2062_v10 }
 0xdf8   :  { %v2064_v11 = vpop.xlane.xlu1 %2063 }
 0xdf9   :  { %v2065_v12 = vsub.f32 %v2061_v9, %v2064_v11 }
 0xdfb   :  { %v2066_v13 = vmul.f32 1.442695, %v2065_v12  ;;  %v4773_v12 = vld [vmem:[%s4746_s10] ss:$0 sm:$0xff]  ;;  %s5764_s10 = smov 19  }
 0xdfc   :  { %s4760_s13 = sld [smem:[%s6370_s0 + %s5764_s10]]  }
 0xdfd   :  { %5680 = vpow2.f32 %v2066_v13 }
 0xe07   :  { %v5681_v14 = vpop.eup %5680 }
 0xe08   :  { %5145 = vmatmul.mubr.msk.f32.vlgmr.msra.gmra.mrb[20].mxu0 %vm378_vm5, %v5681_v14  ;;  %v2068_v15 = vsel %vm368_vm4, %v5681_v14, 0.0 }
 0xe09   :  { %2069 = vadd.xlane.f32.xlu1 %v2068_v15  ;;  %5168 = vmatprep.mubr.msk.f32.mxu0 %vm5731_vm1, %v5729_v0 }
 0xe0d   :  { %134 = vadd.xlane.f32.xlu1 %v133_v21 }
 0xe11   :  { %137 = vadd.xlane.f32.xlu1 %v136_v22  ;;  %v2267_v22 = vld [vmem:[%s4753_s17 + $0x20] sm:$0xff] }
 0xe37   :  { %v1977_v17 = vpop.f32.mrb[18].mxu0 }
 0xe38   :  { %v1981_v39 = vadd.f32 %v1977_v17, %v1739_v61  ;;  %v5136_v18 = vpop.f32.mrb[19].mxu0  ;;  %v2264_v17 = vld [vmem:[%s4753_s17 + $0x8] sm:$0xff] }
 0xe39   :  { %v5754_v18 = vmov 0.0|0.0  }
 0xe3a   :  { %5412 = vmatprep.subr.bf16.mxu0 %v5754_v18 }
 0xe96   :  { %v2070_v23 = vpop.xlane.xlu1 %2069 }
 0xe97   :  { %5682 = vrcp.f32 %v2070_v23  ;;  %v2268_v23 = vld [vmem:[%s4753_s17 + $0x28] sm:$0xff] }
 0xe9a   :  { %v135_v29 = vpop.xlane.xlu1 %134 }
 0xe9b   :  { %v140_v36 = vmul.f32 0.015625, %v135_v29 }
 0xe9d   :  { %v142_v41 = vsub.f32 %v128_v19, %v140_v36  ;;  %v2265_v19 = vld [vmem:[%s4753_s17 + $0x10] sm:$0xff]  ;;  %v4817_v36 = vld [vmem:[%s4752_s7] ss:$0 sm:$0xff]  ;;  %s5770_s7 = smov 27  }
 0xe9e   :  { %v138_v30 = vpop.xlane.xlu1 %137  ;;  %s4768_s10 = sld [smem:[%s6370_s0 + %s5770_s7]]  }
 0xe9f   :  { %v141_v31 = vmul.f32 0.015625, %v138_v30  ;;  %v144_v46 = vmul.f32 %v142_v41, %v142_v41 }
 0xea1   :  { %v5683_v24 = vpop.eup %5682  ;;  %v143_v33 = vsub.f32 %v129_v20, %v141_v31  ;;  %v146_v48 = vsel %vm132_vm0, %v144_v46, 0.0  ;;  %v2266_v20 = vld [vmem:[%s4753_s17 + $0x18] sm:$0xff] }
 0xea2   :  { %v5416_v21 = vpack.c.bf16 %v2266_v20, %v2265_v19 }
 0xea3   :  { %v145_v34 = vmul.f32 %v143_v33, %v143_v33 }
 0xea5   :  { %v149_v35 = vsel %vm132_vm0, %v145_v34, 0.0  ;;  %v4816_v34 = vld [vmem:[%s4751_s24] ss:$0 sm:$0xff]  ;;  %s6131_s24 = sld [smem:[%s6370_s0 + %s5746_s4]]  }
 0xea6   :  { %150 = vadd.xlane.f32.xlu0 %v149_v35 }
 0xedb   :  { %v2144_v26 = vpop.f32.mrb[20].mxu0 }
 0xedc   :  { %v2149_v27 = vmul.f32 %v5683_v24, %v2144_v26  ;;  %v5146_v28 = vpop.f32.mrb[21].mxu0  ;;  %v5419_v24 = vpack.c.bf16 %v2268_v23, %v2267_v22  ;;  %v2269_v26 = vld [vmem:[%s4753_s17 + $0x30] sm:$0xff] }
 0xede   :  { %5150 = vmatmul.mubr.msk.f32.vlgmr.msra.gmra.mrb[26].mxu1 %vm291_vm2, %v2149_v27  ;;  %v2270_v27 = vld [vmem:[%s4753_s17 + $0x38] sm:$0xff]  ;;  %s5765_s17 = smov 21  }
 0xedf   :  { %5427 = vmatpush3.bf16.msra.mxu1 %v5424_v51  ;;  %v5422_v28 = vpack.c.bf16 %v2270_v27, %v2269_v26  ;;  %v4818_v51 = vld [vmem:[%s4754_s18] ss:$0 sm:$0xff]  ;;  %s5772_s18 = smov 30  }
 0xee0   :  { %5429 = vmatprep.subr.bf16.mxu1 %v5428_v53 }
 0xee3   :  { %5431 = vmatpush3.bf16.msra.mxu1 %v5428_v53 }
 0xf33   :  { %v151_v59 = vpop.xlane.xlu0 %150 }
 0xf34   :  { %v153_v60 = vmul.f32 0.015625, %v151_v59 }
 0xf36   :  { %v155_v61 = vadd.f32 1e-05, %v153_v60 }
 0xf38   :  { %5684 = vrsqrt.f32 %v155_v61 }
 0xf42   :  { %v5685_v7 = vpop.eup %5684 }
 0xf43   :  { %v159_v37 = vmul.f32 %v5685_v7, %v143_v33 }
 0xf45   :  { %v167_v11 = vmul.f32 %v4772_v8, %v159_v37 }
 0xf47   :  { %v175_v15 = vadd.f32 %v4773_v12, %v167_v11 }
 0xfb1   :  { %v2219_v38 = vpop.f32.mrb[26].mxu1 }
 0xfb2   :  { %v2223_v42 = vadd.f32 %v2219_v38, %v1981_v39  ;;  %v5151_v43 = vpop.f32.mrb[27].mxu1  ;;  %v5413_v39 = vpack.c.bf16 %v2264_v17, %v2263_v16 }
 0xfb4   :  { %v2231_v44 = vadd.f32 %v4815_v40, %v2223_v42  ;;  %5414 = vmatpush3.bf16.msra.mxu0 %v5413_v39  ;;  %v2448_v39 = vld [vmem:[%s6131_s24 + $0x8] sm:$0xff] }
 0xfb5   :  { %5415 = vmatprep.subr.bf16.mxu0 %v5754_v18 }
 0xfb6   :  { %v2232_v45 = vadd.f32 %v2231_v44, %v5804_v25  ;;  %v2356_v25 = vld [vmem:[%s4755_s20 + $0x28] sm:$0xff] }
 0xfb7   :  { %v5432_v55 = vpack.c.bf16 %v2356_v25, %v2355_v54 }
 0xfb8   :  { %v2236_v47 = vsel %vm2235_vm6, %v2232_v45, 0.0  ;;  %5417 = vmatpush3.bf16.msra.mxu0 %v5416_v21 }
 0xfb9   :  { %2237 = vadd.xlane.f32.xlu1 %v2236_v47  ;;  %5433 = vmatprep.subr.bf16.mxu1 %v5432_v55 }
 0xfba   :  { %5435 = vmatpush3.bf16.msra.mxu1 %v5432_v55  ;;  %5418 = vmatprep.subr.bf16.mxu0 %v5754_v18 }
 0xfbb   :  { %5437 = vmatprep.subr.bf16.mxu1 %v5436_v58 }
 0xfbc   :  { %5420 = vmatpush3.bf16.msra.mxu0 %v5419_v24 }
 0xfbd   :  { %147 = vadd.xlane.f32.xlu1 %v146_v48  ;;  %5421 = vmatprep.subr.bf16.mxu0 %v5754_v18 }
 0xfbe   :  { %5439 = vmatpush3.bf16.msra.mxu1 %v5436_v58 }
 0xfbf   :  { %5444 = vmatprep.subr.bf16.mxu1 %v5754_v18 }
 0xfc0   :  { %5423 = vmatpush3.bf16.msra.mxu0 %v5422_v28 }
 0xfc1   :  { %5440 = vmatprep.subr.bf16.mxu0 %v5754_v18 }
0x1046   :  { %v2238_v62 = vpop.xlane.xlu1 %2237 }
0x1047   :  { %v2239_v63 = vmul.f32 0.015625, %v2238_v62 }
0x1049   :  { %v2240_v1 = vsub.f32 %v2232_v45, %v2239_v63 }
0x104a   :  { %v148_v2 = vpop.xlane.xlu1 %147 }
0x104b   :  { %v152_v3 = vmul.f32 0.015625, %v148_v2  ;;  %v2241_v4 = vmul.f32 %v2240_v1, %v2240_v1 }
0x104d   :  { %v154_v5 = vadd.f32 1e-05, %v152_v3  ;;  %v2242_v6 = vsel %vm2235_vm6, %v2241_v4, 0.0 }
0x104e   :  { %2243 = vadd.xlane.f32.xlu1 %v2242_v6 }
0x104f   :  { %5686 = vrsqrt.f32 %v154_v5 }
0x1059   :  { %v5687_v9 = vpop.eup %5686 }
0x105a   :  { %v158_v10 = vmul.f32 %v5687_v9, %v142_v41  ;;  %v4820_v41 = vld [vmem:[%s4756_s11] ss:$0 sm:$0xff]  ;;  %s5771_s11 = smov 28  }
0x105c   :  { %v166_v13 = vmul.f32 %v4772_v8, %v158_v10 }
0x105e   :  { %v174_v14 = vadd.f32 %v4773_v12, %v166_v13 }
0x1060   :  { %5187 = vmatprep.mubr.msk.f32.mxu1 %vm132_vm0, %v174_v14 }
0x1061   :  { %5188 = vmatmul.mubr.msk.f32.vlgmr.msra.gmra.mrb[28].mxu1 %vm132_vm0, %v175_v15 }
0x1062   :  { %5201 = vmatprep.mubr.msk.f32.mxu1 %vm5731_vm1, %v5729_v0 }
0x10db   :  { %v2244_v29 = vpop.xlane.xlu1 %2243 }
0x10dc   :  { %v2245_v30 = vmul.f32 0.015625, %v2244_v29 }
0x10de   :  { %v2246_v31 = vadd.f32 1e-05, %v2245_v30 }
0x10e0   :  { %5688 = vrsqrt.f32 %v2246_v31 }
0x10ea   :  { %v5689_v33 = vpop.eup %5688 }
0x10eb   :  { %v2248_v35 = vmul.f32 %v5689_v33, %v2240_v1 }
0x10ed   :  { %v2255_v38 = vmul.f32 %v4816_v34, %v2248_v35 }
0x10ef   :  { %v6061_v40 = vadd.f32 %v4817_v36, %v2255_v38 }
0x10f1   :  { %5169 = vmatmul.mubr.msk.f32.vlgmr.msra.gmra.mrb[22].mxu0 %vm132_vm0, %v6061_v40 }
0x10f2   :  { %5194 = vmatprep.mubr.msk.f32.mxu0 %vm5731_vm1, %v5729_v0 }
0x1134   :  { %v5189_v42 = vpop.f32.mrb[28].mxu1 }
0x1135   :  { %v2444_v43 = vadd.f32 %v5189_v42, %v4820_v41  ;;  %v2438_v44 = vpop.f32.mrb[29].mxu1  ;;  %v2447_v42 = vld [vmem:[%s6131_s24] sm:$0xff] }
0x1136   :  { %v2439_v45 = vadd.f32 %v4820_v41, %v2438_v44 }
0x1138   :  { %v6070_v46 = vpack.i.bf16 %v2444_v43, %v2439_v45  ;;  %v5441_v47 = vpack.c.bf16 %v2444_v43, %v2439_v45 }
0x113a   :  { %5583 = vrot.lane.b32.xlu0 %v6070_v46, %s5732_s14  ;;  %5578 = vrot.lane.b32.xlu1 %v6070_v46, %s5734_s16  ;;  %s5759_s14 = smov 3  }
0x113b   :  { %5443 = vmatpush3.bf16.xpose.msk.msra.mxu0 %vm6074_vm7, %v5441_v47  ;;  %s4744_s20 = sld [smem:[%s6370_s0 + %s5759_s14]]  }
0x113c   :  { %5447 = vmatprep.subr.bf16.mxu0 %v5754_v18 }
0x1141   :  { %v6106_v2 = vld [vmem:[%s4744_s20] sm:$0x3f] }
0x11ac   :  { %v5579_v32 = vpop.permute.xlu1 %5578  ;;  %v5584_v55 = vpop.permute.xlu0 %5583 }
0x11ad   :  { %v5581_v49 = vunpack.i.h.bf16 %v5579_v32  ;;  %v5580_v50 = vunpack.i.l.bf16 %v5579_v32  ;;  %v5586_v56 = vunpack.i.h.bf16 %v5584_v55  ;;  %v5585_v57 = vunpack.i.l.bf16 %v5584_v55 }
0x11af   :  { %v5448_v25 = vpack.c.bf16 %v5581_v49, %v5580_v50  ;;  %v5452_v58 = vpack.c.bf16 %v5586_v56, %v5585_v57 }
0x11c4   :  { %v2347_v52 = vpop.f32.mrb[22].mxu0 }
0x11c5   :  { %v6088_v53 = vadd.f32 %v4818_v51, %v2347_v52  ;;  %v5170_v54 = vpop.f32.mrb[23].mxu0 }
0x11c7   :  { %2629 = vrot.lane.b32.xlu1 %v6088_v53, %s5734_s16  ;;  %5195 = vmatmul.mubr.msk.f32.vlgmr.msra.gmra.mrb[24].mxu0 %vm291_vm2, %v6088_v53  ;;  %s4762_s16 = sld [smem:[%s6370_s0 + %s5765_s17]]  }
0x11c8   :  { %5450 = vmatpush3.bf16.xpose.msk.msra.mxu0 %vm6074_vm7, %v5448_v25  ;;  %5208 = vmatprep.mubr.msk.f32.mxu0 %vm5731_vm1, %v5729_v0  ;;  %s4769_s17 = sld [smem:[%s6370_s0 + %s5771_s11]]  }
0x11c9   :  { %5451 = vmatprep.subr.bf16.mxu0 %v5754_v18 }
0x1239   :  { %v2630_v59 = vpop.permute.xlu1 %2629 }
0x123a   :  { %5209 = vmatmul.mubr.msk.f32.vlgmr.msra.gmra.mrb[26].mxu0 %vm291_vm2, %v2630_v59 }
0x123b   :  { %5453 = vmatpush3.bf16.msra.mxu0 %v5452_v58  ;;  %5215 = vmatprep.mubr.msk.f32.mxu0 %vm5731_vm1, %v5729_v0 }
0x123c   :  { %5218 = vmatprep.subr.mxu0 %v5729_v0 }
0x129a   :  { %v2531_v60 = vpop.f32.mrb[24].mxu0 }
0x129b   :  { %v5196_v61 = vpop.f32.mrb[25].mxu0  ;;  %v2535_v9 = vmul.f32 0.35355338, %v2531_v60 }
0x129d   :  { %v2536_v16 = vadd.f32 %v2535_v9, %v6106_v2 }
0x129f   :  { %v2538_v17 = vsel %vm2537_vm8, %v2536_v16, -inf }
0x130d   :  { %v2707_v62 = vpop.f32.mrb[26].mxu0 }
0x130e   :  { %v2711_v63 = vmul.f32 0.35355338, %v2707_v62  ;;  %v5210_v1 = vpop.f32.mrb[27].mxu0 }
0x1310   :  { %v2712_v3 = vadd.f32 %v2711_v63, %v6106_v2 }
0x1312   :  { %v2713_v4 = vsel %vm2537_vm8, %v2712_v3, -inf }
0x1313   :  { %2714 = vmax.xlane.f32.xlu1 %v2713_v4 }
0x1324   :  { %5588 = vrot.lane.b32.xlu1 %v6070_v46, %s5736_s21 }
0x1328   :  { %2949 = vrot.lane.b32.xlu1 %v6088_v53, %s5736_s21  ;;  %s4764_s21 = sld [smem:[%s6370_s0 + %s5766_s19]]  }
0x1329   :  { %s4771_s19 = sld [smem:[%s6370_s0 + %s5772_s18]]  }
0x132c   :  { %5593 = vrot.lane.b32.xlu1 %v6070_v46, %s5733_s15 }
0x1330   :  { %3197 = vrot.lane.b32.xlu1 %v6088_v53, %s5737_s22 }
0x13a0   :  { %v2715_v5 = vpop.xlane.xlu1 %2714 }
0x13a1   :  { %v2716_v6 = vsub.f32 %v2712_v3, %v2715_v5 }
0x13a3   :  { %v2717_v7 = vmul.f32 1.442695, %v2716_v6 }
0x13a4   :  { %v5589_v37 = vpop.permute.xlu1 %5588 }
0x13a5   :  { %5690 = vpow2.f32 %v2717_v7  ;;  %v5591_v26 = vunpack.i.h.bf16 %v5589_v37  ;;  %v5590_v27 = vunpack.i.l.bf16 %v5589_v37 }
0x13a7   :  { %v5455_v33 = vpack.c.bf16 %v5591_v26, %v5590_v27 }
0x13a8   :  { %v2950_v8 = vpop.permute.xlu1 %2949 }
0x13ac   :  { %v5594_v10 = vpop.permute.xlu1 %5593 }
0x13ad   :  { %v5596_v11 = vunpack.i.h.bf16 %v5594_v10  ;;  %v5595_v12 = vunpack.i.l.bf16 %v5594_v10 }
0x13af   :  { %v5691_v13 = vpop.eup %5690  ;;  %v5445_v14 = vpack.c.bf16 %v5596_v11, %v5595_v12 }
0x13b0   :  { %5216 = vmatmul.mubr.msk.f32.vlgmr.msra.gmra.mrb[28].mxu0 %vm2553_vm9, %v5691_v13  ;;  %v2719_v15 = vsel %vm2537_vm8, %v5691_v13, 0.0  ;;  %v3198_v41 = vpop.permute.xlu1 %3197 }
0x13b1   :  { %2720 = vadd.xlane.f32.xlu0 %v2719_v15  ;;  %5446 = vmatpush3.bf16.msra.mxu1 %v5445_v14 }
0x13b2   :  { %5220 = vmatprep.mubr.msk.f32.mxu0 %vm5731_vm1, %v5729_v0  ;;  %5223 = vmatprep.subr.mxu1 %v5729_v0 }
0x13b3   :  { %5219 = vmatpush3.msra.mxu0 %v2448_v39 }
0x13b4   :  { %5454 = vmatprep.subr.bf16.mxu0 %v5754_v18 }
0x13b5   :  { %2539 = vmax.xlane.f32.xlu0 %v2538_v17 }
0x13cb   :  { %5598 = vrot.lane.b32.xlu0 %v6070_v46, %s5737_s22  ;;  %s5760_s22 = smov 17  }
0x143e   :  { %v2721_v19 = vpop.xlane.xlu0 %2720 }
0x1442   :  { %v2540_v20 = vpop.xlane.xlu0 %2539 }
0x1443   :  { %v2541_v21 = vsub.f32 %v2536_v16, %v2540_v20 }
0x1445   :  { %v2542_v22 = vmul.f32 1.442695, %v2541_v21 }
0x1446   :  { %v5599_v34 = vpop.permute.xlu0 %5598 }
0x1447   :  { %5692 = vpow2.f32 %v2542_v22  ;;  %v5601_v35 = vunpack.i.h.bf16 %v5599_v34  ;;  %v5600_v36 = vunpack.i.l.bf16 %v5599_v34 }
0x1448   :  { %5694 = vrcp.f32 %v2721_v19 }
0x1449   :  { %v5462_v38 = vpack.c.bf16 %v5601_v35, %v5600_v36 }
0x1451   :  { %v5693_v23 = vpop.eup %5692 }
0x1452   :  { %5202 = vmatmul.mubr.msk.f32.vlgmr.msra.gmra.mrb[30].mxu1 %vm2553_vm9, %v5693_v23  ;;  %v2544_v24 = vsel %vm2537_vm8, %v5693_v23, 0.0  ;;  %v5695_v28 = vpop.eup %5694 }
0x1453   :  { %2545 = vadd.xlane.f32.xlu1 %v2544_v24  ;;  %5225 = vmatprep.mubr.msk.f32.mxu1 %vm5731_vm1, %v5729_v0  ;;  %v2449_v24 = vld [vmem:[%s6131_s24 + $0x10] sm:$0xff] }
0x1454   :  { %5224 = vmatpush3.msra.mxu1 %v2447_v42 }
0x1455   :  { %5458 = vmatprep.subr.bf16.mxu1 %v5754_v18 }
0x1464   :  { %5603 = vrot.lane.b32.xlu1 %v6070_v46, %s5739_s27  ;;  %s5767_s27 = smov 25  }
0x1468   :  { %3445 = vrot.lane.b32.xlu1 %v6088_v53, %s5741_s29 }
0x1483   :  { %v2797_v29 = vpop.f32.mrb[28].mxu0 }
0x1484   :  { %v2802_v30 = vmul.f32 %v5695_v28, %v2797_v29  ;;  %v5217_v31 = vpop.f32.mrb[29].mxu0 }
0x1486   :  { %5221 = vmatmul.mubr.msk.f32.vlgmr.msra.gmra.mrb[30].mxu0 %vm291_vm2, %v2802_v30 }
0x1487   :  { %5457 = vmatpush3.bf16.xpose.msk.msra.mxu0 %vm6074_vm7, %v5455_v33  ;;  %5232 = vmatprep.mubr.msk.f32.mxu0 %vm5731_vm1, %v5729_v0 }
0x1488   :  { %5461 = vmatprep.subr.bf16.mxu0 %v5754_v18 }
0x148e   :  { %5233 = vmatmul.mubr.msk.f32.vlgmr.msra.gmra.mrb[32].mxu0 %vm291_vm2, %v2950_v8 }
0x148f   :  { %5464 = vmatpush3.bf16.xpose.msk.msra.mxu0 %vm6074_vm7, %v5462_v38  ;;  %5251 = vmatprep.mubr.msk.f32.mxu0 %vm5731_vm1, %v5729_v0 }
0x1490   :  { %5468 = vmatprep.subr.bf16.mxu0 %v5754_v18 }
0x1496   :  { %5252 = vmatmul.mubr.msk.f32.vlgmr.msra.gmra.mrb[34].mxu0 %vm291_vm2, %v3198_v41 }
0x1497   :  { %5270 = vmatprep.mubr.msk.f32.mxu0 %vm5731_vm1, %v5729_v0 }
0x14e0   :  { %v2546_v43 = vpop.xlane.xlu1 %2545 }
0x14e1   :  { %5696 = vrcp.f32 %v2546_v43 }
0x14e4   :  { %v5604_v44 = vpop.permute.xlu1 %5603 }
0x14e5   :  { %v5606_v45 = vunpack.i.h.bf16 %v5604_v44  ;;  %v5605_v47 = vunpack.i.l.bf16 %v5604_v44 }
0x14e7   :  { %v5459_v52 = vpack.c.bf16 %v5606_v45, %v5605_v47  ;;  %v2450_v45 = vld [vmem:[%s6131_s24 + $0x18] sm:$0xff] }
0x14e8   :  { %v3446_v13 = vpop.permute.xlu1 %3445 }
0x14eb   :  { %v5697_v32 = vpop.eup %5696 }
0x1525   :  { %v2623_v49 = vpop.f32.mrb[30].mxu1 }
0x1526   :  { %v2628_v50 = vmul.f32 %v5697_v32, %v2623_v49  ;;  %v5203_v51 = vpop.f32.mrb[31].mxu1 }
0x1528   :  { %5226 = vmatmul.mubr.msk.f32.vlgmr.msra.gmra.mrb[32].mxu1 %vm291_vm2, %v2628_v50 }
0x1529   :  { %5460 = vmatpush3.bf16.msra.mxu1 %v5459_v52  ;;  %5239 = vmatprep.mubr.msk.f32.mxu1 %vm5731_vm1, %v5729_v0 }
0x152a   :  { %5242 = vmatprep.subr.mxu1 %v5729_v0 }
0x1559   :  { %v2872_v54 = vpop.f32.mrb[30].mxu0 }
0x155a   :  { %v5222_v25 = vpop.f32.mrb[31].mxu0 }
0x1561   :  { %v3027_v55 = vpop.f32.mrb[32].mxu0 }
0x1562   :  { %v3031_v56 = vmul.f32 0.35355338, %v3027_v55  ;;  %v5234_v57 = vpop.f32.mrb[33].mxu0 }
0x1564   :  { %v3032_v58 = vadd.f32 %v3031_v56, %v6106_v2 }
0x1566   :  { %v3033_v59 = vsel %vm2537_vm8, %v3032_v58, -inf }
0x1567   :  { %3034 = vmax.xlane.f32.xlu0 %v3033_v59 }
0x1569   :  { %v3275_v60 = vpop.f32.mrb[34].mxu0 }
0x156a   :  { %v5253_v61 = vpop.f32.mrb[35].mxu0  ;;  %v3279_v62 = vmul.f32 0.35355338, %v3275_v60 }
0x156c   :  { %v3280_v63 = vadd.f32 %v3279_v62, %v6106_v2 }
0x156e   :  { %v3281_v1 = vsel %vm2537_vm8, %v3280_v63, -inf }
0x157d   :  { %5608 = vrot.lane.b32.xlu0 %v6070_v46, %s5741_s29  ;;  %s5761_s29 = smov 20  }
0x159c   :  { %3282 = vmax.xlane.f32.xlu0 %v3281_v1 }
0x15b2   :  { %5618 = vrot.lane.b32.xlu0 %v6070_v46, %s5744_s2 }
0x15f4   :  { %v3035_v3 = vpop.xlane.xlu0 %3034 }
0x15f5   :  { %v3036_v4 = vsub.f32 %v3032_v58, %v3035_v3 }
0x15f7   :  { %v3037_v5 = vmul.f32 1.442695, %v3036_v4 }
0x15f8   :  { %v5609_v6 = vpop.permute.xlu0 %5608 }
0x15f9   :  { %5698 = vpow2.f32 %v3037_v5  ;;  %v5611_v7 = vunpack.i.h.bf16 %v5609_v6  ;;  %v5610_v37 = vunpack.i.l.bf16 %v5609_v6 }
0x15fb   :  { %v5469_v8 = vpack.c.bf16 %v5611_v7, %v5610_v37  ;;  %v2945_v9 = vpop.f32.mrb[32].mxu1 }
0x15fc   :  { %v6172_v10 = vadd.f32 %v2945_v9, %v2872_v54  ;;  %v5227_v11 = vpop.f32.mrb[33].mxu1 }
0x15fd   :  { %5471 = vmatpush3.bf16.xpose.msk.msra.mxu0 %vm6074_vm7, %v5469_v8 }
0x15fe   :  { %5475 = vmatprep.subr.bf16.mxu0 %v5754_v18 }
0x1603   :  { %v5699_v12 = vpop.eup %5698 }
0x1604   :  { %5240 = vmatmul.mubr.msk.f32.vlgmr.msra.gmra.mrb[34].mxu1 %vm2553_vm9, %v5699_v12  ;;  %5271 = vmatmul.mubr.msk.f32.vlgmr.msra.gmra.mrb[36].mxu0 %vm291_vm2, %v3446_v13  ;;  %v3039_v14 = vsel %vm2537_vm8, %v5699_v12, 0.0 }
0x1605   :  { %3040 = vadd.xlane.f32.xlu1 %v3039_v14  ;;  %5289 = vmatprep.mubr.msk.f32.mxu0 %vm5731_vm1, %v5729_v0  ;;  %v2451_v14 = vld [vmem:[%s6131_s24 + $0x20] sm:$0xff] }
0x1606   :  { %5244 = vmatprep.mubr.msk.f32.mxu1 %vm5731_vm1, %v5729_v0  ;;  %5243 = vmatpush3.msra.mxu1 %v2449_v24 }
0x1607   :  { %5465 = vmatprep.subr.bf16.mxu1 %v5754_v18 }
0x1616   :  { %5613 = vrot.lane.b32.xlu1 %v6070_v46, %s5740_s28  ;;  %s4758_s28 = sld [smem:[%s6370_s0 + %s5760_s22]]  }
0x161a   :  { %3693 = vrot.lane.b32.xlu1 %v6088_v53, %s5744_s2 }
0x1629   :  { %v3283_v15 = vpop.xlane.xlu0 %3282 }
0x162a   :  { %v3284_v16 = vsub.f32 %v3280_v63, %v3283_v15 }
0x162c   :  { %v3285_v17 = vmul.f32 1.442695, %v3284_v16 }
0x162d   :  { %v5619_v39 = vpop.permute.xlu0 %5618 }
0x162e   :  { %v5621_v19 = vunpack.i.h.bf16 %v5619_v39  ;;  %v5620_v20 = vunpack.i.l.bf16 %v5619_v39  ;;  %5700 = vpow2.f32 %v3285_v17 }
0x1630   :  { %v5476_v21 = vpack.c.bf16 %v5621_v19, %v5620_v20 }
0x1632   :  { %5478 = vmatpush3.bf16.xpose.msk.msra.mxu0 %vm6074_vm7, %v5476_v21 }
0x1633   :  { %5482 = vmatprep.subr.bf16.mxu0 %v5754_v18 }
0x1638   :  { %v5701_v22 = vpop.eup %5700 }
0x1639   :  { %v3287_v23 = vsel %vm2537_vm8, %v5701_v22, 0.0 }
0x163e   :  { %3288 = vadd.xlane.f32.xlu1 %v3287_v23 }
0x164f   :  { %5623 = vrot.lane.b32.xlu1 %v6070_v46, %s5742_s30  ;;  %s4766_s30 = sld [smem:[%s6370_s0 + %s5767_s27]]  }
0x1653   :  { %3941 = vrot.lane.b32.xlu1 %v6088_v53, %s5745_s3 }
0x1692   :  { %v3041_v26 = vpop.xlane.xlu1 %3040 }
0x1693   :  { %5702 = vrcp.f32 %v3041_v26 }
0x1696   :  { %v5614_v27 = vpop.permute.xlu1 %5613 }
0x1697   :  { %v5616_v29 = vunpack.i.h.bf16 %v5614_v27  ;;  %v5615_v30 = vunpack.i.l.bf16 %v5614_v27 }
0x1699   :  { %v5466_v42 = vpack.c.bf16 %v5616_v29, %v5615_v30 }
0x169a   :  { %v3694_v28 = vpop.permute.xlu1 %3693 }
0x169b   :  { %5290 = vmatmul.mubr.msk.f32.vlgmr.msra.gmra.mrb[38].mxu0 %vm291_vm2, %v3694_v28 }
0x169c   :  { %5308 = vmatprep.mubr.msk.f32.mxu0 %vm5731_vm1, %v5729_v0 }
0x169d   :  { %v5703_v31 = vpop.eup %5702 }
0x16cb   :  { %v3289_v49 = vpop.xlane.xlu1 %3288 }
0x16cf   :  { %v5624_v59 = vpop.permute.xlu1 %5623 }
0x16d0   :  { %v5626_v5 = vunpack.i.h.bf16 %v5624_v59  ;;  %v5625_v6 = vunpack.i.l.bf16 %v5624_v59 }
0x16d2   :  { %v5473_v11 = vpack.c.bf16 %v5626_v5, %v5625_v6 }
0x16d3   :  { %v3942_v62 = vpop.permute.xlu1 %3941 }
0x16d7   :  { %v3117_v33 = vpop.f32.mrb[34].mxu1  ;;  %v3523_v34 = vpop.f32.mrb[36].mxu0 }
0x16d8   :  { %v3122_v35 = vmul.f32 %v5703_v31, %v3117_v33  ;;  %v3527_v36 = vmul.f32 0.35355338, %v3523_v34  ;;  %v5241_v38 = vpop.f32.mrb[35].mxu1  ;;  %v5272_v41 = vpop.f32.mrb[37].mxu0 }
0x16da   :  { %5245 = vmatmul.mubr.msk.f32.vlgmr.msra.gmra.mrb[36].mxu1 %vm291_vm2, %v3122_v35  ;;  %v3528_v43 = vadd.f32 %v3527_v36, %v6106_v2 }
0x16db   :  { %5467 = vmatpush3.bf16.msra.mxu1 %v5466_v42  ;;  %5258 = vmatprep.mubr.msk.f32.mxu1 %vm5731_vm1, %v5729_v0 }
0x16dc   :  { %v3529_v44 = vsel %vm2537_vm8, %v3528_v43, -inf  ;;  %5261 = vmatprep.subr.mxu1 %v5729_v0 }
0x16dd   :  { %3530 = vmax.xlane.f32.xlu0 %v3529_v44  ;;  %v2452_v44 = vld [vmem:[%s6131_s24 + $0x28] sm:$0xff] }
0x16de   :  { %5259 = vmatmul.mubr.msk.f32.vlgmr.msra.gmra.mrb[38].mxu1 %vm2553_vm9, %v5701_v22 }
0x16df   :  { %5263 = vmatprep.mubr.msk.f32.mxu1 %vm5731_vm1, %v5729_v0  ;;  %5262 = vmatpush3.msra.mxu1 %v2450_v45 }
0x16e0   :  { %5472 = vmatprep.subr.bf16.mxu1 %v5754_v18 }
0x16f3   :  { %5628 = vrot.lane.b32.xlu0 %v6070_v46, %s5745_s3  ;;  %s4761_s3 = sld [smem:[%s6370_s0 + %s5761_s29]]  }
0x176a   :  { %v3531_v47 = vpop.xlane.xlu0 %3530 }
0x176b   :  { %v3532_v32 = vsub.f32 %v3528_v43, %v3531_v47 }
0x176d   :  { %v3533_v50 = vmul.f32 1.442695, %v3532_v32 }
0x176e   :  { %v5629_v51 = vpop.permute.xlu0 %5628  ;;  %v3771_v52 = vpop.f32.mrb[38].mxu0 }
0x176f   :  { %5704 = vpow2.f32 %v3533_v50  ;;  %v5631_v54 = vunpack.i.h.bf16 %v5629_v51  ;;  %v5630_v25 = vunpack.i.l.bf16 %v5629_v51  ;;  %v3775_v55 = vmul.f32 0.35355338, %v3771_v52  ;;  %v5291_v56 = vpop.f32.mrb[39].mxu0 }
0x1770   :  { %5706 = vrcp.f32 %v3289_v49 }
0x1771   :  { %v5483_v57 = vpack.c.bf16 %v5631_v54, %v5630_v25  ;;  %v3776_v58 = vadd.f32 %v3775_v55, %v6106_v2 }
0x1773   :  { %5485 = vmatpush3.bf16.xpose.msk.msra.mxu0 %vm6074_vm7, %v5483_v57  ;;  %v3777_v60 = vsel %vm2537_vm8, %v3776_v58, -inf }
0x1774   :  { %3778 = vmax.xlane.f32.xlu0 %v3777_v60  ;;  %5489 = vmatprep.subr.bf16.mxu0 %v5754_v18 }
0x1779   :  { %v5705_v61 = vpop.eup %5704 }
0x177a   :  { %5309 = vmatmul.mubr.msk.f32.vlgmr.msra.gmra.mrb[40].mxu0 %vm291_vm2, %v3942_v62  ;;  %v3535_v63 = vsel %vm2537_vm8, %v5705_v61, 0.0  ;;  %v5707_v7 = vpop.eup %5706 }
0x177b   :  { %3536 = vadd.xlane.f32.xlu1 %v3535_v63  ;;  %5327 = vmatprep.mubr.msk.f32.mxu0 %vm5731_vm1, %v5729_v0 }
0x178a   :  { %5633 = vrot.lane.b32.xlu0 %v6070_v46, %s5743_s1 }
0x178c   :  { %5638 = vrot.lane.b32.xlu1 %v6070_v46, %s5747_s5 }
0x1790   :  { %4189 = vrot.lane.b32.xlu1 %v6088_v53, %s5747_s5  ;;  %s5769_s5 = smov 26  }
0x1791   :  { %s4767_s6 = sld [smem:[%s6370_s0 + %s5769_s5]]  }
0x17ad   :  { %v3192_v1 = vpop.f32.mrb[36].mxu1 }
0x17ae   :  { %v3196_v3 = vadd.f32 %v3192_v1, %v6172_v10  ;;  %v5246_v4 = vpop.f32.mrb[37].mxu1 }
0x17b1   :  { %v3365_v37 = vpop.f32.mrb[38].mxu1 }
0x17b2   :  { %v3370_v8 = vmul.f32 %v5707_v7, %v3365_v37  ;;  %v5260_v9 = vpop.f32.mrb[39].mxu1  ;;  %v2453_v7 = vld [vmem:[%s6131_s24 + $0x30] sm:$0xff] }
0x17b4   :  { %5264 = vmatmul.mubr.msk.f32.vlgmr.msra.gmra.mrb[40].mxu1 %vm291_vm2, %v3370_v8 }
0x17b5   :  { %5474 = vmatpush3.bf16.msra.mxu1 %v5473_v11  ;;  %5277 = vmatprep.mubr.msk.f32.mxu1 %vm5731_vm1, %v5729_v0 }
0x17b6   :  { %5280 = vmatprep.subr.mxu1 %v5729_v0 }
0x17b8   :  { %5278 = vmatmul.mubr.msk.f32.vlgmr.msra.gmra.mrb[42].mxu1 %vm2553_vm9, %v5705_v61 }
0x17b9   :  { %5282 = vmatprep.mubr.msk.f32.mxu1 %vm5731_vm1, %v5729_v0  ;;  %5281 = vmatpush3.msra.mxu1 %v2451_v14 }
0x17ba   :  { %5479 = vmatprep.subr.bf16.mxu1 %v5754_v18 }
0x1801   :  { %v3779_v53 = vpop.xlane.xlu0 %3778 }
0x1802   :  { %v3780_v10 = vsub.f32 %v3776_v58, %v3779_v53 }
0x1804   :  { %v3781_v12 = vmul.f32 1.442695, %v3780_v10 }
0x1805   :  { %v5634_v48 = vpop.permute.xlu0 %5633 }
0x1806   :  { %5708 = vpow2.f32 %v3781_v12  ;;  %v5636_v31 = vunpack.i.h.bf16 %v5634_v48  ;;  %v5635_v33 = vunpack.i.l.bf16 %v5634_v48 }
0x1808   :  { %v3537_v13 = vpop.xlane.xlu1 %3536  ;;  %v5480_v41 = vpack.c.bf16 %v5636_v31, %v5635_v33 }
0x1809   :  { %5710 = vrcp.f32 %v3537_v13 }
0x180c   :  { %v5639_v15 = vpop.permute.xlu1 %5638 }
0x180d   :  { %v5641_v16 = vunpack.i.h.bf16 %v5639_v15  ;;  %v5640_v17 = vunpack.i.l.bf16 %v5639_v15 }
0x180f   :  { %v5490_v39 = vpack.c.bf16 %v5641_v16, %v5640_v17 }
0x1810   :  { %v5709_v19 = vpop.eup %5708  ;;  %v4190_v21 = vpop.permute.xlu1 %4189 }
0x1811   :  { %5492 = vmatpush3.bf16.xpose.msk.msra.mxu0 %vm6074_vm7, %v5490_v39  ;;  %v3783_v20 = vsel %vm2537_vm8, %v5709_v19, 0.0  ;;  %v2454_v39 = vld [vmem:[%s6131_s24 + $0x38] sm:$0xff] }
0x1812   :  { %3784 = vadd.xlane.f32.xlu1 %v3783_v20  ;;  %5496 = vmatprep.subr.bf16.mxu0 %v5754_v18 }
0x1813   :  { %v5711_v34 = vpop.eup %5710 }
0x1818   :  { %5328 = vmatmul.mubr.msk.f32.vlgmr.msra.gmra.mrb[42].mxu0 %vm291_vm2, %v4190_v21 }
0x1819   :  { %5358 = vmatprep.mubr.msk.f32.mxu0 %vm5731_vm1, %v5729_v0 }
0x184d   :  { %v4019_v22 = vpop.f32.mrb[40].mxu0 }
0x184e   :  { %v4023_v23 = vmul.f32 0.35355338, %v4019_v22  ;;  %v5310_v24 = vpop.f32.mrb[41].mxu0 }
0x1850   :  { %v4024_v26 = vadd.f32 %v4023_v23, %v6106_v2 }
0x1852   :  { %v4025_v27 = vsel %vm2537_vm8, %v4024_v26, -inf }
0x1853   :  { %4026 = vmax.xlane.f32.xlu0 %v4025_v27 }
0x1869   :  { %5643 = vrot.lane.b32.xlu0 %v6070_v46, %s5746_s4  ;;  %s5762_s4 = smov 22  }
0x186a   :  { %s6305_s26 = sld [smem:[%s6370_s0 + %s5762_s4]]  }
0x1887   :  { %v3440_v28 = vpop.f32.mrb[40].mxu1 }
0x1888   :  { %v3444_v29 = vadd.f32 %v3440_v28, %v3196_v3  ;;  %v5265_v30 = vpop.f32.mrb[41].mxu1  ;;  %v4863_v28 = vld [vmem:[%s4758_s28] ss:$0 sm:$0xff] }
0x188b   :  { %v3613_v35 = vpop.f32.mrb[42].mxu1 }
0x188c   :  { %v3618_v36 = vmul.f32 %v5711_v34, %v3613_v35  ;;  %v5279_v38 = vpop.f32.mrb[43].mxu1 }
0x188e   :  { %5283 = vmatmul.mubr.msk.f32.vlgmr.msra.gmra.mrb[44].mxu1 %vm291_vm2, %v3618_v36 }
0x188f   :  { %5481 = vmatpush3.bf16.msra.mxu1 %v5480_v41  ;;  %5296 = vmatprep.mubr.msk.f32.mxu1 %vm5731_vm1, %v5729_v0 }
0x1890   :  { %5299 = vmatprep.subr.mxu1 %v5729_v0 }
0x1892   :  { %5297 = vmatmul.mubr.msk.f32.vlgmr.msra.gmra.mrb[46].mxu1 %vm2553_vm9, %v5709_v19 }
0x1893   :  { %5301 = vmatprep.mubr.msk.f32.mxu1 %vm5731_vm1, %v5729_v0  ;;  %5300 = vmatpush3.msra.mxu1 %v2452_v44  ;;  %v4477_v44 = vld [vmem:[%s4761_s3 + $0x10] sm:$0xff] }
0x1894   :  { %5486 = vmatprep.subr.bf16.mxu1 %v5754_v18 }
0x189f   :  { %v3785_v25 = vpop.xlane.xlu1 %3784 }
0x18e0   :  { %v4027_v42 = vpop.xlane.xlu0 %4026 }
0x18e1   :  { %v4028_v43 = vsub.f32 %v4024_v26, %v4027_v42  ;;  %v4475_v42 = vld [vmem:[%s4761_s3] sm:$0xff] }
0x18e3   :  { %v4029_v45 = vmul.f32 1.442695, %v4028_v43 }
0x18e4   :  { %v5644_v55 = vpop.permute.xlu0 %5643 }
0x18e5   :  { %5712 = vpow2.f32 %v4029_v45  ;;  %v5646_v59 = vunpack.i.h.bf16 %v5644_v55  ;;  %v5645_v60 = vunpack.i.l.bf16 %v5644_v55  ;;  %v4478_v45 = vld [vmem:[%s4761_s3 + $0x18] sm:$0xff]  ;;  %v4565_v55 = vld [vmem:[%s6305_s26 + $0x8] sm:$0xff] }
0x18e6   :  { %5714 = vrcp.f32 %v3785_v25  ;;  %v4564_v25 = vld [vmem:[%s6305_s26] sm:$0xff] }
0x18e7   :  { %v5487_v1 = vpack.c.bf16 %v5646_v59, %v5645_v60  ;;  %v4568_v60 = vld [vmem:[%s6305_s26 + $0x20] sm:$0xff] }
0x18eb   :  { %v4267_v47 = vpop.f32.mrb[42].mxu0 }
0x18ec   :  { %v4271_v32 = vmul.f32 0.35355338, %v4267_v47  ;;  %v5329_v49 = vpop.f32.mrb[43].mxu0  ;;  %v5500_v47 = vpack.c.bf16 %v4478_v45, %v4477_v44  ;;  %v4870_v44 = vld [vmem:[%s4766_s30] ss:$0 sm:$0xff] }
0x18ed   :  { %v4480_v49 = vld [vmem:[%s4761_s3 + $0x28] sm:$0xff] }
0x18ee   :  { %v4272_v50 = vadd.f32 %v4271_v32, %v6106_v2  ;;  %v4479_v32 = vld [vmem:[%s4761_s3 + $0x20] sm:$0xff] }
0x18ef   :  { %v5713_v52 = vpop.eup %5712 }
0x18f0   :  { %v4273_v51 = vsel %vm2537_vm8, %v4272_v50, -inf  ;;  %v4031_v54 = vsel %vm2537_vm8, %v5713_v52, 0.0  ;;  %v5715_v61 = vpop.eup %5714 }
0x18f1   :  { %4274 = vmax.xlane.f32.xlu1 %v4273_v51  ;;  %v4481_v51 = vld [vmem:[%s4761_s3 + $0x30] sm:$0xff] }
0x18f5   :  { %4032 = vadd.xlane.f32.xlu1 %v4031_v54 }
0x1906   :  { %5648 = vrot.lane.b32.xlu1 %v6070_v46, %s5738_s23  ;;  %s4765_s23 = sld [smem:[%s6370_s0 + %s5743_s1]]   ;;  %s5768_s1 = smov 29  }
0x1907   :  { %s4770_s4 = sld [smem:[%s6370_s0 + %s5768_s1]]  }
0x1961   :  { %v3688_v56 = vpop.f32.mrb[44].mxu1 }
0x1962   :  { %v3692_v57 = vadd.f32 %v3688_v56, %v3444_v29  ;;  %v5284_v58 = vpop.f32.mrb[45].mxu1  ;;  %v4566_v56 = vld [vmem:[%s6305_s26 + $0x10] sm:$0xff] }
0x1963   :  { %v4567_v58 = vld [vmem:[%s6305_s26 + $0x18] sm:$0xff] }
0x1964   :  { %v5512_v59 = vpack.c.bf16 %v4567_v58, %v4566_v56 }
0x1965   :  { %v3861_v2 = vpop.f32.mrb[46].mxu1 }
0x1966   :  { %v3866_v62 = vmul.f32 %v5715_v61, %v3861_v2  ;;  %v5298_v63 = vpop.f32.mrb[47].mxu1  ;;  %v4569_v61 = vld [vmem:[%s6305_s26 + $0x28] sm:$0xff] }
0x1967   :  { %v5515_v2 = vpack.c.bf16 %v4569_v61, %v4568_v60  ;;  %v4571_v63 = vld [vmem:[%s6305_s26 + $0x38] sm:$0xff]  ;;  %v4872_v61 = vld [vmem:[%s4768_s10] ss:$0 sm:$0xff] }
0x1968   :  { %5302 = vmatmul.mubr.msk.f32.vlgmr.msra.gmra.mrb[48].mxu1 %vm291_vm2, %v3866_v62  ;;  %v4570_v62 = vld [vmem:[%s6305_s26 + $0x30] sm:$0xff] }
0x1969   :  { %5488 = vmatpush3.bf16.msra.mxu1 %v5487_v1  ;;  %5315 = vmatprep.mubr.msk.f32.mxu1 %vm5731_vm1, %v5729_v0  ;;  %v5518_v1 = vpack.c.bf16 %v4571_v63, %v4570_v62  ;;  %v4873_v62 = vld [vmem:[%s4769_s17] ss:$0 sm:$0xff] }
0x196a   :  { %5318 = vmatprep.subr.mxu1 %v5729_v0 }
0x196c   :  { %5316 = vmatmul.mubr.msk.f32.vlgmr.msra.gmra.mrb[50].mxu1 %vm2553_vm9, %v5713_v52  ;;  %v4482_v52 = vld [vmem:[%s4761_s3 + $0x38] sm:$0xff] }
0x196d   :  { %5320 = vmatprep.mubr.msk.f32.mxu1 %vm5731_vm1, %v5729_v0  ;;  %5319 = vmatpush3.msra.mxu1 %v2453_v7  ;;  %v5506_v54 = vpack.c.bf16 %v4482_v52, %v4481_v51 }
0x196e   :  { %5493 = vmatprep.subr.bf16.mxu1 %v5754_v18 }
0x197e   :  { %v4275_v46 = vpop.xlane.xlu1 %4274 }
0x197f   :  { %v4276_v3 = vsub.f32 %v4272_v50, %v4275_v46  ;;  %v5503_v50 = vpack.c.bf16 %v4480_v49, %v4479_v32  ;;  %v4572_v46 = vld [vmem:[%s6305_s26 + $0x40] sm:$0xff] }
0x1981   :  { %v4277_v4 = vmul.f32 1.442695, %v4276_v3  ;;  %v4573_v3 = vld [vmem:[%s6305_s26 + $0x48] sm:$0xff] }
0x1982   :  { %v4033_v37 = vpop.xlane.xlu1 %4032 }
0x1983   :  { %5716 = vpow2.f32 %v4277_v4  ;;  %v5521_v4 = vpack.c.bf16 %v4573_v3, %v4572_v46 }
0x1984   :  { %5718 = vrcp.f32 %v4033_v37  ;;  %v4576_v37 = vld [vmem:[%s6305_s26 + $0x60] sm:$0xff] }
0x1986   :  { %v5649_v8 = vpop.permute.xlu1 %5648 }
0x1987   :  { %v5651_v10 = vunpack.i.h.bf16 %v5649_v8  ;;  %v5650_v12 = vunpack.i.l.bf16 %v5649_v8  ;;  %v4577_v8 = vld [vmem:[%s6305_s26 + $0x68] sm:$0xff] }
0x1989   :  { %v5494_v17 = vpack.c.bf16 %v5651_v10, %v5650_v12 }
0x198d   :  { %v5717_v5 = vpop.eup %5716 }
0x198e   :  { %v4279_v6 = vsel %vm2537_vm8, %v5717_v5, 0.0  ;;  %v5719_v13 = vpop.eup %5718 }
0x198f   :  { %4280 = vadd.xlane.f32.xlu0 %v4279_v6  ;;  %v4575_v6 = vld [vmem:[%s6305_s26 + $0x58] sm:$0xff] }
0x1a1c   :  { %v4281_v19 = vpop.xlane.xlu0 %4280 }
0x1a1d   :  { %5720 = vrcp.f32 %v4281_v19 }
0x1a27   :  { %v5721_v23 = vpop.eup %5720 }
0x1a3b   :  { %v3936_v9 = vpop.f32.mrb[48].mxu1 }
0x1a3c   :  { %v3940_v11 = vadd.f32 %v3936_v9, %v3692_v57  ;;  %v5303_v53 = vpop.f32.mrb[49].mxu1  ;;  %v5509_v57 = vpack.c.bf16 %v4565_v55, %v4564_v25  ;;  %v5527_v9 = vpack.c.bf16 %v4577_v8, %v4576_v37  ;;  %v66_v25 = vstv %s4770_s4 }
0x1a3d   :  { %67 = vst [vmem:[#allocation2] sm:$0x1] %v66_v25 }
0x1a3f   :  { %v4109_v14 = vpop.f32.mrb[50].mxu1 }
0x1a40   :  { %v4114_v15 = vmul.f32 %v5719_v13, %v4109_v14  ;;  %v5317_v16 = vpop.f32.mrb[51].mxu1  ;;  %v4864_v13 = vld [vmem:[%s4759_s9] ss:$0 sm:$0xff] }
0x1a41   :  { %v4865_v14 = vld [vmem:[%s4760_s13] ss:$0 sm:$0xff] }
0x1a42   :  { %5321 = vmatmul.mubr.msk.f32.vlgmr.msra.gmra.mrb[52].mxu1 %vm291_vm2, %v4114_v15 }
0x1a43   :  { %5495 = vmatpush3.bf16.msra.mxu1 %v5494_v17  ;;  %5334 = vmatprep.mubr.msk.f32.mxu1 %vm5731_vm1, %v5729_v0  ;;  %v4578_v17 = vld [vmem:[%s6305_s26 + $0x70] sm:$0xff] }
0x1a44   :  { %5337 = vmatprep.subr.mxu1 %v5729_v0  ;;  %v4874_v3 = vld [vmem:[#allocation2] ss:$0 sm:$0xff] }
0x1a46   :  { %5335 = vmatmul.mubr.msk.f32.vlgmr.msra.gmra.mrb[54].mxu1 %vm2553_vm9, %v5717_v5  ;;  %v4574_v5 = vld [vmem:[%s6305_s26 + $0x50] sm:$0xff] }
0x1a47   :  { %5339 = vmatprep.mubr.msk.f32.mxu1 %vm5731_vm1, %v5729_v0  ;;  %5338 = vmatpush3.msra.mxu1 %v2454_v39  ;;  %v5524_v7 = vpack.c.bf16 %v4575_v6, %v4574_v5  ;;  %v4579_v39 = vld [vmem:[%s6305_s26 + $0x78] sm:$0xff] }
0x1a48   :  { %5508 = vmatprep.subr.bf16.mxu1 %v5754_v18  ;;  %v5530_v19 = vpack.c.bf16 %v4579_v39, %v4578_v17 }
0x1b15   :  { %v4184_v20 = vpop.f32.mrb[52].mxu1 }
0x1b16   :  { %v4188_v21 = vadd.f32 %v4184_v20, %v3940_v11  ;;  %v5322_v22 = vpop.f32.mrb[53].mxu1  ;;  %v4866_v20 = vld [vmem:[%s4762_s16] ss:$0 sm:$0xff] }
0x1b19   :  { %v4357_v24 = vpop.f32.mrb[54].mxu1 }
0x1b1a   :  { %v4362_v26 = vmul.f32 %v5721_v23, %v4357_v24  ;;  %v5336_v27 = vpop.f32.mrb[55].mxu1 }
0x1b1c   :  { %5340 = vmatmul.mubr.msk.f32.vlgmr.msra.gmra.mrb[56].mxu1 %vm291_vm2, %v4362_v26  ;;  %v4868_v26 = vld [vmem:[%s4764_s21] ss:$0 sm:$0xff] }
0x1b1d   :  { %5393 = vmatprep.mubr.msk.f32.mxu1 %vm5731_vm1, %v5729_v0  ;;  %5510 = vmatpush3.bf16.msra.mxu1 %v5509_v57 }
0x1b1e   :  { %5511 = vmatprep.subr.bf16.mxu1 %v5754_v18 }
0x1b21   :  { %5513 = vmatpush3.bf16.msra.mxu1 %v5512_v59  ;;  %v4871_v59 = vld [vmem:[%s4767_s6] ss:$0 sm:$0xff] }
0x1b22   :  { %5514 = vmatprep.subr.bf16.mxu1 %v5754_v18 }
0x1b25   :  { %5516 = vmatpush3.bf16.msra.mxu1 %v5515_v2 }
0x1b26   :  { %5517 = vmatprep.subr.bf16.mxu1 %v5754_v18 }
0x1b29   :  { %5519 = vmatpush3.bf16.msra.mxu1 %v5518_v1 }
0x1b2a   :  { %5520 = vmatprep.subr.bf16.mxu1 %v5754_v18 }
0x1b2d   :  { %5522 = vmatpush3.bf16.msra.mxu1 %v5521_v4 }
0x1b2e   :  { %5523 = vmatprep.subr.bf16.mxu1 %v5754_v18 }
0x1b31   :  { %5525 = vmatpush3.bf16.msra.mxu1 %v5524_v7 }
0x1b32   :  { %5526 = vmatprep.subr.bf16.mxu1 %v5754_v18 }
0x1b35   :  { %5528 = vmatpush3.bf16.msra.mxu1 %v5527_v9 }
0x1b36   :  { %5529 = vmatprep.subr.bf16.mxu1 %v5754_v18 }
0x1b39   :  { %5531 = vmatpush3.bf16.msra.mxu1 %v5530_v19 }
0x1bef   :  { %v4432_v48 = vpop.f32.mrb[56].mxu1 }
0x1bf0   :  { %v4436_v29 = vadd.f32 %v4432_v48, %v4188_v21  ;;  %v5341_v30 = vpop.f32.mrb[57].mxu1 }
0x1bf2   :  { %v4444_v31 = vadd.f32 %v4863_v28, %v4436_v29 }
0x1bf4   :  { %v4445_v33 = vadd.f32 %v4444_v31, %v6061_v40  ;;  %v4476_v40 = vld [vmem:[%s4761_s3 + $0x8] sm:$0xff] }
0x1bf5   :  { %v5497_v43 = vpack.c.bf16 %v4476_v40, %v4475_v42  ;;  %v4869_v40 = vld [vmem:[%s4765_s23] ss:$0 sm:$0xff] }
0x1bf6   :  { %v4448_v34 = vsel %vm2235_vm6, %v4445_v33, 0.0 }
0x1bf7   :  { %4449 = vadd.xlane.f32.xlu1 %v4448_v34  ;;  %5498 = vmatpush3.bf16.msra.mxu0 %v5497_v43 }
0x1bf8   :  { %5499 = vmatprep.subr.bf16.mxu0 %v5754_v18 }
0x1bfb   :  { %5501 = vmatpush3.bf16.msra.mxu0 %v5500_v47 }
0x1bfc   :  { %5502 = vmatprep.subr.bf16.mxu0 %v5754_v18 }
0x1bff   :  { %5504 = vmatpush3.bf16.msra.mxu0 %v5503_v50 }
0x1c00   :  { %5505 = vmatprep.subr.bf16.mxu0 %v5754_v18 }
0x1c03   :  { %5507 = vmatpush3.bf16.msra.mxu0 %v5506_v54 }
0x1c84   :  { %v4450_v35 = vpop.xlane.xlu1 %4449 }
0x1c85   :  { %v4451_v36 = vmul.f32 0.015625, %v4450_v35 }
0x1c87   :  { %v6291_v38 = vsub.f32 %v4445_v33, %v4451_v36 }
0x1c89   :  { %v4453_v0 = vmul.f32 %v6291_v38, %v6291_v38 }
0x1c8b   :  { %v4454_v41 = vsel %vm2235_vm6, %v4453_v0, 0.0 }
0x1c8c   :  { %4455 = vadd.xlane.f32.xlu0 %v4454_v41 }
0x1d19   :  { %v4456_v11 = vpop.xlane.xlu0 %4455 }
0x1d1a   :  { %v4457_v53 = vmul.f32 0.015625, %v4456_v11 }
0x1d1c   :  { %v4458_v10 = vadd.f32 1e-05, %v4457_v53 }
0x1d1e   :  { %5722 = vrsqrt.f32 %v4458_v10 }
0x1d28   :  { %v5723_v12 = vpop.eup %5722 }
0x1d29   :  { %v4460_v18 = vmul.f32 %v5723_v12, %v6291_v38 }
0x1d2b   :  { %v4467_v15 = vmul.f32 %v4864_v13, %v4460_v18 }
0x1d2d   :  { %v4474_v16 = vadd.f32 %v4865_v14, %v4467_v15 }
0x1d2f   :  { %5359 = vmatmul.mubr.msk.f32.vlgmr.msra.gmra.mrb[44].mxu0 %vm132_vm0, %v4474_v16 }
0x1e02   :  { %v4559_v21 = vpop.f32.mrb[44].mxu0 }
0x1e03   :  { %v4560_v22 = vadd.f32 %v4866_v20, %v4559_v21  ;;  %v5360_v23 = vpop.f32.mrb[45].mxu0 }
0x1e05   :  { %v4563_v24 = vmax.f32 %v4560_v22, 0.0 }
0x1e07   :  { %5394 = vmatmul.mubr.f32.vlgmr.msra.gmra.mrb[58].mxu1 %v4563_v24 }
0x1eda   :  { %v4653_v27 = vpop.f32.mrb[58].mxu1 }
0x1edb   :  { %v4654_v48 = vadd.f32 %v4868_v26, %v4653_v27  ;;  %v5395_v28 = vpop.f32.mrb[59].mxu1 }
0x1edd   :  { %v4657_v29 = vadd.f32 %v4654_v48, %v4474_v16 }
0x1edf   :  { %v4660_v30 = vsel %vm2235_vm6, %v4657_v29, 0.0 }
0x1ee0   :  { %4661 = vadd.xlane.f32.xlu0 %v4660_v30 }
0x1f6d   :  { %v4662_v31 = vpop.xlane.xlu0 %4661 }
0x1f6e   :  { %v4663_v33 = vmul.f32 0.015625, %v4662_v31 }
0x1f70   :  { %v4664_v34 = vsub.f32 %v4657_v29, %v4663_v33 }
0x1f72   :  { %v4665_v35 = vmul.f32 %v4664_v34, %v4664_v34 }
0x1f74   :  { %v4666_v36 = vsel %vm2235_vm6, %v4665_v35, 0.0 }
0x1f75   :  { %4667 = vadd.xlane.f32.xlu0 %v4666_v36 }
0x2002   :  { %v4668_v38 = vpop.xlane.xlu0 %4667 }
0x2003   :  { %v4669_v0 = vmul.f32 0.015625, %v4668_v38 }
0x2005   :  { %v4670_v41 = vadd.f32 1e-05, %v4669_v0 }
0x2007   :  { %5724 = vrsqrt.f32 %v4670_v41 }
0x2011   :  { %v5725_v42 = vpop.eup %5724 }
0x2012   :  { %v4672_v43 = vmul.f32 %v5725_v42, %v4664_v34 }
0x2014   :  { %v4679_v45 = vmul.f32 %v4869_v40, %v4672_v43 }
0x2016   :  { %v4686_v47 = vadd.f32 %v4870_v44, %v4679_v45 }
0x2018   :  { %v4689_v32 = vsel %vm2235_vm6, %v4686_v47, 0.0 }
0x2019   :  { %4690 = vadd.xlane.f32.xlu0 %v4689_v32 }
0x20a6   :  { %v4691_v49 = vpop.xlane.xlu0 %4690 }
0x20a7   :  { %v4692_v50 = vmul.f32 0.015625, %v4691_v49 }
0x20a9   :  { %v4693_v51 = vsub.f32 %v4686_v47, %v4692_v50 }
0x20ab   :  { %v4694_v52 = vmul.f32 %v4693_v51, %v4693_v51 }
0x20ad   :  { %v4695_v54 = vsel %vm2235_vm6, %v4694_v52, 0.0 }
0x20ae   :  { %4696 = vadd.xlane.f32.xlu1 %v4695_v54 }
0x213b   :  { %v4697_v55 = vpop.xlane.xlu1 %4696 }
0x213c   :  { %v4698_v56 = vmul.f32 0.015625, %v4697_v55 }
0x213e   :  { %v4699_v57 = vadd.f32 1e-05, %v4698_v56 }
0x2140   :  { %5726 = vrsqrt.f32 %v4699_v57 }
0x214a   :  { %v5727_v58 = vpop.eup %5726 }
0x214b   :  { %v4701_v60 = vmul.f32 %v5727_v58, %v4693_v51 }
0x214d   :  { %v4708_v2 = vmul.f32 %v4871_v59, %v4701_v60 }
0x214f   :  { %v4715_v63 = vadd.f32 %v4872_v61, %v4708_v2 }
0x2151   :  { %v4723_v1 = vmul.f32 %v4873_v62, %v4715_v63 }
0x2153   :  { %v4725_v46 = vsel %vm4724_vm10, %v4723_v1, 0.0 }
0x2154   :  { %4726 = vadd.xlane.f32.xlu0 %v4725_v46 }
0x21e1   :  { %v4727_v4 = vpop.xlane.xlu0 %4726 }
0x21e2   :  { %v4735_v5 = vadd.f32 %v4874_v3, %v4727_v4 }
0x21e4   :  { %4737 = vst.msk [vmem:[%s4771_s19] sm:$0x3] %vm4736_vm11, %v4735_v5 }

</bundles_post_ra>
